<compile_context>
chip_gen: v5e
topology: v5e:2x2
jax: 0.10.0
libtpu: 0.0.40
codegen_flags: <defaults>
</compile_context>

<pallas_src>
import math
from functools import partial

import jax
import jax.numpy as jnp
from jax.experimental import pallas as pl
from jax.experimental.pallas import tpu as pltpu


# ----------------------------- fused decoder layer -------------------------

def _decoder_layer_kernel(
    x_ref, mem_ref,
    wqkv_ref, bqkv_ref, wo1_ref, bo1_ref, g1_ref, be1_ref,
    wq2_ref, bq2_ref, wkv2_ref, bkv2_ref, wo2_ref, bo2_ref, g2_ref, be2_ref,
    w1_ref, b1_ref, w2_ref, b2_ref, g3_ref, be3_ref,
    o_ref, *, nhead,
):
    D = x_ref.shape[-1]
    Dh = D // nhead
    scale = 1.0 / math.sqrt(Dh)

    x = x_ref[0]        # (S, D)  f32
    mem = mem_ref[0]    # (Sm, D) f32

    def mm(a, w_ref, b_ref):
        # bf16 MXU matmul, f32 accumulate, f32 bias add
        return jnp.dot(a.astype(jnp.bfloat16), w_ref[...],
                       preferred_element_type=jnp.float32) + b_ref[...]

    def add_ln(res, y, g_ref, b_ref, eps=1e-5):
        # fused residual add + LayerNorm (torch unbiased=False semantics)
        v = res + y
        mu = jnp.mean(v, axis=-1, keepdims=True)
        vc = v - mu
        var = jnp.mean(vc * vc, axis=-1, keepdims=True)
        return vc * jax.lax.rsqrt(var + eps) * g_ref[...] + b_ref[...]

    def attend(q, k, v, causal):
        # q: (Sq, D), k/v: (Sk, D); heads sliced along the lane dim in-kernel.
        Sq, Sk = q.shape[0], k.shape[0]
        if causal:
            r = jax.lax.broadcasted_iota(jnp.int32, (Sq, Sk), 0)
            c = jax.lax.broadcasted_iota(jnp.int32, (Sq, Sk), 1)
            neg = jnp.where(c > r, jnp.float32(-1e30), jnp.float32(0.0))
        ctx = []
        for h in range(nhead):   # static unroll; data stays in vregs/VMEM
            qh = q[:, h * Dh:(h + 1) * Dh].astype(jnp.bfloat16)
            kh = k[:, h * Dh:(h + 1) * Dh].astype(jnp.bfloat16)
            vh = v[:, h * Dh:(h + 1) * Dh].astype(jnp.bfloat16)
            s = jax.lax.dot_general(
                qh, kh, (((1,), (1,)), ((), ())),     # q @ k.T on the MXU
                preferred_element_type=jnp.float32) * scale
            if causal:
                s = s + neg
            m = jnp.max(s, axis=-1, keepdims=True)
            p = jnp.exp(s - m)
            p = p * pl.reciprocal(jnp.sum(p, axis=-1, keepdims=True),
                                  approx=True)
            ctx.append(jnp.dot(p.astype(jnp.bfloat16), vh,
                               preferred_element_type=jnp.float32))
        return jnp.concatenate(ctx, axis=-1)          # (Sq, D)

    # --- masked self-attention (fused QKV) + add & LN ---
    qkv = mm(x, wqkv_ref, bqkv_ref)                   # (S, 3D)
    sa = attend(qkv[:, :D], qkv[:, D:2 * D], qkv[:, 2 * D:], causal=True)
    sa = mm(sa, wo1_ref, bo1_ref)
    x = add_ln(x, sa, g1_ref, be1_ref)

    # --- cross-attention on memory (fused KV) + add & LN ---
    q2 = mm(x, wq2_ref, bq2_ref)                      # (S, D)
    kv2 = mm(mem, wkv2_ref, bkv2_ref)                 # (Sm, 2D)
    ca = attend(q2, kv2[:, :D], kv2[:, D:], causal=False)
    ca = mm(ca, wo2_ref, bo2_ref)
    x = add_ln(x, ca, g2_ref, be2_ref)

    # --- ReLU FFN + add & LN ---
    h = jnp.maximum(mm(x, w1_ref, b1_ref), 0.0)
    ff = mm(h, w2_ref, b2_ref)
    x = add_ln(x, ff, g3_ref, be3_ref)

    o_ref[0] = x


def decoder_layer(x, memory, p, nhead):
    B, S, D = x.shape
    Sm = memory.shape[1]
    F = p["w1"].shape[1]
    d3, d2 = 3 * D, 2 * D

    def act_spec(slen):
        return pl.BlockSpec((1, slen, D), lambda b: (b, 0, 0))

    def full2(shape):
        return pl.BlockSpec(shape, lambda b: (0, 0))

    in_specs = [
        act_spec(S), act_spec(Sm),
        full2((D, d3)), full2((1, d3)), full2((D, D)), full2((1, D)),
        full2((1, D)), full2((1, D)),
        full2((D, D)), full2((1, D)), full2((D, d2)), full2((1, d2)),
        full2((D, D)), full2((1, D)),
        full2((1, D)), full2((1, D)),
        full2((D, F)), full2((1, F)), full2((F, D)), full2((1, D)),
        full2((1, D)), full2((1, D)),
    ]
    args = (
        x, memory,
        p["wqkv"], p["bqkv"], p["wo1"], p["bo1"], p["ln1_g"], p["ln1_b"],
        p["wq2"], p["bq2"], p["wkv2"], p["bkv2"], p["wo2"], p["bo2"],
        p["ln2_g"], p["ln2_b"],
        p["w1"], p["b1"], p["w2"], p["b2"], p["ln3_g"], p["ln3_b"],
    )
    return pl.pallas_call(
        partial(_decoder_layer_kernel, nhead=nhead),
        out_shape=jax.ShapeDtypeStruct((B, S, D), jnp.float32),
        grid=(B,),
        in_specs=in_specs,
        out_specs=act_spec(S),
        compiler_params=pltpu.CompilerParams(
            dimension_semantics=("parallel",),      # shards batch across v7x TCs
            vmem_limit_bytes=32 * 1024 * 1024),
    )(*args)


# --------------------------- tiled output projection ------------------------

def _linear_kernel(x_ref, w_ref, b_ref, o_ref):
    o_ref[...] = (jnp.dot(x_ref[...].astype(jnp.bfloat16), w_ref[...],
                          preferred_element_type=jnp.float32) + b_ref[...])


def linear(x2d, w_bf16, b2d, *, tm=256, tn=512):
    # Tiled over (M, N) with lane-dense output blocks; K (= d_model) kept
    # whole since it comfortably fits VMEM at realistic d_model.
    M, K = x2d.shape
    N = w_bf16.shape[1]
    tm_eff = M if M <= tm else tm          # tm multiple of 8 when tiling
    tn_eff = N if N <= tn else tn          # tn multiple of 128 when tiling
    grid = (pl.cdiv(M, tm_eff), pl.cdiv(N, tn_eff))
    return pl.pallas_call(
        _linear_kernel,
        out_shape=jax.ShapeDtypeStruct((M, N), jnp.float32),
        grid=grid,
        in_specs=[
            pl.BlockSpec((tm_eff, K), lambda i, j: (i, 0)),
            pl.BlockSpec((K, tn_eff), lambda i, j: (0, j)),
            pl.BlockSpec((1, tn_eff), lambda i, j: (0, j)),
        ],
        out_specs=pl.BlockSpec((tm_eff, tn_eff), lambda i, j: (i, j)),
        compiler_params=pltpu.CompilerParams(
            dimension_semantics=("parallel", "parallel"),
            vmem_limit_bytes=32 * 1024 * 1024),
    )(x2d, w_bf16, b2d)


# ------------------------------ model (glue) -------------------------------

def positional_encoding(max_len, d_model):
    position = jnp.arange(max_len, dtype=jnp.float32)[:, None]
    div_term = jnp.exp(jnp.arange(0, d_model, 2, dtype=jnp.float32)
                       * (-math.log(10000.0) / d_model))
    pe = jnp.zeros((max_len, d_model), jnp.float32)
    pe = pe.at[:, 0::2].set(jnp.sin(position * div_term))
    pe = pe.at[:, 1::2].set(jnp.cos(position * div_term))
    return pe[None]  # (1, max_len, d_model)


def transformer_decoder_forward(params, tgt_ids, memory, nhead):
    B, S = tgt_ids.shape
    D = params["embedding"].shape[1]
    # embedding gather + positional encoding add: plain XLA glue
    x = jnp.take(params["embedding"], tgt_ids, axis=0)
    x = x + params["pe"][:, :S, :]
    for lp in params["layers"]:
        x = decoder_layer(x, memory, lp, nhead)
    logits = linear(x.reshape(B * S, D), params["fc_w"], params["fc_b"])
    return logits.reshape(B, S, -1)


# ------------------------------ init & main --------------------------------

def init_params(key, vocab_size, d_model, num_layers, nhead, dff, max_len=64):
    D = d_model

    def dense(k, fan_in, fan_out):
        kw, kb = jax.random.split(k)
        lim = 1.0 / math.sqrt(fan_in)
        w = jax.random.uniform(kw, (fan_in, fan_out), jnp.float32, -lim, lim)
        b = jax.random.uniform(kb, (1, fan_out), jnp.float32, -lim, lim)
        return w.astype(jnp.bfloat16), b     # weights bf16 (MXU), biases f32

    keys = jax.random.split(key, 2 + num_layers)
    layers = []
    for l in range(num_layers):
        k = jax.random.split(keys[2 + l], 10)
        wq, bq = dense(k[0], D, D)
        wk, bk = dense(k[1], D, D)
        wv, bv = dense(k[2], D, D)
        wo1, bo1 = dense(k[3], D, D)
        wq2, bq2 = dense(k[4], D, D)
        wk2, bk2 = dense(k[5], D, D)
        wv2, bv2 = dense(k[6], D, D)
        wo2, bo2 = dense(k[7], D, D)
        w1, b1 = dense(k[8], D, dff)
        w2, b2 = dense(k[9], dff, D)
        layers.append(dict(
            wqkv=jnp.concatenate([wq, wk, wv], axis=1),
            bqkv=jnp.concatenate([bq, bk, bv], axis=1),
            wo1=wo1, bo1=bo1,
            wq2=wq2, bq2=bq2,
            wkv2=jnp.concatenate([wk2, wv2], axis=1),
            bkv2=jnp.concatenate([bk2, bv2], axis=1),
            wo2=wo2, bo2=bo2,
            w1=w1, b1=b1, w2=w2, b2=b2,
            ln1_g=jnp.ones((1, D), jnp.float32), ln1_b=jnp.zeros((1, D), jnp.float32),
            ln2_g=jnp.ones((1, D), jnp.float32), ln2_b=jnp.zeros((1, D), jnp.float32),
            ln3_g=jnp.ones((1, D), jnp.float32), ln3_b=jnp.zeros((1, D), jnp.float32),
        ))
    embedding = jax.random.normal(keys[0], (vocab_size, D), jnp.float32)
    fc_w, fc_b = dense(keys[1], D, vocab_size)
    return dict(embedding=embedding, pe=positional_encoding(max_len, D),
                layers=layers, fc_w=fc_w, fc_b=fc_b)


if __name__ == "__main__":
    vocab_size, d_model, num_layers, nhead, dff = 50, 32, 2, 4, 64
    B, S, Sm = 2, 8, 10

    key = jax.random.PRNGKey(0)
    kp, kt, km = jax.random.split(key, 3)
    params = init_params(kp, vocab_size, d_model, num_layers, nhead, dff)
    tgt = jax.random.randint(kt, (B, S), 0, vocab_size, dtype=jnp.int32)
    memory = jax.random.normal(km, (B, Sm, d_model), jnp.float32)

    fwd = jax.jit(partial(transformer_decoder_forward, nhead=nhead))
    out = fwd(params, tgt, memory)
    jax.block_until_ready(out)
    assert out.shape == (B, S, vocab_size)
    assert bool(jnp.all(jnp.isfinite(out)))
    print("KERNEL_OK")
</pallas_src>

<mosaic_0001>
module attributes {stable_mosaic.version = 11 : i64} {
  func.func @_linear_kernel(%arg0: i32, %arg1: i32, %arg2: memref<16x32xf32, #tpu.memory_space<vmem>>, %arg3: memref<32x50xbf16, #tpu.memory_space<vmem>>, %arg4: memref<1x50xf32, #tpu.memory_space<vmem>>, %arg5: memref<16x50xf32, #tpu.memory_space<vmem>>) attributes {dimension_semantics = [#tpu.dimension_semantics<parallel>, #tpu.dimension_semantics<parallel>], iteration_bounds = array<i64: 1, 1>, scalar_prefetch = 0 : i64, scratch_operands = 0 : i64, tpu.core_type = #tpu.core_type<tc>, window_params = [{transform_indices = @transform_0, window_bounds = array<i64: 16, 32>}, {transform_indices = @transform_1, window_bounds = array<i64: 32, 50>}, {transform_indices = @transform_2, window_bounds = array<i64: 1, 50>}, {transform_indices = @transform_3, window_bounds = array<i64: 16, 50>}]} {
    %c0 = arith.constant 0 : index
    %c0_0 = arith.constant 0 : index
    %0 = vector.load %arg2[%c0, %c0_0] : memref<16x32xf32, #tpu.memory_space<vmem>>, vector<16x32xf32>
    %1 = arith.truncf %0 : vector<16x32xf32> to vector<16x32xbf16>
    %c0_1 = arith.constant 0 : index
    %c0_2 = arith.constant 0 : index
    %2 = vector.load %arg3[%c0_1, %c0_2] : memref<32x50xbf16, #tpu.memory_space<vmem>>, vector<32x50xbf16>
    %cst = arith.constant dense<0.000000e+00> : vector<16x50xf32>
    %3 = tpu.matmul %1, %2, %cst {dimension_numbers = #tpu.dot_dimension_numbers<[1], [0], [0], [1], [0, 0, 1, 1], [], []>} : vector<16x32xbf16>, vector<32x50xbf16>, vector<16x50xf32> -> vector<16x50xf32>
    %c0_3 = arith.constant 0 : index
    %c0_4 = arith.constant 0 : index
    %4 = vector.load %arg4[%c0_3, %c0_4] : memref<1x50xf32, #tpu.memory_space<vmem>>, vector<1x50xf32>
    %5 = vector.broadcast %4 : vector<1x50xf32> to vector<16x50xf32>
    %6 = arith.addf %3, %5 : vector<16x50xf32>
    %c0_5 = arith.constant 0 : index
    %c0_6 = arith.constant 0 : index
    %7 = vector.load %arg5[%c0_5, %c0_6] : memref<16x50xf32, #tpu.memory_space<vmem>>, vector<16x50xf32>
    tpu.vector_store %arg5[%c0_5, %c0_6], %6 {strides = array<i32>} : memref<16x50xf32, #tpu.memory_space<vmem>>, vector<16x50xf32>,
    return
  }
  func.func @transform_0(%arg0: i32, %arg1: i32) -> (i32, i32) {
    %c0_i32 = arith.constant 0 : i32
    %c0_i32_0 = arith.constant 0 : i32
    return %arg0, %c0_i32 : i32, i32
  }
  func.func @transform_1(%arg0: i32, %arg1: i32) -> (i32, i32) {
    %c0_i32 = arith.constant 0 : i32
    %c0_i32_0 = arith.constant 0 : i32
    return %c0_i32, %arg1 : i32, i32
  }
  func.func @transform_2(%arg0: i32, %arg1: i32) -> (i32, i32) {
    %c0_i32 = arith.constant 0 : i32
    %c0_i32_0 = arith.constant 0 : i32
    return %c0_i32, %arg1 : i32, i32
  }
  func.func @transform_3(%arg0: i32, %arg1: i32) -> (i32, i32) {
    %c0_i32 = arith.constant 0 : i32
    return %arg0, %arg1 : i32, i32
  }
}

module attributes {stable_mosaic.version = 11 : i64} {
  func.func @_decoder_layer_kernel(%arg0: i32, %arg1: memref<1x8x32xf32, #tpu.memory_space<vmem>>, %arg2: memref<1x10x32xf32, #tpu.memory_space<vmem>>, %arg3: memref<32x96xbf16, #tpu.memory_space<vmem>>, %arg4: memref<1x96xf32, #tpu.memory_space<vmem>>, %arg5: memref<32x32xbf16, #tpu.memory_space<vmem>>, %arg6: memref<1x32xf32, #tpu.memory_space<vmem>>, %arg7: memref<1x32xf32, #tpu.memory_space<vmem>>, %arg8: memref<1x32xf32, #tpu.memory_space<vmem>>, %arg9: memref<32x32xbf16, #tpu.memory_space<vmem>>, %arg10: memref<1x32xf32, #tpu.memory_space<vmem>>, %arg11: memref<32x64xbf16, #tpu.memory_space<vmem>>, %arg12: memref<1x64xf32, #tpu.memory_space<vmem>>, %arg13: memref<32x32xbf16, #tpu.memory_space<vmem>>, %arg14: memref<1x32xf32, #tpu.memory_space<vmem>>, %arg15: memref<1x32xf32, #tpu.memory_space<vmem>>, %arg16: memref<1x32xf32, #tpu.memory_space<vmem>>, %arg17: memref<32x64xbf16, #tpu.memory_space<vmem>>, %arg18: memref<1x64xf32, #tpu.memory_space<vmem>>, %arg19: memref<64x32xbf16, #tpu.memory_space<vmem>>, %arg20: memref<1x32xf32, #tpu.memory_space<vmem>>, %arg21: memref<1x32xf32, #tpu.memory_space<vmem>>, %arg22: memref<1x32xf32, #tpu.memory_space<vmem>>, %arg23: memref<1x8x32xf32, #tpu.memory_space<vmem>>) attributes {dimension_semantics = [#tpu.dimension_semantics<parallel>], iteration_bounds = array<i64: 2>, scalar_prefetch = 0 : i64, scratch_operands = 0 : i64, tpu.core_type = #tpu.core_type<tc>, window_params = [{transform_indices = @transform_0, window_bounds = array<i64: 1, 8, 32>}, {transform_indices = @transform_1, window_bounds = array<i64: 1, 10, 32>}, {pipeline_mode = #tpu.pipeline_mode<synchronous>, transform_indices = @transform_2, window_bounds = array<i64: 32, 96>}, {pipeline_mode = #tpu.pipeline_mode<synchronous>, transform_indices = @transform_3, window_bounds = array<i64: 1, 96>}, {pipeline_mode = #tpu.pipeline_mode<synchronous>, transform_indices = @transform_4, window_bounds = array<i64: 32, 32>}, {pipeline_mode = #tpu.pipeline_mode<synchronous>, transform_indices = @transform_5, window_bounds = array<i64: 1, 32>}, {pipeline_mode = #tpu.pipeline_mode<synchronous>, transform_indices = @transform_6, window_bounds = array<i64: 1, 32>}, {pipeline_mode = #tpu.pipeline_mode<synchronous>, transform_indices = @transform_7, window_bounds = array<i64: 1, 32>}, {pipeline_mode = #tpu.pipeline_mode<synchronous>, transform_indices = @transform_8, window_bounds = array<i64: 32, 32>}, {pipeline_mode = #tpu.pipeline_mode<synchronous>, transform_indices = @transform_9, window_bounds = array<i64: 1, 32>}, {pipeline_mode = #tpu.pipeline_mode<synchronous>, transform_indices = @transform_10, window_bounds = array<i64: 32, 64>}, {pipeline_mode = #tpu.pipeline_mode<synchronous>, transform_indices = @transform_11, window_bounds = array<i64: 1, 64>}, {pipeline_mode = #tpu.pipeline_mode<synchronous>, transform_indices = @transform_12, window_bounds = array<i64: 32, 32>}, {pipeline_mode = #tpu.pipeline_mode<synchronous>, transform_indices = @transform_13, window_bounds = array<i64: 1, 32>}, {pipeline_mode = #tpu.pipeline_mode<synchronous>, transform_indices = @transform_14, window_bounds = array<i64: 1, 32>}, {pipeline_mode = #tpu.pipeline_mode<synchronous>, transform_indices = @transform_15, window_bounds = array<i64: 1, 32>}, {pipeline_mode = #tpu.pipeline_mode<synchronous>, transform_indices = @transform_16, window_bounds = array<i64: 32, 64>}, {pipeline_mode = #tpu.pipeline_mode<synchronous>, transform_indices = @transform_17, window_bounds = array<i64: 1, 64>}, {pipeline_mode = #tpu.pipeline_mode<synchronous>, transform_indices = @transform_18, window_bounds = array<i64: 64, 32>}, {pipeline_mode = #tpu.pipeline_mode<synchronous>, transform_indices = @transform_19, window_bounds = array<i64: 1, 32>}, {pipeline_mode = #tpu.pipeline_mode<synchronous>, transform_indices = @transform_20, window_bounds = array<i64: 1, 32>}, {pipeline_mode = #tpu.pipeline_mode<synchronous>, transform_indices = @transform_21, window_bounds = array<i64: 1, 32>}, {transform_indices = @transform_22, window_bounds = array<i64: 1, 8, 32>}]} {
    %c0 = arith.constant 0 : index
    %c0_0 = arith.constant 0 : index
    %c0_1 = arith.constant 0 : index
    %0 = vector.load %arg1[%c0, %c0_0, %c0_1] : memref<1x8x32xf32, #tpu.memory_space<vmem>>, vector<1x8x32xf32>
    %1 = vector.shape_cast %0 : vector<1x8x32xf32> to vector<8x32xf32>
    %c0_2 = arith.constant 0 : index
    %c0_3 = arith.constant 0 : index
    %c0_4 = arith.constant 0 : index
    %2 = vector.load %arg2[%c0_2, %c0_3, %c0_4] : memref<1x10x32xf32, #tpu.memory_space<vmem>>, vector<1x10x32xf32>
    %3 = vector.shape_cast %2 : vector<1x10x32xf32> to vector<10x32xf32>
    %4 = arith.truncf %1 : vector<8x32xf32> to vector<8x32xbf16>
    %c0_5 = arith.constant 0 : index
    %c0_6 = arith.constant 0 : index
    %5 = vector.load %arg3[%c0_5, %c0_6] : memref<32x96xbf16, #tpu.memory_space<vmem>>, vector<32x96xbf16>
    %cst = arith.constant dense<0.000000e+00> : vector<8x96xf32>
    %6 = tpu.matmul %4, %5, %cst {dimension_numbers = #tpu.dot_dimension_numbers<[1], [0], [0], [1], [0, 0, 1, 1], [], []>} : vector<8x32xbf16>, vector<32x96xbf16>, vector<8x96xf32> -> vector<8x96xf32>
    %c0_7 = arith.constant 0 : index
    %c0_8 = arith.constant 0 : index
    %7 = vector.load %arg4[%c0_7, %c0_8] : memref<1x96xf32, #tpu.memory_space<vmem>>, vector<1x96xf32>
    %8 = vector.broadcast %7 : vector<1x96xf32> to vector<8x96xf32>
    %9 = arith.addf %6, %8 : vector<8x96xf32>
    %10 = vector.extract_strided_slice %9 {offsets = [0, 0], sizes = [8, 32], strides = [1, 1]} : vector<8x96xf32> to vector<8x32xf32>
    %11 = vector.extract_strided_slice %9 {offsets = [0, 32], sizes = [8, 32], strides = [1, 1]} : vector<8x96xf32> to vector<8x32xf32>
    %12 = vector.extract_strided_slice %9 {offsets = [0, 64], sizes = [8, 32], strides = [1, 1]} : vector<8x96xf32> to vector<8x32xf32>
    %13 = tpu.iota {dimensions = array<i32: 0>} : vector<8x8xi32>
    %14 = tpu.iota {dimensions = array<i32: 1>} : vector<8x8xi32>
    %15 = arith.cmpi sgt, %14, %13 : vector<8x8xi32>
    %cst_9 = arith.constant -1.000000e+30 : f32
    %cst_10 = arith.constant 0.000000e+00 : f32
    %16 = vector.broadcast %cst_9 : f32 to vector<8x8xf32>
    %17 = vector.broadcast %cst_10 : f32 to vector<8x8xf32>
    %18 = arith.select %15, %16, %17 : vector<8x8xi1>, vector<8x8xf32>
    %19 = vector.extract_strided_slice %10 {offsets = [0, 0], sizes = [8, 8], strides = [1, 1]} : vector<8x32xf32> to vector<8x8xf32>
    %20 = arith.truncf %19 : vector<8x8xf32> to vector<8x8xbf16>
    %21 = vector.extract_strided_slice %11 {offsets = [0, 0], sizes = [8, 8], strides = [1, 1]} : vector<8x32xf32> to vector<8x8xf32>
    %22 = arith.truncf %21 : vector<8x8xf32> to vector<8x8xbf16>
    %23 = vector.extract_strided_slice %12 {offsets = [0, 0], sizes = [8, 8], strides = [1, 1]} : vector<8x32xf32> to vector<8x8xf32>
    %24 = arith.truncf %23 : vector<8x8xf32> to vector<8x8xbf16>
    %cst_11 = arith.constant dense<0.000000e+00> : vector<8x8xf32>
    %25 = tpu.matmul %20, %22, %cst_11 {dimension_numbers = #tpu.dot_dimension_numbers<[1], [1], [0], [0], [0, 0, 1, 0], [], []>} : vector<8x8xbf16>, vector<8x8xbf16>, vector<8x8xf32> -> vector<8x8xf32>
    %cst_12 = arith.constant 0.353553385 : f32
    %26 = vector.broadcast %cst_12 : f32 to vector<8x8xf32>
    %27 = arith.mulf %25, %26 : vector<8x8xf32>
    %28 = arith.addf %27, %18 : vector<8x8xf32>
    %cst_13 = arith.constant dense<0xFF800000> : vector<8xf32>
    %29 = vector.multi_reduction <maximumf>, %28, %cst_13 [1] : vector<8x8xf32> to vector<8xf32>
    %30 = vector.shape_cast %29 : vector<8xf32> to vector<8x1xf32>
    %31 = vector.broadcast %30 : vector<8x1xf32> to vector<8x8xf32>
    %32 = arith.subf %28, %31 : vector<8x8xf32>
    %33 = math.exp %32 : vector<8x8xf32>
    %cst_14 = arith.constant dense<0.000000e+00> : vector<8xf32>
    %34 = vector.multi_reduction <add>, %33, %cst_14 [1] : vector<8x8xf32> to vector<8xf32>
    %35 = vector.shape_cast %34 : vector<8xf32> to vector<8x1xf32>
    %36 = tpu.reciprocal %35 {approx = true} : vector<8x1xf32> -> vector<8x1xf32>
    %37 = vector.broadcast %36 : vector<8x1xf32> to vector<8x8xf32>
    %38 = arith.mulf %33, %37 : vector<8x8xf32>
    %39 = arith.truncf %38 : vector<8x8xf32> to vector<8x8xbf16>
    %cst_15 = arith.constant dense<0.000000e+00> : vector<8x8xf32>
    %40 = tpu.matmul %39, %24, %cst_15 {dimension_numbers = #tpu.dot_dimension_numbers<[1], [0], [0], [1], [0, 0, 1, 1], [], []>} : vector<8x8xbf16>, vector<8x8xbf16>, vector<8x8xf32> -> vector<8x8xf32>
    %41 = vector.extract_strided_slice %10 {offsets = [0, 8], sizes = [8, 8], strides = [1, 1]} : vector<8x32xf32> to vector<8x8xf32>
    %42 = arith.truncf %41 : vector<8x8xf32> to vector<8x8xbf16>
    %43 = vector.extract_strided_slice %11 {offsets = [0, 8], sizes = [8, 8], strides = [1, 1]} : vector<8x32xf32> to vector<8x8xf32>
    %44 = arith.truncf %43 : vector<8x8xf32> to vector<8x8xbf16>
    %45 = vector.extract_strided_slice %12 {offsets = [0, 8], sizes = [8, 8], strides = [1, 1]} : vector<8x32xf32> to vector<8x8xf32>
    %46 = arith.truncf %45 : vector<8x8xf32> to vector<8x8xbf16>
    %cst_16 = arith.constant dense<0.000000e+00> : vector<8x8xf32>
    %47 = tpu.matmul %42, %44, %cst_16 {dimension_numbers = #tpu.dot_dimension_numbers<[1], [1], [0], [0], [0, 0, 1, 0], [], []>} : vector<8x8xbf16>, vector<8x8xbf16>, vector<8x8xf32> -> vector<8x8xf32>
    %cst_17 = arith.constant 0.353553385 : f32
    %48 = vector.broadcast %cst_17 : f32 to vector<8x8xf32>
    %49 = arith.mulf %47, %48 : vector<8x8xf32>
    %50 = arith.addf %49, %18 : vector<8x8xf32>
    %cst_18 = arith.constant dense<0xFF800000> : vector<8xf32>
    %51 = vector.multi_reduction <maximumf>, %50, %cst_18 [1] : vector<8x8xf32> to vector<8xf32>
    %52 = vector.shape_cast %51 : vector<8xf32> to vector<8x1xf32>
    %53 = vector.broadcast %52 : vector<8x1xf32> to vector<8x8xf32>
    %54 = arith.subf %50, %53 : vector<8x8xf32>
    %55 = math.exp %54 : vector<8x8xf32>
    %cst_19 = arith.constant dense<0.000000e+00> : vector<8xf32>
    %56 = vector.multi_reduction <add>, %55, %cst_19 [1] : vector<8x8xf32> to vector<8xf32>
    %57 = vector.shape_cast %56 : vector<8xf32> to vector<8x1xf32>
    %58 = tpu.reciprocal %57 {approx = true} : vector<8x1xf32> -> vector<8x1xf32>
    %59 = vector.broadcast %58 : vector<8x1xf32> to vector<8x8xf32>
    %60 = arith.mulf %55, %59 : vector<8x8xf32>
    %61 = arith.truncf %60 : vector<8x8xf32> to vector<8x8xbf16>
    %cst_20 = arith.constant dense<0.000000e+00> : vector<8x8xf32>
    %62 = tpu.matmul %61, %46, %cst_20 {dimension_numbers = #tpu.dot_dimension_numbers<[1], [0], [0], [1], [0, 0, 1, 1], [], []>} : vector<8x8xbf16>, vector<8x8xbf16>, vector<8x8xf32> -> vector<8x8xf32>
    %63 = vector.extract_strided_slice %10 {offsets = [0, 16], sizes = [8, 8], strides = [1, 1]} : vector<8x32xf32> to vector<8x8xf32>
    %64 = arith.truncf %63 : vector<8x8xf32> to vector<8x8xbf16>
    %65 = vector.extract_strided_slice %11 {offsets = [0, 16], sizes = [8, 8], strides = [1, 1]} : vector<8x32xf32> to vector<8x8xf32>
    %66 = arith.truncf %65 : vector<8x8xf32> to vector<8x8xbf16>
    %67 = vector.extract_strided_slice %12 {offsets = [0, 16], sizes = [8, 8], strides = [1, 1]} : vector<8x32xf32> to vector<8x8xf32>
    %68 = arith.truncf %67 : vector<8x8xf32> to vector<8x8xbf16>
    %cst_21 = arith.constant dense<0.000000e+00> : vector<8x8xf32>
    %69 = tpu.matmul %64, %66, %cst_21 {dimension_numbers = #tpu.dot_dimension_numbers<[1], [1], [0], [0], [0, 0, 1, 0], [], []>} : vector<8x8xbf16>, vector<8x8xbf16>, vector<8x8xf32> -> vector<8x8xf32>
    %cst_22 = arith.constant 0.353553385 : f32
    %70 = vector.broadcast %cst_22 : f32 to vector<8x8xf32>
    %71 = arith.mulf %69, %70 : vector<8x8xf32>
    %72 = arith.addf %71, %18 : vector<8x8xf32>
    %cst_23 = arith.constant dense<0xFF800000> : vector<8xf32>
    %73 = vector.multi_reduction <maximumf>, %72, %cst_23 [1] : vector<8x8xf32> to vector<8xf32>
    %74 = vector.shape_cast %73 : vector<8xf32> to vector<8x1xf32>
    %75 = vector.broadcast %74 : vector<8x1xf32> to vector<8x8xf32>
    %76 = arith.subf %72, %75 : vector<8x8xf32>
    %77 = math.exp %76 : vector<8x8xf32>
    %cst_24 = arith.constant dense<0.000000e+00> : vector<8xf32>
    %78 = vector.multi_reduction <add>, %77, %cst_24 [1] : vector<8x8xf32> to vector<8xf32>
    %79 = vector.shape_cast %78 : vector<8xf32> to vector<8x1xf32>
    %80 = tpu.reciprocal %79 {approx = true} : vector<8x1xf32> -> vector<8x1xf32>
    %81 = vector.broadcast %80 : vector<8x1xf32> to vector<8x8xf32>
    %82 = arith.mulf %77, %81 : vector<8x8xf32>
    %83 = arith.truncf %82 : vector<8x8xf32> to vector<8x8xbf16>
    %cst_25 = arith.constant dense<0.000000e+00> : vector<8x8xf32>
    %84 = tpu.matmul %83, %68, %cst_25 {dimension_numbers = #tpu.dot_dimension_numbers<[1], [0], [0], [1], [0, 0, 1, 1], [], []>} : vector<8x8xbf16>, vector<8x8xbf16>, vector<8x8xf32> -> vector<8x8xf32>
    %85 = vector.extract_strided_slice %10 {offsets = [0, 24], sizes = [8, 8], strides = [1, 1]} : vector<8x32xf32> to vector<8x8xf32>
    %86 = arith.truncf %85 : vector<8x8xf32> to vector<8x8xbf16>
    %87 = vector.extract_strided_slice %11 {offsets = [0, 24], sizes = [8, 8], strides = [1, 1]} : vector<8x32xf32> to vector<8x8xf32>
    %88 = arith.truncf %87 : vector<8x8xf32> to vector<8x8xbf16>
    %89 = vector.extract_strided_slice %12 {offsets = [0, 24], sizes = [8, 8], strides = [1, 1]} : vector<8x32xf32> to vector<8x8xf32>
    %90 = arith.truncf %89 : vector<8x8xf32> to vector<8x8xbf16>
    %cst_26 = arith.constant dense<0.000000e+00> : vector<8x8xf32>
    %91 = tpu.matmul %86, %88, %cst_26 {dimension_numbers = #tpu.dot_dimension_numbers<[1], [1], [0], [0], [0, 0, 1, 0], [], []>} : vector<8x8xbf16>, vector<8x8xbf16>, vector<8x8xf32> -> vector<8x8xf32>
    %cst_27 = arith.constant 0.353553385 : f32
    %92 = vector.broadcast %cst_27 : f32 to vector<8x8xf32>
    %93 = arith.mulf %91, %92 : vector<8x8xf32>
    %94 = arith.addf %93, %18 : vector<8x8xf32>
    %cst_28 = arith.constant dense<0xFF800000> : vector<8xf32>
    %95 = vector.multi_reduction <maximumf>, %94, %cst_28 [1] : vector<8x8xf32> to vector<8xf32>
    %96 = vector.shape_cast %95 : vector<8xf32> to vector<8x1xf32>
    %97 = vector.broadcast %96 : vector<8x1xf32> to vector<8x8xf32>
    %98 = arith.subf %94, %97 : vector<8x8xf32>
    %99 = math.exp %98 : vector<8x8xf32>
    %cst_29 = arith.constant dense<0.000000e+00> : vector<8xf32>
    %100 = vector.multi_reduction <add>, %99, %cst_29 [1] : vector<8x8xf32> to vector<8xf32>
    %101 = vector.shape_cast %100 : vector<8xf32> to vector<8x1xf32>
    %102 = tpu.reciprocal %101 {approx = true} : vector<8x1xf32> -> vector<8x1xf32>
    %103 = vector.broadcast %102 : vector<8x1xf32> to vector<8x8xf32>
    %104 = arith.mulf %99, %103 : vector<8x8xf32>
    %105 = arith.truncf %104 : vector<8x8xf32> to vector<8x8xbf16>
    %cst_30 = arith.constant dense<0.000000e+00> : vector<8x8xf32>
    %106 = tpu.matmul %105, %90, %cst_30 {dimension_numbers = #tpu.dot_dimension_numbers<[1], [0], [0], [1], [0, 0, 1, 1], [], []>} : vector<8x8xbf16>, vector<8x8xbf16>, vector<8x8xf32> -> vector<8x8xf32>
    %107 = tpu.concatenate %40, %62, %84, %106 in 1 : vector<8x8xf32>, vector<8x8xf32>, vector<8x8xf32>, vector<8x8xf32> -> vector<8x32xf32>
    %108 = arith.truncf %107 : vector<8x32xf32> to vector<8x32xbf16>
    %c0_31 = arith.constant 0 : index
    %c0_32 = arith.constant 0 : index
    %109 = vector.load %arg5[%c0_31, %c0_32] : memref<32x32xbf16, #tpu.memory_space<vmem>>, vector<32x32xbf16>
    %cst_33 = arith.constant dense<0.000000e+00> : vector<8x32xf32>
    %110 = tpu.matmul %108, %109, %cst_33 {dimension_numbers = #tpu.dot_dimension_numbers<[1], [0], [0], [1], [0, 0, 1, 1], [], []>} : vector<8x32xbf16>, vector<32x32xbf16>, vector<8x32xf32> -> vector<8x32xf32>
    %c0_34 = arith.constant 0 : index
    %c0_35 = arith.constant 0 : index
    %111 = vector.load %arg6[%c0_34, %c0_35] : memref<1x32xf32, #tpu.memory_space<vmem>>, vector<1x32xf32>
    %112 = vector.broadcast %111 : vector<1x32xf32> to vector<8x32xf32>
    %113 = arith.addf %110, %112 : vector<8x32xf32>
    %114 = arith.addf %1, %113 : vector<8x32xf32>
    %cst_36 = arith.constant dense<0.000000e+00> : vector<8xf32>
    %115 = vector.multi_reduction <add>, %114, %cst_36 [1] : vector<8x32xf32> to vector<8xf32>
    %116 = vector.shape_cast %115 : vector<8xf32> to vector<8x1xf32>
    %cst_37 = arith.constant 3.200000e+01 : f32
    %117 = vector.broadcast %cst_37 : f32 to vector<8x1xf32>
    %118 = arith.divf %116, %117 : vector<8x1xf32>
    %119 = vector.broadcast %118 : vector<8x1xf32> to vector<8x32xf32>
    %120 = arith.subf %114, %119 : vector<8x32xf32>
    %121 = arith.mulf %120, %120 : vector<8x32xf32>
    %cst_38 = arith.constant dense<0.000000e+00> : vector<8xf32>
    %122 = vector.multi_reduction <add>, %121, %cst_38 [1] : vector<8x32xf32> to vector<8xf32>
    %123 = vector.shape_cast %122 : vector<8xf32> to vector<8x1xf32>
    %cst_39 = arith.constant 3.200000e+01 : f32
    %124 = vector.broadcast %cst_39 : f32 to vector<8x1xf32>
    %125 = arith.divf %123, %124 : vector<8x1xf32>
    %cst_40 = arith.constant 9.99999974E-6 : f32
    %126 = vector.broadcast %cst_40 : f32 to vector<8x1xf32>
    %127 = arith.addf %125, %126 : vector<8x1xf32>
    %128 = math.rsqrt %127 : vector<8x1xf32>
    %129 = vector.broadcast %128 : vector<8x1xf32> to vector<8x32xf32>
    %130 = arith.mulf %120, %129 : vector<8x32xf32>
    %c0_41 = arith.constant 0 : index
    %c0_42 = arith.constant 0 : index
    %131 = vector.load %arg7[%c0_41, %c0_42] : memref<1x32xf32, #tpu.memory_space<vmem>>, vector<1x32xf32>
    %132 = vector.broadcast %131 : vector<1x32xf32> to vector<8x32xf32>
    %133 = arith.mulf %130, %132 : vector<8x32xf32>
    %c0_43 = arith.constant 0 : index
    %c0_44 = arith.constant 0 : index
    %134 = vector.load %arg8[%c0_43, %c0_44] : memref<1x32xf32, #tpu.memory_space<vmem>>, vector<1x32xf32>
    %135 = vector.broadcast %134 : vector<1x32xf32> to vector<8x32xf32>
    %136 = arith.addf %133, %135 : vector<8x32xf32>
    %137 = arith.truncf %136 : vector<8x32xf32> to vector<8x32xbf16>
    %c0_45 = arith.constant 0 : index
    %c0_46 = arith.constant 0 : index
    %138 = vector.load %arg9[%c0_45, %c0_46] : memref<32x32xbf16, #tpu.memory_space<vmem>>, vector<32x32xbf16>
    %cst_47 = arith.constant dense<0.000000e+00> : vector<8x32xf32>
    %139 = tpu.matmul %137, %138, %cst_47 {dimension_numbers = #tpu.dot_dimension_numbers<[1], [0], [0], [1], [0, 0, 1, 1], [], []>} : vector<8x32xbf16>, vector<32x32xbf16>, vector<8x32xf32> -> vector<8x32xf32>
    %c0_48 = arith.constant 0 : index
    %c0_49 = arith.constant 0 : index
    %140 = vector.load %arg10[%c0_48, %c0_49] : memref<1x32xf32, #tpu.memory_space<vmem>>, vector<1x32xf32>
    %141 = vector.broadcast %140 : vector<1x32xf32> to vector<8x32xf32>
    %142 = arith.addf %139, %141 : vector<8x32xf32>
    %143 = arith.truncf %3 : vector<10x32xf32> to vector<10x32xbf16>
    %c0_50 = arith.constant 0 : index
    %c0_51 = arith.constant 0 : index
    %144 = vector.load %arg11[%c0_50, %c0_51] : memref<32x64xbf16, #tpu.memory_space<vmem>>, vector<32x64xbf16>
    %cst_52 = arith.constant dense<0.000000e+00> : vector<10x64xf32>
    %145 = tpu.matmul %143, %144, %cst_52 {dimension_numbers = #tpu.dot_dimension_numbers<[1], [0], [0], [1], [0, 0, 1, 1], [], []>} : vector<10x32xbf16>, vector<32x64xbf16>, vector<10x64xf32> -> vector<10x64xf32>
    %c0_53 = arith.constant 0 : index
    %c0_54 = arith.constant 0 : index
    %146 = vector.load %arg12[%c0_53, %c0_54] : memref<1x64xf32, #tpu.memory_space<vmem>>, vector<1x64xf32>
    %147 = vector.broadcast %146 : vector<1x64xf32> to vector<10x64xf32>
    %148 = arith.addf %145, %147 : vector<10x64xf32>
    %149 = vector.extract_strided_slice %148 {offsets = [0, 0], sizes = [10, 32], strides = [1, 1]} : vector<10x64xf32> to vector<10x32xf32>
    %150 = vector.extract_strided_slice %148 {offsets = [0, 32], sizes = [10, 32], strides = [1, 1]} : vector<10x64xf32> to vector<10x32xf32>
    %151 = vector.extract_strided_slice %142 {offsets = [0, 0], sizes = [8, 8], strides = [1, 1]} : vector<8x32xf32> to vector<8x8xf32>
    %152 = arith.truncf %151 : vector<8x8xf32> to vector<8x8xbf16>
    %153 = vector.extract_strided_slice %149 {offsets = [0, 0], sizes = [10, 8], strides = [1, 1]} : vector<10x32xf32> to vector<10x8xf32>
    %154 = arith.truncf %153 : vector<10x8xf32> to vector<10x8xbf16>
    %155 = vector.extract_strided_slice %150 {offsets = [0, 0], sizes = [10, 8], strides = [1, 1]} : vector<10x32xf32> to vector<10x8xf32>
    %156 = arith.truncf %155 : vector<10x8xf32> to vector<10x8xbf16>
    %cst_55 = arith.constant dense<0.000000e+00> : vector<8x10xf32>
    %157 = tpu.matmul %152, %154, %cst_55 {dimension_numbers = #tpu.dot_dimension_numbers<[1], [1], [0], [0], [0, 0, 1, 0], [], []>} : vector<8x8xbf16>, vector<10x8xbf16>, vector<8x10xf32> -> vector<8x10xf32>
    %cst_56 = arith.constant 0.353553385 : f32
    %158 = vector.broadcast %cst_56 : f32 to vector<8x10xf32>
    %159 = arith.mulf %157, %158 : vector<8x10xf32>
    %cst_57 = arith.constant dense<0xFF800000> : vector<8xf32>
    %160 = vector.multi_reduction <maximumf>, %159, %cst_57 [1] : vector<8x10xf32> to vector<8xf32>
    %161 = vector.shape_cast %160 : vector<8xf32> to vector<8x1xf32>
    %162 = vector.broadcast %161 : vector<8x1xf32> to vector<8x10xf32>
    %163 = arith.subf %159, %162 : vector<8x10xf32>
    %164 = math.exp %163 : vector<8x10xf32>
    %cst_58 = arith.constant dense<0.000000e+00> : vector<8xf32>
    %165 = vector.multi_reduction <add>, %164, %cst_58 [1] : vector<8x10xf32> to vector<8xf32>
    %166 = vector.shape_cast %165 : vector<8xf32> to vector<8x1xf32>
    %167 = tpu.reciprocal %166 {approx = true} : vector<8x1xf32> -> vector<8x1xf32>
    %168 = vector.broadcast %167 : vector<8x1xf32> to vector<8x10xf32>
    %169 = arith.mulf %164, %168 : vector<8x10xf32>
    %170 = arith.truncf %169 : vector<8x10xf32> to vector<8x10xbf16>
    %cst_59 = arith.constant dense<0.000000e+00> : vector<8x8xf32>
    %171 = tpu.matmul %170, %156, %cst_59 {dimension_numbers = #tpu.dot_dimension_numbers<[1], [0], [0], [1], [0, 0, 1, 1], [], []>} : vector<8x10xbf16>, vector<10x8xbf16>, vector<8x8xf32> -> vector<8x8xf32>
    %172 = vector.extract_strided_slice %142 {offsets = [0, 8], sizes = [8, 8], strides = [1, 1]} : vector<8x32xf32> to vector<8x8xf32>
    %173 = arith.truncf %172 : vector<8x8xf32> to vector<8x8xbf16>
    %174 = vector.extract_strided_slice %149 {offsets = [0, 8], sizes = [10, 8], strides = [1, 1]} : vector<10x32xf32> to vector<10x8xf32>
    %175 = arith.truncf %174 : vector<10x8xf32> to vector<10x8xbf16>
    %176 = vector.extract_strided_slice %150 {offsets = [0, 8], sizes = [10, 8], strides = [1, 1]} : vector<10x32xf32> to vector<10x8xf32>
    %177 = arith.truncf %176 : vector<10x8xf32> to vector<10x8xbf16>
    %cst_60 = arith.constant dense<0.000000e+00> : vector<8x10xf32>
    %178 = tpu.matmul %173, %175, %cst_60 {dimension_numbers = #tpu.dot_dimension_numbers<[1], [1], [0], [0], [0, 0, 1, 0], [], []>} : vector<8x8xbf16>, vector<10x8xbf16>, vector<8x10xf32> -> vector<8x10xf32>
    %cst_61 = arith.constant 0.353553385 : f32
    %179 = vector.broadcast %cst_61 : f32 to vector<8x10xf32>
    %180 = arith.mulf %178, %179 : vector<8x10xf32>
    %cst_62 = arith.constant dense<0xFF800000> : vector<8xf32>
    %181 = vector.multi_reduction <maximumf>, %180, %cst_62 [1] : vector<8x10xf32> to vector<8xf32>
    %182 = vector.shape_cast %181 : vector<8xf32> to vector<8x1xf32>
    %183 = vector.broadcast %182 : vector<8x1xf32> to vector<8x10xf32>
    %184 = arith.subf %180, %183 : vector<8x10xf32>
    %185 = math.exp %184 : vector<8x10xf32>
    %cst_63 = arith.constant dense<0.000000e+00> : vector<8xf32>
    %186 = vector.multi_reduction <add>, %185, %cst_63 [1] : vector<8x10xf32> to vector<8xf32>
    %187 = vector.shape_cast %186 : vector<8xf32> to vector<8x1xf32>
    %188 = tpu.reciprocal %187 {approx = true} : vector<8x1xf32> -> vector<8x1xf32>
    %189 = vector.broadcast %188 : vector<8x1xf32> to vector<8x10xf32>
    %190 = arith.mulf %185, %189 : vector<8x10xf32>
    %191 = arith.truncf %190 : vector<8x10xf32> to vector<8x10xbf16>
    %cst_64 = arith.constant dense<0.000000e+00> : vector<8x8xf32>
    %192 = tpu.matmul %191, %177, %cst_64 {dimension_numbers = #tpu.dot_dimension_numbers<[1], [0], [0], [1], [0, 0, 1, 1], [], []>} : vector<8x10xbf16>, vector<10x8xbf16>, vector<8x8xf32> -> vector<8x8xf32>
    %193 = vector.extract_strided_slice %142 {offsets = [0, 16], sizes = [8, 8], strides = [1, 1]} : vector<8x32xf32> to vector<8x8xf32>
    %194 = arith.truncf %193 : vector<8x8xf32> to vector<8x8xbf16>
    %195 = vector.extract_strided_slice %149 {offsets = [0, 16], sizes = [10, 8], strides = [1, 1]} : vector<10x32xf32> to vector<10x8xf32>
    %196 = arith.truncf %195 : vector<10x8xf32> to vector<10x8xbf16>
    %197 = vector.extract_strided_slice %150 {offsets = [0, 16], sizes = [10, 8], strides = [1, 1]} : vector<10x32xf32> to vector<10x8xf32>
    %198 = arith.truncf %197 : vector<10x8xf32> to vector<10x8xbf16>
    %cst_65 = arith.constant dense<0.000000e+00> : vector<8x10xf32>
    %199 = tpu.matmul %194, %196, %cst_65 {dimension_numbers = #tpu.dot_dimension_numbers<[1], [1], [0], [0], [0, 0, 1, 0], [], []>} : vector<8x8xbf16>, vector<10x8xbf16>, vector<8x10xf32> -> vector<8x10xf32>
    %cst_66 = arith.constant 0.353553385 : f32
    %200 = vector.broadcast %cst_66 : f32 to vector<8x10xf32>
    %201 = arith.mulf %199, %200 : vector<8x10xf32>
    %cst_67 = arith.constant dense<0xFF800000> : vector<8xf32>
    %202 = vector.multi_reduction <maximumf>, %201, %cst_67 [1] : vector<8x10xf32> to vector<8xf32>
    %203 = vector.shape_cast %202 : vector<8xf32> to vector<8x1xf32>
    %204 = vector.broadcast %203 : vector<8x1xf32> to vector<8x10xf32>
    %205 = arith.subf %201, %204 : vector<8x10xf32>
    %206 = math.exp %205 : vector<8x10xf32>
    %cst_68 = arith.constant dense<0.000000e+00> : vector<8xf32>
    %207 = vector.multi_reduction <add>, %206, %cst_68 [1] : vector<8x10xf32> to vector<8xf32>
    %208 = vector.shape_cast %207 : vector<8xf32> to vector<8x1xf32>
    %209 = tpu.reciprocal %208 {approx = true} : vector<8x1xf32> -> vector<8x1xf32>
    %210 = vector.broadcast %209 : vector<8x1xf32> to vector<8x10xf32>
    %211 = arith.mulf %206, %210 : vector<8x10xf32>
    %212 = arith.truncf %211 : vector<8x10xf32> to vector<8x10xbf16>
    %cst_69 = arith.constant dense<0.000000e+00> : vector<8x8xf32>
    %213 = tpu.matmul %212, %198, %cst_69 {dimension_numbers = #tpu.dot_dimension_numbers<[1], [0], [0], [1], [0, 0, 1, 1], [], []>} : vector<8x10xbf16>, vector<10x8xbf16>, vector<8x8xf32> -> vector<8x8xf32>
    %214 = vector.extract_strided_slice %142 {offsets = [0, 24], sizes = [8, 8], strides = [1, 1]} : vector<8x32xf32> to vector<8x8xf32>
    %215 = arith.truncf %214 : vector<8x8xf32> to vector<8x8xbf16>
    %216 = vector.extract_strided_slice %149 {offsets = [0, 24], sizes = [10, 8], strides = [1, 1]} : vector<10x32xf32> to vector<10x8xf32>
    %217 = arith.truncf %216 : vector<10x8xf32> to vector<10x8xbf16>
    %218 = vector.extract_strided_slice %150 {offsets = [0, 24], sizes = [10, 8], strides = [1, 1]} : vector<10x32xf32> to vector<10x8xf32>
    %219 = arith.truncf %218 : vector<10x8xf32> to vector<10x8xbf16>
    %cst_70 = arith.constant dense<0.000000e+00> : vector<8x10xf32>
    %220 = tpu.matmul %215, %217, %cst_70 {dimension_numbers = #tpu.dot_dimension_numbers<[1], [1], [0], [0], [0, 0, 1, 0], [], []>} : vector<8x8xbf16>, vector<10x8xbf16>, vector<8x10xf32> -> vector<8x10xf32>
    %cst_71 = arith.constant 0.353553385 : f32
    %221 = vector.broadcast %cst_71 : f32 to vector<8x10xf32>
    %222 = arith.mulf %220, %221 : vector<8x10xf32>
    %cst_72 = arith.constant dense<0xFF800000> : vector<8xf32>
    %223 = vector.multi_reduction <maximumf>, %222, %cst_72 [1] : vector<8x10xf32> to vector<8xf32>
    %224 = vector.shape_cast %223 : vector<8xf32> to vector<8x1xf32>
    %225 = vector.broadcast %224 : vector<8x1xf32> to vector<8x10xf32>
    %226 = arith.subf %222, %225 : vector<8x10xf32>
    %227 = math.exp %226 : vector<8x10xf32>
    %cst_73 = arith.constant dense<0.000000e+00> : vector<8xf32>
    %228 = vector.multi_reduction <add>, %227, %cst_73 [1] : vector<8x10xf32> to vector<8xf32>
    %229 = vector.shape_cast %228 : vector<8xf32> to vector<8x1xf32>
    %230 = tpu.reciprocal %229 {approx = true} : vector<8x1xf32> -> vector<8x1xf32>
    %231 = vector.broadcast %230 : vector<8x1xf32> to vector<8x10xf32>
    %232 = arith.mulf %227, %231 : vector<8x10xf32>
    %233 = arith.truncf %232 : vector<8x10xf32> to vector<8x10xbf16>
    %cst_74 = arith.constant dense<0.000000e+00> : vector<8x8xf32>
    %234 = tpu.matmul %233, %219, %cst_74 {dimension_numbers = #tpu.dot_dimension_numbers<[1], [0], [0], [1], [0, 0, 1, 1], [], []>} : vector<8x10xbf16>, vector<10x8xbf16>, vector<8x8xf32> -> vector<8x8xf32>
    %235 = tpu.concatenate %171, %192, %213, %234 in 1 : vector<8x8xf32>, vector<8x8xf32>, vector<8x8xf32>, vector<8x8xf32> -> vector<8x32xf32>
    %236 = arith.truncf %235 : vector<8x32xf32> to vector<8x32xbf16>
    %c0_75 = arith.constant 0 : index
    %c0_76 = arith.constant 0 : index
    %237 = vector.load %arg13[%c0_75, %c0_76] : memref<32x32xbf16, #tpu.memory_space<vmem>>, vector<32x32xbf16>
    %cst_77 = arith.constant dense<0.000000e+00> : vector<8x32xf32>
    %238 = tpu.matmul %236, %237, %cst_77 {dimension_numbers = #tpu.dot_dimension_numbers<[1], [0], [0], [1], [0, 0, 1, 1], [], []>} : vector<8x32xbf16>, vector<32x32xbf16>, vector<8x32xf32> -> vector<8x32xf32>
    %c0_78 = arith.constant 0 : index
    %c0_79 = arith.constant 0 : index
    %239 = vector.load %arg14[%c0_78, %c0_79] : memref<1x32xf32, #tpu.memory_space<vmem>>, vector<1x32xf32>
    %240 = vector.broadcast %239 : vector<1x32xf32> to vector<8x32xf32>
    %241 = arith.addf %238, %240 : vector<8x32xf32>
    %242 = arith.addf %136, %241 : vector<8x32xf32>
    %cst_80 = arith.constant dense<0.000000e+00> : vector<8xf32>
    %243 = vector.multi_reduction <add>, %242, %cst_80 [1] : vector<8x32xf32> to vector<8xf32>
    %244 = vector.shape_cast %243 : vector<8xf32> to vector<8x1xf32>
    %cst_81 = arith.constant 3.200000e+01 : f32
    %245 = vector.broadcast %cst_81 : f32 to vector<8x1xf32>
    %246 = arith.divf %244, %245 : vector<8x1xf32>
    %247 = vector.broadcast %246 : vector<8x1xf32> to vector<8x32xf32>
    %248 = arith.subf %242, %247 : vector<8x32xf32>
    %249 = arith.mulf %248, %248 : vector<8x32xf32>
    %cst_82 = arith.constant dense<0.000000e+00> : vector<8xf32>
    %250 = vector.multi_reduction <add>, %249, %cst_82 [1] : vector<8x32xf32> to vector<8xf32>
    %251 = vector.shape_cast %250 : vector<8xf32> to vector<8x1xf32>
    %cst_83 = arith.constant 3.200000e+01 : f32
    %252 = vector.broadcast %cst_83 : f32 to vector<8x1xf32>
    %253 = arith.divf %251, %252 : vector<8x1xf32>
    %cst_84 = arith.constant 9.99999974E-6 : f32
    %254 = vector.broadcast %cst_84 : f32 to vector<8x1xf32>
    %255 = arith.addf %253, %254 : vector<8x1xf32>
    %256 = math.rsqrt %255 : vector<8x1xf32>
    %257 = vector.broadcast %256 : vector<8x1xf32> to vector<8x32xf32>
    %258 = arith.mulf %248, %257 : vector<8x32xf32>
    %c0_85 = arith.constant 0 : index
    %c0_86 = arith.constant 0 : index
    %259 = vector.load %arg15[%c0_85, %c0_86] : memref<1x32xf32, #tpu.memory_space<vmem>>, vector<1x32xf32>
    %260 = vector.broadcast %259 : vector<1x32xf32> to vector<8x32xf32>
    %261 = arith.mulf %258, %260 : vector<8x32xf32>
    %c0_87 = arith.constant 0 : index
    %c0_88 = arith.constant 0 : index
    %262 = vector.load %arg16[%c0_87, %c0_88] : memref<1x32xf32, #tpu.memory_space<vmem>>, vector<1x32xf32>
    %263 = vector.broadcast %262 : vector<1x32xf32> to vector<8x32xf32>
    %264 = arith.addf %261, %263 : vector<8x32xf32>
    %265 = arith.truncf %264 : vector<8x32xf32> to vector<8x32xbf16>
    %c0_89 = arith.constant 0 : index
    %c0_90 = arith.constant 0 : index
    %266 = vector.load %arg17[%c0_89, %c0_90] : memref<32x64xbf16, #tpu.memory_space<vmem>>, vector<32x64xbf16>
    %cst_91 = arith.constant dense<0.000000e+00> : vector<8x64xf32>
    %267 = tpu.matmul %265, %266, %cst_91 {dimension_numbers = #tpu.dot_dimension_numbers<[1], [0], [0], [1], [0, 0, 1, 1], [], []>} : vector<8x32xbf16>, vector<32x64xbf16>, vector<8x64xf32> -> vector<8x64xf32>
    %c0_92 = arith.constant 0 : index
    %c0_93 = arith.constant 0 : index
    %268 = vector.load %arg18[%c0_92, %c0_93] : memref<1x64xf32, #tpu.memory_space<vmem>>, vector<1x64xf32>
    %269 = vector.broadcast %268 : vector<1x64xf32> to vector<8x64xf32>
    %270 = arith.addf %267, %269 : vector<8x64xf32>
    %cst_94 = arith.constant 0.000000e+00 : f32
    %271 = vector.broadcast %cst_94 : f32 to vector<8x64xf32>
    %272 = arith.maximumf %270, %271 : vector<8x64xf32>
    %273 = arith.truncf %272 : vector<8x64xf32> to vector<8x64xbf16>
    %c0_95 = arith.constant 0 : index
    %c0_96 = arith.constant 0 : index
    %274 = vector.load %arg19[%c0_95, %c0_96] : memref<64x32xbf16, #tpu.memory_space<vmem>>, vector<64x32xbf16>
    %cst_97 = arith.constant dense<0.000000e+00> : vector<8x32xf32>
    %275 = tpu.matmul %273, %274, %cst_97 {dimension_numbers = #tpu.dot_dimension_numbers<[1], [0], [0], [1], [0, 0, 1, 1], [], []>} : vector<8x64xbf16>, vector<64x32xbf16>, vector<8x32xf32> -> vector<8x32xf32>
    %c0_98 = arith.constant 0 : index
    %c0_99 = arith.constant 0 : index
    %276 = vector.load %arg20[%c0_98, %c0_99] : memref<1x32xf32, #tpu.memory_space<vmem>>, vector<1x32xf32>
    %277 = vector.broadcast %276 : vector<1x32xf32> to vector<8x32xf32>
    %278 = arith.addf %275, %277 : vector<8x32xf32>
    %279 = arith.addf %264, %278 : vector<8x32xf32>
    %cst_100 = arith.constant dense<0.000000e+00> : vector<8xf32>
    %280 = vector.multi_reduction <add>, %279, %cst_100 [1] : vector<8x32xf32> to vector<8xf32>
    %281 = vector.shape_cast %280 : vector<8xf32> to vector<8x1xf32>
    %cst_101 = arith.constant 3.200000e+01 : f32
    %282 = vector.broadcast %cst_101 : f32 to vector<8x1xf32>
    %283 = arith.divf %281, %282 : vector<8x1xf32>
    %284 = vector.broadcast %283 : vector<8x1xf32> to vector<8x32xf32>
    %285 = arith.subf %279, %284 : vector<8x32xf32>
    %286 = arith.mulf %285, %285 : vector<8x32xf32>
    %cst_102 = arith.constant dense<0.000000e+00> : vector<8xf32>
    %287 = vector.multi_reduction <add>, %286, %cst_102 [1] : vector<8x32xf32> to vector<8xf32>
    %288 = vector.shape_cast %287 : vector<8xf32> to vector<8x1xf32>
    %cst_103 = arith.constant 3.200000e+01 : f32
    %289 = vector.broadcast %cst_103 : f32 to vector<8x1xf32>
    %290 = arith.divf %288, %289 : vector<8x1xf32>
    %cst_104 = arith.constant 9.99999974E-6 : f32
    %291 = vector.broadcast %cst_104 : f32 to vector<8x1xf32>
    %292 = arith.addf %290, %291 : vector<8x1xf32>
    %293 = math.rsqrt %292 : vector<8x1xf32>
    %294 = vector.broadcast %293 : vector<8x1xf32> to vector<8x32xf32>
    %295 = arith.mulf %285, %294 : vector<8x32xf32>
    %c0_105 = arith.constant 0 : index
    %c0_106 = arith.constant 0 : index
    %296 = vector.load %arg21[%c0_105, %c0_106] : memref<1x32xf32, #tpu.memory_space<vmem>>, vector<1x32xf32>
    %297 = vector.broadcast %296 : vector<1x32xf32> to vector<8x32xf32>
    %298 = arith.mulf %295, %297 : vector<8x32xf32>
    %c0_107 = arith.constant 0 : index
    %c0_108 = arith.constant 0 : index
    %299 = vector.load %arg22[%c0_107, %c0_108] : memref<1x32xf32, #tpu.memory_space<vmem>>, vector<1x32xf32>
    %300 = vector.broadcast %299 : vector<1x32xf32> to vector<8x32xf32>
    %301 = arith.addf %298, %300 : vector<8x32xf32>
    %c0_109 = arith.constant 0 : index
    %c0_110 = arith.constant 0 : index
    %c0_111 = arith.constant 0 : index
    %302 = vector.load %arg23[%c0_109, %c0_110, %c0_111] : memref<1x8x32xf32, #tpu.memory_space<vmem>>, vector<1x8x32xf32>
    %303 = vector.shape_cast %302 : vector<1x8x32xf32> to vector<8x32xf32>
    %304 = vector.shape_cast %301 : vector<8x32xf32> to vector<1x8x32xf32>
    tpu.vector_store %arg23[%c0_109, %c0_110, %c0_111], %304 {strides = array<i32>} : memref<1x8x32xf32, #tpu.memory_space<vmem>>, vector<1x8x32xf32>,
    return
  }
  func.func @transform_0(%arg0: i32) -> (i32, i32, i32) {
    %c0_i32 = arith.constant 0 : i32
    %c0_i32_0 = arith.constant 0 : i32
    %c0_i32_1 = arith.constant 0 : i32
    return %arg0, %c0_i32, %c0_i32_0 : i32, i32, i32
  }
  func.func @transform_1(%arg0: i32) -> (i32, i32, i32) {
    %c0_i32 = arith.constant 0 : i32
    %c0_i32_0 = arith.constant 0 : i32
    %c0_i32_1 = arith.constant 0 : i32
    return %arg0, %c0_i32, %c0_i32_0 : i32, i32, i32
  }
  func.func @transform_2(%arg0: i32) -> (i32, i32) {
    %c0_i32 = arith.constant 0 : i32
    %c0_i32_0 = arith.constant 0 : i32
    %c0_i32_1 = arith.constant 0 : i32
    return %c0_i32, %c0_i32_0 : i32, i32
  }
  func.func @transform_3(%arg0: i32) -> (i32, i32) {
    %c0_i32 = arith.constant 0 : i32
    %c0_i32_0 = arith.constant 0 : i32
    %c0_i32_1 = arith.constant 0 : i32
    return %c0_i32, %c0_i32_0 : i32, i32
  }
  func.func @transform_4(%arg0: i32) -> (i32, i32) {
    %c0_i32 = arith.constant 0 : i32
    %c0_i32_0 = arith.constant 0 : i32
    %c0_i32_1 = arith.constant 0 : i32
    return %c0_i32, %c0_i32_0 : i32, i32
  }
  func.func @transform_5(%arg0: i32) -> (i32, i32) {
    %c0_i32 = arith.constant 0 : i32
    %c0_i32_0 = arith.constant 0 : i32
    %c0_i32_1 = arith.constant 0 : i32
    return %c0_i32, %c0_i32_0 : i32, i32
  }
  func.func @transform_6(%arg0: i32) -> (i32, i32) {
    %c0_i32 = arith.constant 0 : i32
    %c0_i32_0 = arith.constant 0 : i32
    %c0_i32_1 = arith.constant 0 : i32
    return %c0_i32, %c0_i32_0 : i32, i32
  }
  func.func @transform_7(%arg0: i32) -> (i32, i32) {
    %c0_i32 = arith.constant 0 : i32
    %c0_i32_0 = arith.constant 0 : i32
    %c0_i32_1 = arith.constant 0 : i32
    return %c0_i32, %c0_i32_0 : i32, i32
  }
  func.func @transform_8(%arg0: i32) -> (i32, i32) {
    %c0_i32 = arith.constant 0 : i32
    %c0_i32_0 = arith.constant 0 : i32
    %c0_i32_1 = arith.constant 0 : i32
    return %c0_i32, %c0_i32_0 : i32, i32
  }
  func.func @transform_9(%arg0: i32) -> (i32, i32) {
    %c0_i32 = arith.constant 0 : i32
    %c0_i32_0 = arith.constant 0 : i32
    %c0_i32_1 = arith.constant 0 : i32
    return %c0_i32, %c0_i32_0 : i32, i32
  }
  func.func @transform_10(%arg0: i32) -> (i32, i32) {
    %c0_i32 = arith.constant 0 : i32
    %c0_i32_0 = arith.constant 0 : i32
    %c0_i32_1 = arith.constant 0 : i32
    return %c0_i32, %c0_i32_0 : i32, i32
  }
  func.func @transform_11(%arg0: i32) -> (i32, i32) {
    %c0_i32 = arith.constant 0 : i32
    %c0_i32_0 = arith.constant 0 : i32
    %c0_i32_1 = arith.constant 0 : i32
    return %c0_i32, %c0_i32_0 : i32, i32
  }
  func.func @transform_12(%arg0: i32) -> (i32, i32) {
    %c0_i32 = arith.constant 0 : i32
    %c0_i32_0 = arith.constant 0 : i32
    %c0_i32_1 = arith.constant 0 : i32
    return %c0_i32, %c0_i32_0 : i32, i32
  }
  func.func @transform_13(%arg0: i32) -> (i32, i32) {
    %c0_i32 = arith.constant 0 : i32
    %c0_i32_0 = arith.constant 0 : i32
    %c0_i32_1 = arith.constant 0 : i32
    return %c0_i32, %c0_i32_0 : i32, i32
  }
  func.func @transform_14(%arg0: i32) -> (i32, i32) {
    %c0_i32 = arith.constant 0 : i32
    %c0_i32_0 = arith.constant 0 : i32
    %c0_i32_1 = arith.constant 0 : i32
    return %c0_i32, %c0_i32_0 : i32, i32
  }
  func.func @transform_15(%arg0: i32) -> (i32, i32) {
    %c0_i32 = arith.constant 0 : i32
    %c0_i32_0 = arith.constant 0 : i32
    %c0_i32_1 = arith.constant 0 : i32
    return %c0_i32, %c0_i32_0 : i32, i32
  }
  func.func @transform_16(%arg0: i32) -> (i32, i32) {
    %c0_i32 = arith.constant 0 : i32
    %c0_i32_0 = arith.constant 0 : i32
    %c0_i32_1 = arith.constant 0 : i32
    return %c0_i32, %c0_i32_0 : i32, i32
  }
  func.func @transform_17(%arg0: i32) -> (i32, i32) {
    %c0_i32 = arith.constant 0 : i32
    %c0_i32_0 = arith.constant 0 : i32
    %c0_i32_1 = arith.constant 0 : i32
    return %c0_i32, %c0_i32_0 : i32, i32
  }
  func.func @transform_18(%arg0: i32) -> (i32, i32) {
    %c0_i32 = arith.constant 0 : i32
    %c0_i32_0 = arith.constant 0 : i32
    %c0_i32_1 = arith.constant 0 : i32
    return %c0_i32, %c0_i32_0 : i32, i32
  }
  func.func @transform_19(%arg0: i32) -> (i32, i32) {
    %c0_i32 = arith.constant 0 : i32
    %c0_i32_0 = arith.constant 0 : i32
    %c0_i32_1 = arith.constant 0 : i32
    return %c0_i32, %c0_i32_0 : i32, i32
  }
  func.func @transform_20(%arg0: i32) -> (i32, i32) {
    %c0_i32 = arith.constant 0 : i32
    %c0_i32_0 = arith.constant 0 : i32
    %c0_i32_1 = arith.constant 0 : i32
    return %c0_i32, %c0_i32_0 : i32, i32
  }
  func.func @transform_21(%arg0: i32) -> (i32, i32) {
    %c0_i32 = arith.constant 0 : i32
    %c0_i32_0 = arith.constant 0 : i32
    %c0_i32_1 = arith.constant 0 : i32
    return %c0_i32, %c0_i32_0 : i32, i32
  }
  func.func @transform_22(%arg0: i32) -> (i32, i32, i32) {
    %c0_i32 = arith.constant 0 : i32
    %c0_i32_0 = arith.constant 0 : i32
    %c0_i32_1 = arith.constant 0 : i32
    return %arg0, %c0_i32, %c0_i32_0 : i32, i32, i32
  }
}

module attributes {stable_mosaic.version = 11 : i64} {
  func.func @_decoder_layer_kernel(%arg0: i32, %arg1: memref<1x8x32xf32, #tpu.memory_space<vmem>>, %arg2: memref<1x10x32xf32, #tpu.memory_space<vmem>>, %arg3: memref<32x96xbf16, #tpu.memory_space<vmem>>, %arg4: memref<1x96xf32, #tpu.memory_space<vmem>>, %arg5: memref<32x32xbf16, #tpu.memory_space<vmem>>, %arg6: memref<1x32xf32, #tpu.memory_space<vmem>>, %arg7: memref<1x32xf32, #tpu.memory_space<vmem>>, %arg8: memref<1x32xf32, #tpu.memory_space<vmem>>, %arg9: memref<32x32xbf16, #tpu.memory_space<vmem>>, %arg10: memref<1x32xf32, #tpu.memory_space<vmem>>, %arg11: memref<32x64xbf16, #tpu.memory_space<vmem>>, %arg12: memref<1x64xf32, #tpu.memory_space<vmem>>, %arg13: memref<32x32xbf16, #tpu.memory_space<vmem>>, %arg14: memref<1x32xf32, #tpu.memory_space<vmem>>, %arg15: memref<1x32xf32, #tpu.memory_space<vmem>>, %arg16: memref<1x32xf32, #tpu.memory_space<vmem>>, %arg17: memref<32x64xbf16, #tpu.memory_space<vmem>>, %arg18: memref<1x64xf32, #tpu.memory_space<vmem>>, %arg19: memref<64x32xbf16, #tpu.memory_space<vmem>>, %arg20: memref<1x32xf32, #tpu.memory_space<vmem>>, %arg21: memref<1x32xf32, #tpu.memory_space<vmem>>, %arg22: memref<1x32xf32, #tpu.memory_space<vmem>>, %arg23: memref<1x8x32xf32, #tpu.memory_space<vmem>>) attributes {dimension_semantics = [#tpu.dimension_semantics<parallel>], iteration_bounds = array<i64: 2>, scalar_prefetch = 0 : i64, scratch_operands = 0 : i64, tpu.core_type = #tpu.core_type<tc>, window_params = [{transform_indices = @transform_0, window_bounds = array<i64: 1, 8, 32>}, {transform_indices = @transform_1, window_bounds = array<i64: 1, 10, 32>}, {pipeline_mode = #tpu.pipeline_mode<synchronous>, transform_indices = @transform_2, window_bounds = array<i64: 32, 96>}, {pipeline_mode = #tpu.pipeline_mode<synchronous>, transform_indices = @transform_3, window_bounds = array<i64: 1, 96>}, {pipeline_mode = #tpu.pipeline_mode<synchronous>, transform_indices = @transform_4, window_bounds = array<i64: 32, 32>}, {pipeline_mode = #tpu.pipeline_mode<synchronous>, transform_indices = @transform_5, window_bounds = array<i64: 1, 32>}, {pipeline_mode = #tpu.pipeline_mode<synchronous>, transform_indices = @transform_6, window_bounds = array<i64: 1, 32>}, {pipeline_mode = #tpu.pipeline_mode<synchronous>, transform_indices = @transform_7, window_bounds = array<i64: 1, 32>}, {pipeline_mode = #tpu.pipeline_mode<synchronous>, transform_indices = @transform_8, window_bounds = array<i64: 32, 32>}, {pipeline_mode = #tpu.pipeline_mode<synchronous>, transform_indices = @transform_9, window_bounds = array<i64: 1, 32>}, {pipeline_mode = #tpu.pipeline_mode<synchronous>, transform_indices = @transform_10, window_bounds = array<i64: 32, 64>}, {pipeline_mode = #tpu.pipeline_mode<synchronous>, transform_indices = @transform_11, window_bounds = array<i64: 1, 64>}, {pipeline_mode = #tpu.pipeline_mode<synchronous>, transform_indices = @transform_12, window_bounds = array<i64: 32, 32>}, {pipeline_mode = #tpu.pipeline_mode<synchronous>, transform_indices = @transform_13, window_bounds = array<i64: 1, 32>}, {pipeline_mode = #tpu.pipeline_mode<synchronous>, transform_indices = @transform_14, window_bounds = array<i64: 1, 32>}, {pipeline_mode = #tpu.pipeline_mode<synchronous>, transform_indices = @transform_15, window_bounds = array<i64: 1, 32>}, {pipeline_mode = #tpu.pipeline_mode<synchronous>, transform_indices = @transform_16, window_bounds = array<i64: 32, 64>}, {pipeline_mode = #tpu.pipeline_mode<synchronous>, transform_indices = @transform_17, window_bounds = array<i64: 1, 64>}, {pipeline_mode = #tpu.pipeline_mode<synchronous>, transform_indices = @transform_18, window_bounds = array<i64: 64, 32>}, {pipeline_mode = #tpu.pipeline_mode<synchronous>, transform_indices = @transform_19, window_bounds = array<i64: 1, 32>}, {pipeline_mode = #tpu.pipeline_mode<synchronous>, transform_indices = @transform_20, window_bounds = array<i64: 1, 32>}, {pipeline_mode = #tpu.pipeline_mode<synchronous>, transform_indices = @transform_21, window_bounds = array<i64: 1, 32>}, {transform_indices = @transform_22, window_bounds = array<i64: 1, 8, 32>}]} {
    %c0 = arith.constant 0 : index
    %c0_0 = arith.constant 0 : index
    %c0_1 = arith.constant 0 : index
    %0 = vector.load %arg1[%c0, %c0_0, %c0_1] : memref<1x8x32xf32, #tpu.memory_space<vmem>>, vector<1x8x32xf32>
    %1 = vector.shape_cast %0 : vector<1x8x32xf32> to vector<8x32xf32>
    %c0_2 = arith.constant 0 : index
    %c0_3 = arith.constant 0 : index
    %c0_4 = arith.constant 0 : index
    %2 = vector.load %arg2[%c0_2, %c0_3, %c0_4] : memref<1x10x32xf32, #tpu.memory_space<vmem>>, vector<1x10x32xf32>
    %3 = vector.shape_cast %2 : vector<1x10x32xf32> to vector<10x32xf32>
    %4 = arith.truncf %1 : vector<8x32xf32> to vector<8x32xbf16>
    %c0_5 = arith.constant 0 : index
    %c0_6 = arith.constant 0 : index
    %5 = vector.load %arg3[%c0_5, %c0_6] : memref<32x96xbf16, #tpu.memory_space<vmem>>, vector<32x96xbf16>
    %cst = arith.constant dense<0.000000e+00> : vector<8x96xf32>
    %6 = tpu.matmul %4, %5, %cst {dimension_numbers = #tpu.dot_dimension_numbers<[1], [0], [0], [1], [0, 0, 1, 1], [], []>} : vector<8x32xbf16>, vector<32x96xbf16>, vector<8x96xf32> -> vector<8x96xf32>
    %c0_7 = arith.constant 0 : index
    %c0_8 = arith.constant 0 : index
    %7 = vector.load %arg4[%c0_7, %c0_8] : memref<1x96xf32, #tpu.memory_space<vmem>>, vector<1x96xf32>
    %8 = vector.broadcast %7 : vector<1x96xf32> to vector<8x96xf32>
    %9 = arith.addf %6, %8 : vector<8x96xf32>
    %10 = vector.extract_strided_slice %9 {offsets = [0, 0], sizes = [8, 32], strides = [1, 1]} : vector<8x96xf32> to vector<8x32xf32>
    %11 = vector.extract_strided_slice %9 {offsets = [0, 32], sizes = [8, 32], strides = [1, 1]} : vector<8x96xf32> to vector<8x32xf32>
    %12 = vector.extract_strided_slice %9 {offsets = [0, 64], sizes = [8, 32], strides = [1, 1]} : vector<8x96xf32> to vector<8x32xf32>
    %13 = tpu.iota {dimensions = array<i32: 0>} : vector<8x8xi32>
    %14 = tpu.iota {dimensions = array<i32: 1>} : vector<8x8xi32>
    %15 = arith.cmpi sgt, %14, %13 : vector<8x8xi32>
    %cst_9 = arith.constant -1.000000e+30 : f32
    %cst_10 = arith.constant 0.000000e+00 : f32
    %16 = vector.broadcast %cst_9 : f32 to vector<8x8xf32>
    %17 = vector.broadcast %cst_10 : f32 to vector<8x8xf32>
    %18 = arith.select %15, %16, %17 : vector<8x8xi1>, vector<8x8xf32>
    %19 = vector.extract_strided_slice %10 {offsets = [0, 0], sizes = [8, 8], strides = [1, 1]} : vector<8x32xf32> to vector<8x8xf32>
    %20 = arith.truncf %19 : vector<8x8xf32> to vector<8x8xbf16>
    %21 = vector.extract_strided_slice %11 {offsets = [0, 0], sizes = [8, 8], strides = [1, 1]} : vector<8x32xf32> to vector<8x8xf32>
    %22 = arith.truncf %21 : vector<8x8xf32> to vector<8x8xbf16>
    %23 = vector.extract_strided_slice %12 {offsets = [0, 0], sizes = [8, 8], strides = [1, 1]} : vector<8x32xf32> to vector<8x8xf32>
    %24 = arith.truncf %23 : vector<8x8xf32> to vector<8x8xbf16>
    %cst_11 = arith.constant dense<0.000000e+00> : vector<8x8xf32>
    %25 = tpu.matmul %20, %22, %cst_11 {dimension_numbers = #tpu.dot_dimension_numbers<[1], [1], [0], [0], [0, 0, 1, 0], [], []>} : vector<8x8xbf16>, vector<8x8xbf16>, vector<8x8xf32> -> vector<8x8xf32>
    %cst_12 = arith.constant 0.353553385 : f32
    %26 = vector.broadcast %cst_12 : f32 to vector<8x8xf32>
    %27 = arith.mulf %25, %26 : vector<8x8xf32>
    %28 = arith.addf %27, %18 : vector<8x8xf32>
    %cst_13 = arith.constant dense<0xFF800000> : vector<8xf32>
    %29 = vector.multi_reduction <maximumf>, %28, %cst_13 [1] : vector<8x8xf32> to vector<8xf32>
    %30 = vector.shape_cast %29 : vector<8xf32> to vector<8x1xf32>
    %31 = vector.broadcast %30 : vector<8x1xf32> to vector<8x8xf32>
    %32 = arith.subf %28, %31 : vector<8x8xf32>
    %33 = math.exp %32 : vector<8x8xf32>
    %cst_14 = arith.constant dense<0.000000e+00> : vector<8xf32>
    %34 = vector.multi_reduction <add>, %33, %cst_14 [1] : vector<8x8xf32> to vector<8xf32>
    %35 = vector.shape_cast %34 : vector<8xf32> to vector<8x1xf32>
    %36 = tpu.reciprocal %35 {approx = true} : vector<8x1xf32> -> vector<8x1xf32>
    %37 = vector.broadcast %36 : vector<8x1xf32> to vector<8x8xf32>
    %38 = arith.mulf %33, %37 : vector<8x8xf32>
    %39 = arith.truncf %38 : vector<8x8xf32> to vector<8x8xbf16>
    %cst_15 = arith.constant dense<0.000000e+00> : vector<8x8xf32>
    %40 = tpu.matmul %39, %24, %cst_15 {dimension_numbers = #tpu.dot_dimension_numbers<[1], [0], [0], [1], [0, 0, 1, 1], [], []>} : vector<8x8xbf16>, vector<8x8xbf16>, vector<8x8xf32> -> vector<8x8xf32>
    %41 = vector.extract_strided_slice %10 {offsets = [0, 8], sizes = [8, 8], strides = [1, 1]} : vector<8x32xf32> to vector<8x8xf32>
    %42 = arith.truncf %41 : vector<8x8xf32> to vector<8x8xbf16>
    %43 = vector.extract_strided_slice %11 {offsets = [0, 8], sizes = [8, 8], strides = [1, 1]} : vector<8x32xf32> to vector<8x8xf32>
    %44 = arith.truncf %43 : vector<8x8xf32> to vector<8x8xbf16>
    %45 = vector.extract_strided_slice %12 {offsets = [0, 8], sizes = [8, 8], strides = [1, 1]} : vector<8x32xf32> to vector<8x8xf32>
    %46 = arith.truncf %45 : vector<8x8xf32> to vector<8x8xbf16>
    %cst_16 = arith.constant dense<0.000000e+00> : vector<8x8xf32>
    %47 = tpu.matmul %42, %44, %cst_16 {dimension_numbers = #tpu.dot_dimension_numbers<[1], [1], [0], [0], [0, 0, 1, 0], [], []>} : vector<8x8xbf16>, vector<8x8xbf16>, vector<8x8xf32> -> vector<8x8xf32>
    %cst_17 = arith.constant 0.353553385 : f32
    %48 = vector.broadcast %cst_17 : f32 to vector<8x8xf32>
    %49 = arith.mulf %47, %48 : vector<8x8xf32>
    %50 = arith.addf %49, %18 : vector<8x8xf32>
    %cst_18 = arith.constant dense<0xFF800000> : vector<8xf32>
    %51 = vector.multi_reduction <maximumf>, %50, %cst_18 [1] : vector<8x8xf32> to vector<8xf32>
    %52 = vector.shape_cast %51 : vector<8xf32> to vector<8x1xf32>
    %53 = vector.broadcast %52 : vector<8x1xf32> to vector<8x8xf32>
    %54 = arith.subf %50, %53 : vector<8x8xf32>
    %55 = math.exp %54 : vector<8x8xf32>
    %cst_19 = arith.constant dense<0.000000e+00> : vector<8xf32>
    %56 = vector.multi_reduction <add>, %55, %cst_19 [1] : vector<8x8xf32> to vector<8xf32>
    %57 = vector.shape_cast %56 : vector<8xf32> to vector<8x1xf32>
    %58 = tpu.reciprocal %57 {approx = true} : vector<8x1xf32> -> vector<8x1xf32>
    %59 = vector.broadcast %58 : vector<8x1xf32> to vector<8x8xf32>
    %60 = arith.mulf %55, %59 : vector<8x8xf32>
    %61 = arith.truncf %60 : vector<8x8xf32> to vector<8x8xbf16>
    %cst_20 = arith.constant dense<0.000000e+00> : vector<8x8xf32>
    %62 = tpu.matmul %61, %46, %cst_20 {dimension_numbers = #tpu.dot_dimension_numbers<[1], [0], [0], [1], [0, 0, 1, 1], [], []>} : vector<8x8xbf16>, vector<8x8xbf16>, vector<8x8xf32> -> vector<8x8xf32>
    %63 = vector.extract_strided_slice %10 {offsets = [0, 16], sizes = [8, 8], strides = [1, 1]} : vector<8x32xf32> to vector<8x8xf32>
    %64 = arith.truncf %63 : vector<8x8xf32> to vector<8x8xbf16>
    %65 = vector.extract_strided_slice %11 {offsets = [0, 16], sizes = [8, 8], strides = [1, 1]} : vector<8x32xf32> to vector<8x8xf32>
    %66 = arith.truncf %65 : vector<8x8xf32> to vector<8x8xbf16>
    %67 = vector.extract_strided_slice %12 {offsets = [0, 16], sizes = [8, 8], strides = [1, 1]} : vector<8x32xf32> to vector<8x8xf32>
    %68 = arith.truncf %67 : vector<8x8xf32> to vector<8x8xbf16>
    %cst_21 = arith.constant dense<0.000000e+00> : vector<8x8xf32>
    %69 = tpu.matmul %64, %66, %cst_21 {dimension_numbers = #tpu.dot_dimension_numbers<[1], [1], [0], [0], [0, 0, 1, 0], [], []>} : vector<8x8xbf16>, vector<8x8xbf16>, vector<8x8xf32> -> vector<8x8xf32>
    %cst_22 = arith.constant 0.353553385 : f32
    %70 = vector.broadcast %cst_22 : f32 to vector<8x8xf32>
    %71 = arith.mulf %69, %70 : vector<8x8xf32>
    %72 = arith.addf %71, %18 : vector<8x8xf32>
    %cst_23 = arith.constant dense<0xFF800000> : vector<8xf32>
    %73 = vector.multi_reduction <maximumf>, %72, %cst_23 [1] : vector<8x8xf32> to vector<8xf32>
    %74 = vector.shape_cast %73 : vector<8xf32> to vector<8x1xf32>
    %75 = vector.broadcast %74 : vector<8x1xf32> to vector<8x8xf32>
    %76 = arith.subf %72, %75 : vector<8x8xf32>
    %77 = math.exp %76 : vector<8x8xf32>
    %cst_24 = arith.constant dense<0.000000e+00> : vector<8xf32>
    %78 = vector.multi_reduction <add>, %77, %cst_24 [1] : vector<8x8xf32> to vector<8xf32>
    %79 = vector.shape_cast %78 : vector<8xf32> to vector<8x1xf32>
    %80 = tpu.reciprocal %79 {approx = true} : vector<8x1xf32> -> vector<8x1xf32>
    %81 = vector.broadcast %80 : vector<8x1xf32> to vector<8x8xf32>
    %82 = arith.mulf %77, %81 : vector<8x8xf32>
    %83 = arith.truncf %82 : vector<8x8xf32> to vector<8x8xbf16>
    %cst_25 = arith.constant dense<0.000000e+00> : vector<8x8xf32>
    %84 = tpu.matmul %83, %68, %cst_25 {dimension_numbers = #tpu.dot_dimension_numbers<[1], [0], [0], [1], [0, 0, 1, 1], [], []>} : vector<8x8xbf16>, vector<8x8xbf16>, vector<8x8xf32> -> vector<8x8xf32>
    %85 = vector.extract_strided_slice %10 {offsets = [0, 24], sizes = [8, 8], strides = [1, 1]} : vector<8x32xf32> to vector<8x8xf32>
    %86 = arith.truncf %85 : vector<8x8xf32> to vector<8x8xbf16>
    %87 = vector.extract_strided_slice %11 {offsets = [0, 24], sizes = [8, 8], strides = [1, 1]} : vector<8x32xf32> to vector<8x8xf32>
    %88 = arith.truncf %87 : vector<8x8xf32> to vector<8x8xbf16>
    %89 = vector.extract_strided_slice %12 {offsets = [0, 24], sizes = [8, 8], strides = [1, 1]} : vector<8x32xf32> to vector<8x8xf32>
    %90 = arith.truncf %89 : vector<8x8xf32> to vector<8x8xbf16>
    %cst_26 = arith.constant dense<0.000000e+00> : vector<8x8xf32>
    %91 = tpu.matmul %86, %88, %cst_26 {dimension_numbers = #tpu.dot_dimension_numbers<[1], [1], [0], [0], [0, 0, 1, 0], [], []>} : vector<8x8xbf16>, vector<8x8xbf16>, vector<8x8xf32> -> vector<8x8xf32>
    %cst_27 = arith.constant 0.353553385 : f32
    %92 = vector.broadcast %cst_27 : f32 to vector<8x8xf32>
    %93 = arith.mulf %91, %92 : vector<8x8xf32>
    %94 = arith.addf %93, %18 : vector<8x8xf32>
    %cst_28 = arith.constant dense<0xFF800000> : vector<8xf32>
    %95 = vector.multi_reduction <maximumf>, %94, %cst_28 [1] : vector<8x8xf32> to vector<8xf32>
    %96 = vector.shape_cast %95 : vector<8xf32> to vector<8x1xf32>
    %97 = vector.broadcast %96 : vector<8x1xf32> to vector<8x8xf32>
    %98 = arith.subf %94, %97 : vector<8x8xf32>
    %99 = math.exp %98 : vector<8x8xf32>
    %cst_29 = arith.constant dense<0.000000e+00> : vector<8xf32>
    %100 = vector.multi_reduction <add>, %99, %cst_29 [1] : vector<8x8xf32> to vector<8xf32>
    %101 = vector.shape_cast %100 : vector<8xf32> to vector<8x1xf32>
    %102 = tpu.reciprocal %101 {approx = true} : vector<8x1xf32> -> vector<8x1xf32>
    %103 = vector.broadcast %102 : vector<8x1xf32> to vector<8x8xf32>
    %104 = arith.mulf %99, %103 : vector<8x8xf32>
    %105 = arith.truncf %104 : vector<8x8xf32> to vector<8x8xbf16>
    %cst_30 = arith.constant dense<0.000000e+00> : vector<8x8xf32>
    %106 = tpu.matmul %105, %90, %cst_30 {dimension_numbers = #tpu.dot_dimension_numbers<[1], [0], [0], [1], [0, 0, 1, 1], [], []>} : vector<8x8xbf16>, vector<8x8xbf16>, vector<8x8xf32> -> vector<8x8xf32>
    %107 = tpu.concatenate %40, %62, %84, %106 in 1 : vector<8x8xf32>, vector<8x8xf32>, vector<8x8xf32>, vector<8x8xf32> -> vector<8x32xf32>
    %108 = arith.truncf %107 : vector<8x32xf32> to vector<8x32xbf16>
    %c0_31 = arith.constant 0 : index
    %c0_32 = arith.constant 0 : index
    %109 = vector.load %arg5[%c0_31, %c0_32] : memref<32x32xbf16, #tpu.memory_space<vmem>>, vector<32x32xbf16>
    %cst_33 = arith.constant dense<0.000000e+00> : vector<8x32xf32>
    %110 = tpu.matmul %108, %109, %cst_33 {dimension_numbers = #tpu.dot_dimension_numbers<[1], [0], [0], [1], [0, 0, 1, 1], [], []>} : vector<8x32xbf16>, vector<32x32xbf16>, vector<8x32xf32> -> vector<8x32xf32>
    %c0_34 = arith.constant 0 : index
    %c0_35 = arith.constant 0 : index
    %111 = vector.load %arg6[%c0_34, %c0_35] : memref<1x32xf32, #tpu.memory_space<vmem>>, vector<1x32xf32>
    %112 = vector.broadcast %111 : vector<1x32xf32> to vector<8x32xf32>
    %113 = arith.addf %110, %112 : vector<8x32xf32>
    %114 = arith.addf %1, %113 : vector<8x32xf32>
    %cst_36 = arith.constant dense<0.000000e+00> : vector<8xf32>
    %115 = vector.multi_reduction <add>, %114, %cst_36 [1] : vector<8x32xf32> to vector<8xf32>
    %116 = vector.shape_cast %115 : vector<8xf32> to vector<8x1xf32>
    %cst_37 = arith.constant 3.200000e+01 : f32
    %117 = vector.broadcast %cst_37 : f32 to vector<8x1xf32>
    %118 = arith.divf %116, %117 : vector<8x1xf32>
    %119 = vector.broadcast %118 : vector<8x1xf32> to vector<8x32xf32>
    %120 = arith.subf %114, %119 : vector<8x32xf32>
    %121 = arith.mulf %120, %120 : vector<8x32xf32>
    %cst_38 = arith.constant dense<0.000000e+00> : vector<8xf32>
    %122 = vector.multi_reduction <add>, %121, %cst_38 [1] : vector<8x32xf32> to vector<8xf32>
    %123 = vector.shape_cast %122 : vector<8xf32> to vector<8x1xf32>
    %cst_39 = arith.constant 3.200000e+01 : f32
    %124 = vector.broadcast %cst_39 : f32 to vector<8x1xf32>
    %125 = arith.divf %123, %124 : vector<8x1xf32>
    %cst_40 = arith.constant 9.99999974E-6 : f32
    %126 = vector.broadcast %cst_40 : f32 to vector<8x1xf32>
    %127 = arith.addf %125, %126 : vector<8x1xf32>
    %128 = math.rsqrt %127 : vector<8x1xf32>
    %129 = vector.broadcast %128 : vector<8x1xf32> to vector<8x32xf32>
    %130 = arith.mulf %120, %129 : vector<8x32xf32>
    %c0_41 = arith.constant 0 : index
    %c0_42 = arith.constant 0 : index
    %131 = vector.load %arg7[%c0_41, %c0_42] : memref<1x32xf32, #tpu.memory_space<vmem>>, vector<1x32xf32>
    %132 = vector.broadcast %131 : vector<1x32xf32> to vector<8x32xf32>
    %133 = arith.mulf %130, %132 : vector<8x32xf32>
    %c0_43 = arith.constant 0 : index
    %c0_44 = arith.constant 0 : index
    %134 = vector.load %arg8[%c0_43, %c0_44] : memref<1x32xf32, #tpu.memory_space<vmem>>, vector<1x32xf32>
    %135 = vector.broadcast %134 : vector<1x32xf32> to vector<8x32xf32>
    %136 = arith.addf %133, %135 : vector<8x32xf32>
    %137 = arith.truncf %136 : vector<8x32xf32> to vector<8x32xbf16>
    %c0_45 = arith.constant 0 : index
    %c0_46 = arith.constant 0 : index
    %138 = vector.load %arg9[%c0_45, %c0_46] : memref<32x32xbf16, #tpu.memory_space<vmem>>, vector<32x32xbf16>
    %cst_47 = arith.constant dense<0.000000e+00> : vector<8x32xf32>
    %139 = tpu.matmul %137, %138, %cst_47 {dimension_numbers = #tpu.dot_dimension_numbers<[1], [0], [0], [1], [0, 0, 1, 1], [], []>} : vector<8x32xbf16>, vector<32x32xbf16>, vector<8x32xf32> -> vector<8x32xf32>
    %c0_48 = arith.constant 0 : index
    %c0_49 = arith.constant 0 : index
    %140 = vector.load %arg10[%c0_48, %c0_49] : memref<1x32xf32, #tpu.memory_space<vmem>>, vector<1x32xf32>
    %141 = vector.broadcast %140 : vector<1x32xf32> to vector<8x32xf32>
    %142 = arith.addf %139, %141 : vector<8x32xf32>
    %143 = arith.truncf %3 : vector<10x32xf32> to vector<10x32xbf16>
    %c0_50 = arith.constant 0 : index
    %c0_51 = arith.constant 0 : index
    %144 = vector.load %arg11[%c0_50, %c0_51] : memref<32x64xbf16, #tpu.memory_space<vmem>>, vector<32x64xbf16>
    %cst_52 = arith.constant dense<0.000000e+00> : vector<10x64xf32>
    %145 = tpu.matmul %143, %144, %cst_52 {dimension_numbers = #tpu.dot_dimension_numbers<[1], [0], [0], [1], [0, 0, 1, 1], [], []>} : vector<10x32xbf16>, vector<32x64xbf16>, vector<10x64xf32> -> vector<10x64xf32>
    %c0_53 = arith.constant 0 : index
    %c0_54 = arith.constant 0 : index
    %146 = vector.load %arg12[%c0_53, %c0_54] : memref<1x64xf32, #tpu.memory_space<vmem>>, vector<1x64xf32>
    %147 = vector.broadcast %146 : vector<1x64xf32> to vector<10x64xf32>
    %148 = arith.addf %145, %147 : vector<10x64xf32>
    %149 = vector.extract_strided_slice %148 {offsets = [0, 0], sizes = [10, 32], strides = [1, 1]} : vector<10x64xf32> to vector<10x32xf32>
    %150 = vector.extract_strided_slice %148 {offsets = [0, 32], sizes = [10, 32], strides = [1, 1]} : vector<10x64xf32> to vector<10x32xf32>
    %151 = vector.extract_strided_slice %142 {offsets = [0, 0], sizes = [8, 8], strides = [1, 1]} : vector<8x32xf32> to vector<8x8xf32>
    %152 = arith.truncf %151 : vector<8x8xf32> to vector<8x8xbf16>
    %153 = vector.extract_strided_slice %149 {offsets = [0, 0], sizes = [10, 8], strides = [1, 1]} : vector<10x32xf32> to vector<10x8xf32>
    %154 = arith.truncf %153 : vector<10x8xf32> to vector<10x8xbf16>
    %155 = vector.extract_strided_slice %150 {offsets = [0, 0], sizes = [10, 8], strides = [1, 1]} : vector<10x32xf32> to vector<10x8xf32>
    %156 = arith.truncf %155 : vector<10x8xf32> to vector<10x8xbf16>
    %cst_55 = arith.constant dense<0.000000e+00> : vector<8x10xf32>
    %157 = tpu.matmul %152, %154, %cst_55 {dimension_numbers = #tpu.dot_dimension_numbers<[1], [1], [0], [0], [0, 0, 1, 0], [], []>} : vector<8x8xbf16>, vector<10x8xbf16>, vector<8x10xf32> -> vector<8x10xf32>
    %cst_56 = arith.constant 0.353553385 : f32
    %158 = vector.broadcast %cst_56 : f32 to vector<8x10xf32>
    %159 = arith.mulf %157, %158 : vector<8x10xf32>
    %cst_57 = arith.constant dense<0xFF800000> : vector<8xf32>
    %160 = vector.multi_reduction <maximumf>, %159, %cst_57 [1] : vector<8x10xf32> to vector<8xf32>
    %161 = vector.shape_cast %160 : vector<8xf32> to vector<8x1xf32>
    %162 = vector.broadcast %161 : vector<8x1xf32> to vector<8x10xf32>
    %163 = arith.subf %159, %162 : vector<8x10xf32>
    %164 = math.exp %163 : vector<8x10xf32>
    %cst_58 = arith.constant dense<0.000000e+00> : vector<8xf32>
    %165 = vector.multi_reduction <add>, %164, %cst_58 [1] : vector<8x10xf32> to vector<8xf32>
    %166 = vector.shape_cast %165 : vector<8xf32> to vector<8x1xf32>
    %167 = tpu.reciprocal %166 {approx = true} : vector<8x1xf32> -> vector<8x1xf32>
    %168 = vector.broadcast %167 : vector<8x1xf32> to vector<8x10xf32>
    %169 = arith.mulf %164, %168 : vector<8x10xf32>
    %170 = arith.truncf %169 : vector<8x10xf32> to vector<8x10xbf16>
    %cst_59 = arith.constant dense<0.000000e+00> : vector<8x8xf32>
    %171 = tpu.matmul %170, %156, %cst_59 {dimension_numbers = #tpu.dot_dimension_numbers<[1], [0], [0], [1], [0, 0, 1, 1], [], []>} : vector<8x10xbf16>, vector<10x8xbf16>, vector<8x8xf32> -> vector<8x8xf32>
    %172 = vector.extract_strided_slice %142 {offsets = [0, 8], sizes = [8, 8], strides = [1, 1]} : vector<8x32xf32> to vector<8x8xf32>
    %173 = arith.truncf %172 : vector<8x8xf32> to vector<8x8xbf16>
    %174 = vector.extract_strided_slice %149 {offsets = [0, 8], sizes = [10, 8], strides = [1, 1]} : vector<10x32xf32> to vector<10x8xf32>
    %175 = arith.truncf %174 : vector<10x8xf32> to vector<10x8xbf16>
    %176 = vector.extract_strided_slice %150 {offsets = [0, 8], sizes = [10, 8], strides = [1, 1]} : vector<10x32xf32> to vector<10x8xf32>
    %177 = arith.truncf %176 : vector<10x8xf32> to vector<10x8xbf16>
    %cst_60 = arith.constant dense<0.000000e+00> : vector<8x10xf32>
    %178 = tpu.matmul %173, %175, %cst_60 {dimension_numbers = #tpu.dot_dimension_numbers<[1], [1], [0], [0], [0, 0, 1, 0], [], []>} : vector<8x8xbf16>, vector<10x8xbf16>, vector<8x10xf32> -> vector<8x10xf32>
    %cst_61 = arith.constant 0.353553385 : f32
    %179 = vector.broadcast %cst_61 : f32 to vector<8x10xf32>
    %180 = arith.mulf %178, %179 : vector<8x10xf32>
    %cst_62 = arith.constant dense<0xFF800000> : vector<8xf32>
    %181 = vector.multi_reduction <maximumf>, %180, %cst_62 [1] : vector<8x10xf32> to vector<8xf32>
    %182 = vector.shape_cast %181 : vector<8xf32> to vector<8x1xf32>
    %183 = vector.broadcast %182 : vector<8x1xf32> to vector<8x10xf32>
    %184 = arith.subf %180, %183 : vector<8x10xf32>
    %185 = math.exp %184 : vector<8x10xf32>
    %cst_63 = arith.constant dense<0.000000e+00> : vector<8xf32>
    %186 = vector.multi_reduction <add>, %185, %cst_63 [1] : vector<8x10xf32> to vector<8xf32>
    %187 = vector.shape_cast %186 : vector<8xf32> to vector<8x1xf32>
    %188 = tpu.reciprocal %187 {approx = true} : vector<8x1xf32> -> vector<8x1xf32>
    %189 = vector.broadcast %188 : vector<8x1xf32> to vector<8x10xf32>
    %190 = arith.mulf %185, %189 : vector<8x10xf32>
    %191 = arith.truncf %190 : vector<8x10xf32> to vector<8x10xbf16>
    %cst_64 = arith.constant dense<0.000000e+00> : vector<8x8xf32>
    %192 = tpu.matmul %191, %177, %cst_64 {dimension_numbers = #tpu.dot_dimension_numbers<[1], [0], [0], [1], [0, 0, 1, 1], [], []>} : vector<8x10xbf16>, vector<10x8xbf16>, vector<8x8xf32> -> vector<8x8xf32>
    %193 = vector.extract_strided_slice %142 {offsets = [0, 16], sizes = [8, 8], strides = [1, 1]} : vector<8x32xf32> to vector<8x8xf32>
    %194 = arith.truncf %193 : vector<8x8xf32> to vector<8x8xbf16>
    %195 = vector.extract_strided_slice %149 {offsets = [0, 16], sizes = [10, 8], strides = [1, 1]} : vector<10x32xf32> to vector<10x8xf32>
    %196 = arith.truncf %195 : vector<10x8xf32> to vector<10x8xbf16>
    %197 = vector.extract_strided_slice %150 {offsets = [0, 16], sizes = [10, 8], strides = [1, 1]} : vector<10x32xf32> to vector<10x8xf32>
    %198 = arith.truncf %197 : vector<10x8xf32> to vector<10x8xbf16>
    %cst_65 = arith.constant dense<0.000000e+00> : vector<8x10xf32>
    %199 = tpu.matmul %194, %196, %cst_65 {dimension_numbers = #tpu.dot_dimension_numbers<[1], [1], [0], [0], [0, 0, 1, 0], [], []>} : vector<8x8xbf16>, vector<10x8xbf16>, vector<8x10xf32> -> vector<8x10xf32>
    %cst_66 = arith.constant 0.353553385 : f32
    %200 = vector.broadcast %cst_66 : f32 to vector<8x10xf32>
    %201 = arith.mulf %199, %200 : vector<8x10xf32>
    %cst_67 = arith.constant dense<0xFF800000> : vector<8xf32>
    %202 = vector.multi_reduction <maximumf>, %201, %cst_67 [1] : vector<8x10xf32> to vector<8xf32>
    %203 = vector.shape_cast %202 : vector<8xf32> to vector<8x1xf32>
    %204 = vector.broadcast %203 : vector<8x1xf32> to vector<8x10xf32>
    %205 = arith.subf %201, %204 : vector<8x10xf32>
    %206 = math.exp %205 : vector<8x10xf32>
    %cst_68 = arith.constant dense<0.000000e+00> : vector<8xf32>
    %207 = vector.multi_reduction <add>, %206, %cst_68 [1] : vector<8x10xf32> to vector<8xf32>
    %208 = vector.shape_cast %207 : vector<8xf32> to vector<8x1xf32>
    %209 = tpu.reciprocal %208 {approx = true} : vector<8x1xf32> -> vector<8x1xf32>
    %210 = vector.broadcast %209 : vector<8x1xf32> to vector<8x10xf32>
    %211 = arith.mulf %206, %210 : vector<8x10xf32>
    %212 = arith.truncf %211 : vector<8x10xf32> to vector<8x10xbf16>
    %cst_69 = arith.constant dense<0.000000e+00> : vector<8x8xf32>
    %213 = tpu.matmul %212, %198, %cst_69 {dimension_numbers = #tpu.dot_dimension_numbers<[1], [0], [0], [1], [0, 0, 1, 1], [], []>} : vector<8x10xbf16>, vector<10x8xbf16>, vector<8x8xf32> -> vector<8x8xf32>
    %214 = vector.extract_strided_slice %142 {offsets = [0, 24], sizes = [8, 8], strides = [1, 1]} : vector<8x32xf32> to vector<8x8xf32>
    %215 = arith.truncf %214 : vector<8x8xf32> to vector<8x8xbf16>
    %216 = vector.extract_strided_slice %149 {offsets = [0, 24], sizes = [10, 8], strides = [1, 1]} : vector<10x32xf32> to vector<10x8xf32>
    %217 = arith.truncf %216 : vector<10x8xf32> to vector<10x8xbf16>
    %218 = vector.extract_strided_slice %150 {offsets = [0, 24], sizes = [10, 8], strides = [1, 1]} : vector<10x32xf32> to vector<10x8xf32>
    %219 = arith.truncf %218 : vector<10x8xf32> to vector<10x8xbf16>
    %cst_70 = arith.constant dense<0.000000e+00> : vector<8x10xf32>
    %220 = tpu.matmul %215, %217, %cst_70 {dimension_numbers = #tpu.dot_dimension_numbers<[1], [1], [0], [0], [0, 0, 1, 0], [], []>} : vector<8x8xbf16>, vector<10x8xbf16>, vector<8x10xf32> -> vector<8x10xf32>
    %cst_71 = arith.constant 0.353553385 : f32
    %221 = vector.broadcast %cst_71 : f32 to vector<8x10xf32>
    %222 = arith.mulf %220, %221 : vector<8x10xf32>
    %cst_72 = arith.constant dense<0xFF800000> : vector<8xf32>
    %223 = vector.multi_reduction <maximumf>, %222, %cst_72 [1] : vector<8x10xf32> to vector<8xf32>
    %224 = vector.shape_cast %223 : vector<8xf32> to vector<8x1xf32>
    %225 = vector.broadcast %224 : vector<8x1xf32> to vector<8x10xf32>
    %226 = arith.subf %222, %225 : vector<8x10xf32>
    %227 = math.exp %226 : vector<8x10xf32>
    %cst_73 = arith.constant dense<0.000000e+00> : vector<8xf32>
    %228 = vector.multi_reduction <add>, %227, %cst_73 [1] : vector<8x10xf32> to vector<8xf32>
    %229 = vector.shape_cast %228 : vector<8xf32> to vector<8x1xf32>
    %230 = tpu.reciprocal %229 {approx = true} : vector<8x1xf32> -> vector<8x1xf32>
    %231 = vector.broadcast %230 : vector<8x1xf32> to vector<8x10xf32>
    %232 = arith.mulf %227, %231 : vector<8x10xf32>
    %233 = arith.truncf %232 : vector<8x10xf32> to vector<8x10xbf16>
    %cst_74 = arith.constant dense<0.000000e+00> : vector<8x8xf32>
    %234 = tpu.matmul %233, %219, %cst_74 {dimension_numbers = #tpu.dot_dimension_numbers<[1], [0], [0], [1], [0, 0, 1, 1], [], []>} : vector<8x10xbf16>, vector<10x8xbf16>, vector<8x8xf32> -> vector<8x8xf32>
    %235 = tpu.concatenate %171, %192, %213, %234 in 1 : vector<8x8xf32>, vector<8x8xf32>, vector<8x8xf32>, vector<8x8xf32> -> vector<8x32xf32>
    %236 = arith.truncf %235 : vector<8x32xf32> to vector<8x32xbf16>
    %c0_75 = arith.constant 0 : index
    %c0_76 = arith.constant 0 : index
    %237 = vector.load %arg13[%c0_75, %c0_76] : memref<32x32xbf16, #tpu.memory_space<vmem>>, vector<32x32xbf16>
    %cst_77 = arith.constant dense<0.000000e+00> : vector<8x32xf32>
    %238 = tpu.matmul %236, %237, %cst_77 {dimension_numbers = #tpu.dot_dimension_numbers<[1], [0], [0], [1], [0, 0, 1, 1], [], []>} : vector<8x32xbf16>, vector<32x32xbf16>, vector<8x32xf32> -> vector<8x32xf32>
    %c0_78 = arith.constant 0 : index
    %c0_79 = arith.constant 0 : index
    %239 = vector.load %arg14[%c0_78, %c0_79] : memref<1x32xf32, #tpu.memory_space<vmem>>, vector<1x32xf32>
    %240 = vector.broadcast %239 : vector<1x32xf32> to vector<8x32xf32>
    %241 = arith.addf %238, %240 : vector<8x32xf32>
    %242 = arith.addf %136, %241 : vector<8x32xf32>
    %cst_80 = arith.constant dense<0.000000e+00> : vector<8xf32>
    %243 = vector.multi_reduction <add>, %242, %cst_80 [1] : vector<8x32xf32> to vector<8xf32>
    %244 = vector.shape_cast %243 : vector<8xf32> to vector<8x1xf32>
    %cst_81 = arith.constant 3.200000e+01 : f32
    %245 = vector.broadcast %cst_81 : f32 to vector<8x1xf32>
    %246 = arith.divf %244, %245 : vector<8x1xf32>
    %247 = vector.broadcast %246 : vector<8x1xf32> to vector<8x32xf32>
    %248 = arith.subf %242, %247 : vector<8x32xf32>
    %249 = arith.mulf %248, %248 : vector<8x32xf32>
    %cst_82 = arith.constant dense<0.000000e+00> : vector<8xf32>
    %250 = vector.multi_reduction <add>, %249, %cst_82 [1] : vector<8x32xf32> to vector<8xf32>
    %251 = vector.shape_cast %250 : vector<8xf32> to vector<8x1xf32>
    %cst_83 = arith.constant 3.200000e+01 : f32
    %252 = vector.broadcast %cst_83 : f32 to vector<8x1xf32>
    %253 = arith.divf %251, %252 : vector<8x1xf32>
    %cst_84 = arith.constant 9.99999974E-6 : f32
    %254 = vector.broadcast %cst_84 : f32 to vector<8x1xf32>
    %255 = arith.addf %253, %254 : vector<8x1xf32>
    %256 = math.rsqrt %255 : vector<8x1xf32>
    %257 = vector.broadcast %256 : vector<8x1xf32> to vector<8x32xf32>
    %258 = arith.mulf %248, %257 : vector<8x32xf32>
    %c0_85 = arith.constant 0 : index
    %c0_86 = arith.constant 0 : index
    %259 = vector.load %arg15[%c0_85, %c0_86] : memref<1x32xf32, #tpu.memory_space<vmem>>, vector<1x32xf32>
    %260 = vector.broadcast %259 : vector<1x32xf32> to vector<8x32xf32>
    %261 = arith.mulf %258, %260 : vector<8x32xf32>
    %c0_87 = arith.constant 0 : index
    %c0_88 = arith.constant 0 : index
    %262 = vector.load %arg16[%c0_87, %c0_88] : memref<1x32xf32, #tpu.memory_space<vmem>>, vector<1x32xf32>
    %263 = vector.broadcast %262 : vector<1x32xf32> to vector<8x32xf32>
    %264 = arith.addf %261, %263 : vector<8x32xf32>
    %265 = arith.truncf %264 : vector<8x32xf32> to vector<8x32xbf16>
    %c0_89 = arith.constant 0 : index
    %c0_90 = arith.constant 0 : index
    %266 = vector.load %arg17[%c0_89, %c0_90] : memref<32x64xbf16, #tpu.memory_space<vmem>>, vector<32x64xbf16>
    %cst_91 = arith.constant dense<0.000000e+00> : vector<8x64xf32>
    %267 = tpu.matmul %265, %266, %cst_91 {dimension_numbers = #tpu.dot_dimension_numbers<[1], [0], [0], [1], [0, 0, 1, 1], [], []>} : vector<8x32xbf16>, vector<32x64xbf16>, vector<8x64xf32> -> vector<8x64xf32>
    %c0_92 = arith.constant 0 : index
    %c0_93 = arith.constant 0 : index
    %268 = vector.load %arg18[%c0_92, %c0_93] : memref<1x64xf32, #tpu.memory_space<vmem>>, vector<1x64xf32>
    %269 = vector.broadcast %268 : vector<1x64xf32> to vector<8x64xf32>
    %270 = arith.addf %267, %269 : vector<8x64xf32>
    %cst_94 = arith.constant 0.000000e+00 : f32
    %271 = vector.broadcast %cst_94 : f32 to vector<8x64xf32>
    %272 = arith.maximumf %270, %271 : vector<8x64xf32>
    %273 = arith.truncf %272 : vector<8x64xf32> to vector<8x64xbf16>
    %c0_95 = arith.constant 0 : index
    %c0_96 = arith.constant 0 : index
    %274 = vector.load %arg19[%c0_95, %c0_96] : memref<64x32xbf16, #tpu.memory_space<vmem>>, vector<64x32xbf16>
    %cst_97 = arith.constant dense<0.000000e+00> : vector<8x32xf32>
    %275 = tpu.matmul %273, %274, %cst_97 {dimension_numbers = #tpu.dot_dimension_numbers<[1], [0], [0], [1], [0, 0, 1, 1], [], []>} : vector<8x64xbf16>, vector<64x32xbf16>, vector<8x32xf32> -> vector<8x32xf32>
    %c0_98 = arith.constant 0 : index
    %c0_99 = arith.constant 0 : index
    %276 = vector.load %arg20[%c0_98, %c0_99] : memref<1x32xf32, #tpu.memory_space<vmem>>, vector<1x32xf32>
    %277 = vector.broadcast %276 : vector<1x32xf32> to vector<8x32xf32>
    %278 = arith.addf %275, %277 : vector<8x32xf32>
    %279 = arith.addf %264, %278 : vector<8x32xf32>
    %cst_100 = arith.constant dense<0.000000e+00> : vector<8xf32>
    %280 = vector.multi_reduction <add>, %279, %cst_100 [1] : vector<8x32xf32> to vector<8xf32>
    %281 = vector.shape_cast %280 : vector<8xf32> to vector<8x1xf32>
    %cst_101 = arith.constant 3.200000e+01 : f32
    %282 = vector.broadcast %cst_101 : f32 to vector<8x1xf32>
    %283 = arith.divf %281, %282 : vector<8x1xf32>
    %284 = vector.broadcast %283 : vector<8x1xf32> to vector<8x32xf32>
    %285 = arith.subf %279, %284 : vector<8x32xf32>
    %286 = arith.mulf %285, %285 : vector<8x32xf32>
    %cst_102 = arith.constant dense<0.000000e+00> : vector<8xf32>
    %287 = vector.multi_reduction <add>, %286, %cst_102 [1] : vector<8x32xf32> to vector<8xf32>
    %288 = vector.shape_cast %287 : vector<8xf32> to vector<8x1xf32>
    %cst_103 = arith.constant 3.200000e+01 : f32
    %289 = vector.broadcast %cst_103 : f32 to vector<8x1xf32>
    %290 = arith.divf %288, %289 : vector<8x1xf32>
    %cst_104 = arith.constant 9.99999974E-6 : f32
    %291 = vector.broadcast %cst_104 : f32 to vector<8x1xf32>
    %292 = arith.addf %290, %291 : vector<8x1xf32>
    %293 = math.rsqrt %292 : vector<8x1xf32>
    %294 = vector.broadcast %293 : vector<8x1xf32> to vector<8x32xf32>
    %295 = arith.mulf %285, %294 : vector<8x32xf32>
    %c0_105 = arith.constant 0 : index
    %c0_106 = arith.constant 0 : index
    %296 = vector.load %arg21[%c0_105, %c0_106] : memref<1x32xf32, #tpu.memory_space<vmem>>, vector<1x32xf32>
    %297 = vector.broadcast %296 : vector<1x32xf32> to vector<8x32xf32>
    %298 = arith.mulf %295, %297 : vector<8x32xf32>
    %c0_107 = arith.constant 0 : index
    %c0_108 = arith.constant 0 : index
    %299 = vector.load %arg22[%c0_107, %c0_108] : memref<1x32xf32, #tpu.memory_space<vmem>>, vector<1x32xf32>
    %300 = vector.broadcast %299 : vector<1x32xf32> to vector<8x32xf32>
    %301 = arith.addf %298, %300 : vector<8x32xf32>
    %c0_109 = arith.constant 0 : index
    %c0_110 = arith.constant 0 : index
    %c0_111 = arith.constant 0 : index
    %302 = vector.load %arg23[%c0_109, %c0_110, %c0_111] : memref<1x8x32xf32, #tpu.memory_space<vmem>>, vector<1x8x32xf32>
    %303 = vector.shape_cast %302 : vector<1x8x32xf32> to vector<8x32xf32>
    %304 = vector.shape_cast %301 : vector<8x32xf32> to vector<1x8x32xf32>
    tpu.vector_store %arg23[%c0_109, %c0_110, %c0_111], %304 {strides = array<i32>} : memref<1x8x32xf32, #tpu.memory_space<vmem>>, vector<1x8x32xf32>,
    return
  }
  func.func @transform_0(%arg0: i32) -> (i32, i32, i32) {
    %c0_i32 = arith.constant 0 : i32
    %c0_i32_0 = arith.constant 0 : i32
    %c0_i32_1 = arith.constant 0 : i32
    return %arg0, %c0_i32, %c0_i32_0 : i32, i32, i32
  }
  func.func @transform_1(%arg0: i32) -> (i32, i32, i32) {
    %c0_i32 = arith.constant 0 : i32
    %c0_i32_0 = arith.constant 0 : i32
    %c0_i32_1 = arith.constant 0 : i32
    return %arg0, %c0_i32, %c0_i32_0 : i32, i32, i32
  }
  func.func @transform_2(%arg0: i32) -> (i32, i32) {
    %c0_i32 = arith.constant 0 : i32
    %c0_i32_0 = arith.constant 0 : i32
    %c0_i32_1 = arith.constant 0 : i32
    return %c0_i32, %c0_i32_0 : i32, i32
  }
  func.func @transform_3(%arg0: i32) -> (i32, i32) {
    %c0_i32 = arith.constant 0 : i32
    %c0_i32_0 = arith.constant 0 : i32
    %c0_i32_1 = arith.constant 0 : i32
    return %c0_i32, %c0_i32_0 : i32, i32
  }
  func.func @transform_4(%arg0: i32) -> (i32, i32) {
    %c0_i32 = arith.constant 0 : i32
    %c0_i32_0 = arith.constant 0 : i32
    %c0_i32_1 = arith.constant 0 : i32
    return %c0_i32, %c0_i32_0 : i32, i32
  }
  func.func @transform_5(%arg0: i32) -> (i32, i32) {
    %c0_i32 = arith.constant 0 : i32
    %c0_i32_0 = arith.constant 0 : i32
    %c0_i32_1 = arith.constant 0 : i32
    return %c0_i32, %c0_i32_0 : i32, i32
  }
  func.func @transform_6(%arg0: i32) -> (i32, i32) {
    %c0_i32 = arith.constant 0 : i32
    %c0_i32_0 = arith.constant 0 : i32
    %c0_i32_1 = arith.constant 0 : i32
    return %c0_i32, %c0_i32_0 : i32, i32
  }
  func.func @transform_7(%arg0: i32) -> (i32, i32) {
    %c0_i32 = arith.constant 0 : i32
    %c0_i32_0 = arith.constant 0 : i32
    %c0_i32_1 = arith.constant 0 : i32
    return %c0_i32, %c0_i32_0 : i32, i32
  }
  func.func @transform_8(%arg0: i32) -> (i32, i32) {
    %c0_i32 = arith.constant 0 : i32
    %c0_i32_0 = arith.constant 0 : i32
    %c0_i32_1 = arith.constant 0 : i32
    return %c0_i32, %c0_i32_0 : i32, i32
  }
  func.func @transform_9(%arg0: i32) -> (i32, i32) {
    %c0_i32 = arith.constant 0 : i32
    %c0_i32_0 = arith.constant 0 : i32
    %c0_i32_1 = arith.constant 0 : i32
    return %c0_i32, %c0_i32_0 : i32, i32
  }
  func.func @transform_10(%arg0: i32) -> (i32, i32) {
    %c0_i32 = arith.constant 0 : i32
    %c0_i32_0 = arith.constant 0 : i32
    %c0_i32_1 = arith.constant 0 : i32
    return %c0_i32, %c0_i32_0 : i32, i32
  }
  func.func @transform_11(%arg0: i32) -> (i32, i32) {
    %c0_i32 = arith.constant 0 : i32
    %c0_i32_0 = arith.constant 0 : i32
    %c0_i32_1 = arith.constant 0 : i32
    return %c0_i32, %c0_i32_0 : i32, i32
  }
  func.func @transform_12(%arg0: i32) -> (i32, i32) {
    %c0_i32 = arith.constant 0 : i32
    %c0_i32_0 = arith.constant 0 : i32
    %c0_i32_1 = arith.constant 0 : i32
    return %c0_i32, %c0_i32_0 : i32, i32
  }
  func.func @transform_13(%arg0: i32) -> (i32, i32) {
    %c0_i32 = arith.constant 0 : i32
    %c0_i32_0 = arith.constant 0 : i32
    %c0_i32_1 = arith.constant 0 : i32
    return %c0_i32, %c0_i32_0 : i32, i32
  }
  func.func @transform_14(%arg0: i32) -> (i32, i32) {
    %c0_i32 = arith.constant 0 : i32
    %c0_i32_0 = arith.constant 0 : i32
    %c0_i32_1 = arith.constant 0 : i32
    return %c0_i32, %c0_i32_0 : i32, i32
  }
  func.func @transform_15(%arg0: i32) -> (i32, i32) {
    %c0_i32 = arith.constant 0 : i32
    %c0_i32_0 = arith.constant 0 : i32
    %c0_i32_1 = arith.constant 0 : i32
    return %c0_i32, %c0_i32_0 : i32, i32
  }
  func.func @transform_16(%arg0: i32) -> (i32, i32) {
    %c0_i32 = arith.constant 0 : i32
    %c0_i32_0 = arith.constant 0 : i32
    %c0_i32_1 = arith.constant 0 : i32
    return %c0_i32, %c0_i32_0 : i32, i32
  }
  func.func @transform_17(%arg0: i32) -> (i32, i32) {
    %c0_i32 = arith.constant 0 : i32
    %c0_i32_0 = arith.constant 0 : i32
    %c0_i32_1 = arith.constant 0 : i32
    return %c0_i32, %c0_i32_0 : i32, i32
  }
  func.func @transform_18(%arg0: i32) -> (i32, i32) {
    %c0_i32 = arith.constant 0 : i32
    %c0_i32_0 = arith.constant 0 : i32
    %c0_i32_1 = arith.constant 0 : i32
    return %c0_i32, %c0_i32_0 : i32, i32
  }
  func.func @transform_19(%arg0: i32) -> (i32, i32) {
    %c0_i32 = arith.constant 0 : i32
    %c0_i32_0 = arith.constant 0 : i32
    %c0_i32_1 = arith.constant 0 : i32
    return %c0_i32, %c0_i32_0 : i32, i32
  }
  func.func @transform_20(%arg0: i32) -> (i32, i32) {
    %c0_i32 = arith.constant 0 : i32
    %c0_i32_0 = arith.constant 0 : i32
    %c0_i32_1 = arith.constant 0 : i32
    return %c0_i32, %c0_i32_0 : i32, i32
  }
  func.func @transform_21(%arg0: i32) -> (i32, i32) {
    %c0_i32 = arith.constant 0 : i32
    %c0_i32_0 = arith.constant 0 : i32
    %c0_i32_1 = arith.constant 0 : i32
    return %c0_i32, %c0_i32_0 : i32, i32
  }
  func.func @transform_22(%arg0: i32) -> (i32, i32, i32) {
    %c0_i32 = arith.constant 0 : i32
    %c0_i32_0 = arith.constant 0 : i32
    %c0_i32_1 = arith.constant 0 : i32
    return %arg0, %c0_i32, %c0_i32_0 : i32, i32, i32
  }
}

</mosaic_0001>

<bundles_post_ra>
// kernel: transformer_decoder_forward.5
= control target key start
LH: loop header
LB: loop body
LE: loop exit
PB: predicated region body
PF: predicated region fallthrough
CT: control target
= control target key end

     0   :  { %s160_s0 = inlined_call_operand.vmem [shape: f32[16,32], index: 0, kind: input, shape index: {}]   ;;  %s161_s1 = inlined_call_operand.vmem [shape: bf16[32,50], index: 1, kind: input, shape index: {}]   ;;  %s162_s2 = inlined_call_operand.vmem [shape: f32[1,50], index: 2, kind: input, shape index: {}]   ;;  %s163_s3 = inlined_call_operand.hbm [shape: f32[16,50], index: 3, kind: output, shape index: {}]  }
   0x1   :  { %v88_v0 = vld [vmem:[%s161_s1 + $0x8] sm:$0xff]  ;;  %v87_v1 = vld [vmem:[%s161_s1] sm:$0xff] }
   0x2   :  { %49 = vmatpush.bf16.msra.mxu0 %v88_v0  ;;  %v16_v2 = vld [vmem:[%s160_s0] sm:$0xff]  ;;  %v17_v3 = vld [vmem:[%s160_s0 + $0x8] sm:$0xff] }
   0x3   :  { %8 = vsyncpa [#allocation3], 0  ;;  %v18_v4 = vpack.c.bf16 %v17_v3, %v16_v2  ;;  %vm39_vm0 = vcmask 261120   ;;  %v92_v5 = vld [vmem:[%s162_s2] ss:$0 sm:$0xff]  ;;  %vm57_vm1 = vcmask 408576  }
   0x4   :  { %s119_s1 = smov [#allocation2]   ;;  %s66_s25 = sshll.u32 %s163_s3, 4  ;;  %s67_s25 = int_to_ptr.hbm [resolvable:$true] %s66_s25 }
   0x5   :  { %s64_s22 = sshll.u32 %s119_s1, 4  ;;  %s120_s0 = smov 128   ;;  %s65_s22 = int_to_ptr.vmem [resolvable:$true] %s64_s22 }
   0x6   :  { %50 = vmatpush.bf16.msra.mxu0 %v87_v1  ;;  %s121_s26 = smov 8  }
   0x9   :  { %86 = vmatmul.msk.bf16.vlgmr.msra.gmra.mxu0 %vm39_vm0, %v18_v4 }
  0x86   :  { %v52_v6 = vpop.f32.mrf.mxu0 }
  0x87   :  { %v53_v7 = vadd.f32 %v92_v5, %v52_v6 }
  0x89   :  { %58 = vst.msk [vmem:[#allocation2] sm:$0xff] %vm57_vm1, %v53_v7 }
  0x8e   :  { %v54_v8 = vpop.f32.mrf.mxu0 }
  0x8f   :  { %v55_v9 = vadd.f32 %v92_v5, %v54_v8 }
  0x91   :  { %59 = vst.msk [vmem:[#allocation2 + $0x8] sm:$0xff] %vm57_vm1, %v55_v9 }
  0x92   :  { %72 = dma.vmem_to_hbm [thread:$0]  %s65_s22, 256, %s67_s25, [#allocation3], %s120_s0, %s120_s0, %s121_s26  }
  0x93   :  { %117 = dma.done.wait [#allocation3], 256  }
  0x94   :  { %118 = vsyncadd [#allocation3], 4294967040 }
  0x95   :  { %77 = vsyncpa [#allocation3], 1 }

// kernel: transformer_decoder_forward.3
= control target key start
LH: loop header
LB: loop body
LE: loop exit
PB: predicated region body
PF: predicated region fallthrough
CT: control target
= control target key end

     0   :  { %s2234_s0 = inlined_call_operand.vmem [shape: f32[2,8,32], index: 0, kind: input, shape index: {}]   ;;  %s2235_s1 = inlined_call_operand.vmem [shape: f32[2,10,32], index: 1, kind: input, shape index: {}]   ;;  %s2236_s2 = inlined_call_operand.vmem [shape: bf16[32,96], index: 2, kind: input, shape index: {}]   ;;  %s2237_s3 = inlined_call_operand.vmem [shape: f32[1,96], index: 3, kind: input, shape index: {}]   ;;  %s2238_s4 = inlined_call_operand.vmem [shape: bf16[32,32], index: 4, kind: input, shape index: {}]   ;;  %s2239_s5 = inlined_call_operand.vmem [shape: f32[1,32], index: 5, kind: input, shape index: {}]   ;;  %s2240_s6 = inlined_call_operand.vmem [shape: f32[1,32], index: 6, kind: input, shape index: {}]   ;;  %s2241_s7 = inlined_call_operand.vmem [shape: f32[1,32], index: 7, kind: input, shape index: {}]   ;;  %s2242_s8 = inlined_call_operand.vmem [shape: bf16[32,32], index: 8, kind: input, shape index: {}]   ;;  %s2243_s9 = inlined_call_operand.vmem [shape: f32[1,32], index: 9, kind: input, shape index: {}]   ;;  %s2244_s10 = inlined_call_operand.vmem [shape: bf16[32,64], index: 10, kind: input, shape index: {}]   ;;  %s2245_s11 = inlined_call_operand.vmem [shape: f32[1,64], index: 11, kind: input, shape index: {}]   ;;  %s2246_s12 = inlined_call_operand.vmem [shape: bf16[32,32], index: 12, kind: input, shape index: {}]   ;;  %s2247_s13 = inlined_call_operand.vmem [shape: f32[1,32], index: 13, kind: input, shape index: {}]   ;;  %s2248_s14 = inlined_call_operand.vmem [shape: f32[1,32], index: 14, kind: input, shape index: {}]   ;;  %s2249_s15 = inlined_call_operand.vmem [shape: f32[1,32], index: 15, kind: input, shape index: {}]   ;;  %s2250_s16 = inlined_call_operand.vmem [shape: bf16[32,64], index: 16, kind: input, shape index: {}]   ;;  %s2251_s17 = inlined_call_operand.vmem [shape: f32[1,64], index: 17, kind: input, shape index: {}]   ;;  %s2252_s18 = inlined_call_operand.vmem [shape: bf16[64,32], index: 18, kind: input, shape index: {}]   ;;  %s2253_s19 = inlined_call_operand.vmem [shape: f32[1,32], index: 19, kind: input, shape index: {}]   ;;  %s2254_s20 = inlined_call_operand.vmem [shape: f32[1,32], index: 20, kind: input, shape index: {}]   ;;  %s2255_s21 = inlined_call_operand.vmem [shape: f32[1,32], index: 21, kind: input, shape index: {}]   ;;  %s2256_s22 = inlined_call_operand.vmem [shape: f32[2,8,32], index: 22, kind: output, shape index: {}]  }
   0x1   :  { %2271 = sst [smem:[#allocation2_spill]] %s2234_s0 }
   0x2   :  { %2272 = sst [smem:[#allocation3_spill]] %s2235_s1 }
   0x3   :  { %2273 = sst [smem:[#allocation4_spill]] %s2236_s2 }
   0x4   :  { %2274 = sst [smem:[#allocation5_spill]] %s2237_s3  ;;  %s1987_s3 = smov 0  }
   0x5   :  { %2275 = sst [smem:[#allocation6_spill]] %s2238_s4 }
   0x6   :  { %2276 = sst [smem:[#allocation7_spill]] %s2239_s5 }
   0x7   :  { %2277 = sst [smem:[#allocation8_spill]] %s2240_s6 }
   0x8 LB: > { %s1656_s28 = sadd.s32 4294967295, %s1854_s3   ;;  %p1660_p0 = scmp.ge.s32.totalorder %s1854_s3, 1  ;;  %s1854_s3 = sphi %s1987_s3, %s32_s3  }
   0x9   : > { %p621_p1 = scmp.lt.s32.totalorder %s1854_s3, 3 }
   0xb   : > { %p622_p2 = pnand %p1660_p0, %p621_p1 }
   0xc   : > { %s2278_s4 = sld [smem:[#allocation4_spill]] (!%p622_p2)  ;;  %p686_p3 = scmp.lt.s32.totalorder (!%p622_p2), %s1656_s28, 1 }
   0xd   : > { %625 = sbr.rel (%p622_p2) target bundleno = 3208 (0xc88), region = 108  ;;  %s2279_s6 = sld [smem:[#allocation2_spill]] (!%p622_p2) }
   0xe   : > { %s2280_s27 = sld [smem:[#allocation5_spill]] (!%p622_p2)  ;;  %s2267_s29 = smov (!%p622_p2), 104  }
   0xf   : > { %s1857_s30 = smov (!%p622_p2), 120   ;;  %s2266_s0 = smov (!%p622_p2), 96  }
  0x10   : > { %s2260_s23 = smov (!%p622_p2), 80   ;;  %s2262_s5 = smov (!%p622_p2), 72  }
  0x11   : > { %s2261_s24 = smov (!%p622_p2), 88   ;;  %s1865_s26 = smov (!%p622_p2), 40  }
  0x12   : > { %v1756_v0 = vld [vmem:[%s2278_s4 + $0x8] sm:$0xff]  ;;  %v1755_v1 = vld [vmem:[%s2278_s4] sm:$0xff]  ;;  %s2296_s28 = smov (!%p686_p3, %s1656_s28), 1  ;;  %vm724_vm0 = vcmask 261120   ;;  %vm751_vm1 = vcmask 64512   ;;  %v741_v20 = vlaneseq  ;;  %v1863_v24 = vmov 0.0  }
  0x13   : > { %734 = vmatpush.bf16.msra.mxu0 %v1756_v0  ;;  %s2259_s1 = sshll.u32 %s2296_s28, 3  ;;  %vm790_vm3 = vcmask 1043456   ;;  %s1866_s2 = smov 56   ;;  %vm994_vm4 = vcmask 130048   ;;  %vm996_vm5 = vcmask 195584   ;;  %vm1172_vm10 = vcmask 80896  }
  0x14   : > { %s689_s25 = scalar_lea.vmem %s2279_s6, %s2259_s1  ;;  %v1795_v4 = vld [vmem:[%s2280_s27] ss:$0 sm:$0xff]  ;;  %s2269_s6 = smov 112   ;;  %v742_v21 = vshrl.u32 %v741_v20, 7  ;;  %v744_v22 = vand.u32 127, %v741_v20  ;;  %vm1191_vm11 = vcmask 1044480  }
  0x15   : > { %v2009_v2 = vld [vmem:[%s689_s25] sm:$0xff]  ;;  %s1864_s25 = smov 64   ;;  %s1867_s27 = smov 48   ;;  %vm1540_vm15 = vcmask 523264  }
  0x16   : > { %v703_v3 = vpack.c.bf16 %v2009_v2, %v2009_v2  ;;  %vm745_vm2 = vcmp.gt.s32.totalorder %v744_v22, %v742_v21  ;;  %s2291_s1 = smov 8  }
  0x17   : > { %735 = vmatpush.bf16.msra.mxu0 %v1755_v1  ;;  %v746_v25 = vsel %vm745_vm2, -1e+30, %v1863_v24 }
  0x1a   : > { %1673 = vmatmul.msk.bf16.vlgmr.msra.gmra.mxu0 %vm724_vm0, %v703_v3 }
  0x97   : > { %v737_v5 = vpop.f32.mrf.mxu0 }
  0x98   : > { %v738_v6 = vadd.f32 %v1795_v4, %v737_v5 }
  0x9a   : > { %v2017_v7 = vpack.c.bf16 %v738_v6, %v738_v6 }
  0x9c   : > { %923 = vrot.lane.b32.xlu2 %v2017_v7, %s2267_s29  ;;  %807 = vrot.lane.b32.xlu1 %v2017_v7, %s1857_s30  ;;  %s2293_s29 = smov 24  }
  0x9d   : > { %749 = vrot.lane.b32.xlu0 %v2017_v7, %s2266_s0 }
  0x9f   : > { %v739_v8 = vpop.f32.mrf.mxu0 }
  0xa4   : > { %867 = vrot.lane.b32.xlu2 %v2017_v7, %s2260_s23  ;;  %925 = vrot.lane.b32.xlu1 %v2017_v7, %s2262_s5  ;;  %s2281_s23 = sld [smem:[#allocation6_spill]] }
  0xa5   : > { %809 = vrot.lane.b32.xlu0 %v2017_v7, %s2261_s24  ;;  %s2282_s5 = sld [smem:[#allocation7_spill]]  ;;  %s1754_s24 = sshll.u32 %s2296_s28, 4 }
  0xad   : > { %865 = vrot.lane.b32.xlu0 %v2017_v7, %s2269_s6 }
  0xf6   : > { %v924_v9 = vpop.permute.xlu2 %923 }
  0xfe   : > { %v868_v10 = vpop.permute.xlu2 %867 }
  0xff   : > { %v873_v11 = vsel %vm751_vm1, %v868_v10, 0 }
 0x100   : > { %882 = vmatpush.bf16.xpose.msrb.mxu0 %v873_v11 }
 0x10e   : > { %v808_v12 = vpop.permute.xlu1 %807 }
 0x10f   : > { %v750_v13 = vpop.permute.xlu0 %749 }
 0x110   : > { %v756_v14 = vsel %vm751_vm1, %v750_v13, 0 }
 0x111   : > { %765 = vmatpush.bf16.xpose.msra.mxu1 %v756_v14 }
 0x116   : > { %v926_v15 = vpop.permute.xlu1 %925 }
 0x117   : > { %v810_v16 = vpop.permute.xlu0 %809  ;;  %v931_v17 = vsel %vm751_vm1, %v926_v15, 0 }
 0x118   : > { %1674 = vmatmul.msk.bf16.vlgmr.msra.gmra.mxu1 %vm751_vm1, %v2017_v7  ;;  %v815_v18 = vsel %vm751_vm1, %v810_v16, 0 }
 0x119   : > { %824 = vmatpush.bf16.xpose.msra.mxu3 %v815_v18 }
 0x11f   : > { %v866_v19 = vpop.permute.xlu0 %865 }
 0x120   : > { %1676 = vmatmul.msk.bf16.vlgmr.msra.gmra.mxu3 %vm751_vm1, %v808_v12  ;;  %1678 = vmatmul.msk.bf16.vlgmr.msrb.gmra.mxu0 %vm751_vm1, %v866_v19 }
 0x121   : > { %940 = vmatpush.bf16.xpose.msrb.mxu3 %v931_v17 }
 0x130   : > { %1680 = vmatmul.msk.bf16.vlgmr.msrb.gmra.mxu3 %vm751_vm1, %v924_v9 }
 0x195   : > { %v767_v23 = vpop.f32.mrf.mxu1 }
 0x196   : > { %v771_v26 = vmul.f32 0.35355338, %v767_v23 }
 0x198   : > { %v772_v27 = vadd.f32 %v771_v26, %v746_v25 }
 0x19a   : > { %v773_v28 = vsel %vm751_vm1, %v772_v27, -inf }
 0x19b   : > { %774 = vmax.xlane.f32.xlu1 %v773_v28 }
 0x19d   : > { %v769_v29 = vpop.f32.mrf.mxu1  ;;  %v884_v30 = vpop.f32.mrf.mxu0 }
 0x19e   : > { %v888_v35 = vmul.f32 0.35355338, %v884_v30 }
 0x1a0   : > { %v889_v38 = vadd.f32 %v888_v35, %v746_v25  ;;  %v1757_v35 = vld [vmem:[%s2281_s23] sm:$0xff] }
 0x1a2   : > { %v890_v39 = vsel %vm751_vm1, %v889_v38, -inf }
 0x1a3   : > { %v826_v31 = vpop.f32.mrf.mxu3 }
 0x1a4   : > { %v830_v32 = vmul.f32 0.35355338, %v826_v31 }
 0x1a5   : > { %v886_v33 = vpop.f32.mrf.mxu0 }
 0x1a6   : > { %v831_v34 = vadd.f32 %v830_v32, %v746_v25 }
 0x1a8   : > { %v832_v36 = vsel %vm751_vm1, %v831_v34, -inf }
 0x1a9   : > { %833 = vmax.xlane.f32.xlu2 %v832_v36 }
 0x1ab   : > { %v828_v37 = vpop.f32.mrf.mxu3 }
 0x1b1   : > { %891 = vmax.xlane.f32.xlu2 %v890_v39 }
 0x1b3   : > { %v942_v40 = vpop.f32.mrf.mxu3 }
 0x1b4   : > { %v946_v41 = vmul.f32 0.35355338, %v942_v40 }
 0x1b6   : > { %v947_v42 = vadd.f32 %v946_v41, %v746_v25 }
 0x1b8   : > { %v948_v43 = vsel %vm751_vm1, %v947_v42, -inf }
 0x1b9   : > { %949 = vmax.xlane.f32.xlu0 %v948_v43  ;;  %v1796_v43 = vld [vmem:[%s2282_s5] ss:$0 sm:$0xff]  ;;  %s2284_s5 = smov 112  }
 0x1bb   : > { %v944_v44 = vpop.f32.mrf.mxu3 }
 0x1c9   : > { %785 = vrot.lane.b32.xlu2 %v2017_v7, %s1864_s25  ;;  %s2265_s25 = smov 8  }
 0x1d1   : > { %960 = vrot.lane.b32.xlu2 %v2017_v7, %s1865_s26  ;;  %s2264_s26 = smov 16  }
 0x20e   : > { %v775_v45 = vpop.xlane.xlu1 %774 }
 0x20f   : > { %v776_v46 = vsub.f32 %v772_v27, %v775_v45 }
 0x211   : > { %v777_v47 = vmul.f32 1.442695, %v776_v46 }
 0x213   : > { %1808 = vpow2.f32 %v777_v47 }
 0x219   : > { %v1809_v48 = vpop.eup %1808 }
 0x21a   : > { %v779_v49 = vsel %vm751_vm1, %v1809_v48, 0.0 }
 0x21b   : > { %780 = vadd.xlane.f32.xlu1 %v779_v49  ;;  %v1871_v49 = vmov 32.0  }
 0x21c   : > { %v834_v50 = vpop.xlane.xlu2 %833 }
 0x21d   : > { %v835_v53 = vsub.f32 %v831_v34, %v834_v50  ;;  %v1758_v34 = vld [vmem:[%s2281_s23 + $0x8] sm:$0xff] }
 0x21e   : > { %1028 = vmatpush.bf16.msra.mxu0 %v1758_v34  ;;  %v1762_v50 = vld [vmem:[%s2244_s10 + $0x8] sm:$0xff] }
 0x21f   : > { %v836_v55 = vmul.f32 1.442695, %v835_v53  ;;  %1142 = vmatpush.bf16.msra.mxu3 %v1762_v50 }
 0x222   : > { %1029 = vmatpush.bf16.msra.mxu0 %v1757_v35 }
 0x224   : > { %v892_v51 = vpop.xlane.xlu2 %891 }
 0x225   : > { %v893_v52 = vsub.f32 %v889_v38, %v892_v51 }
 0x227   : > { %v894_v54 = vmul.f32 1.442695, %v893_v52 }
 0x229   : > { %1810 = vpow2.f32 %v894_v54 }
 0x22a   : > { %1812 = vpow2.f32 %v836_v55 }
 0x22c   : > { %v786_v56 = vpop.permute.xlu2 %785  ;;  %v950_v57 = vpop.xlane.xlu0 %949 }
 0x22d   : > { %v792_v58 = vsel %vm790_vm3, %v786_v56, 0  ;;  %v951_v60 = vsub.f32 %v947_v42, %v950_v57 }
 0x22e   : > { %801 = vmatpush.bf16.msra.mxu2 %v792_v58 }
 0x22f   : > { %v1811_v59 = vpop.eup %1810  ;;  %v952_v62 = vmul.f32 1.442695, %v951_v60 }
 0x230   : > { %v896_v61 = vsel %vm751_vm1, %v1811_v59, 0.0  ;;  %v1813_v63 = vpop.eup %1812 }
 0x231   : > { %897 = vadd.xlane.f32.xlu0 %v896_v61  ;;  %1814 = vpow2.f32 %v952_v62  ;;  %v838_v0 = vsel %vm751_vm1, %v1813_v63, 0.0 }
 0x234   : > { %844 = vrot.lane.b32.xlu1 %v2017_v7, %s1866_s2  ;;  %v961_v10 = vpop.permute.xlu2 %960  ;;  %s2263_s2 = smov 24  }
 0x235   : > { %v966_v13 = vsel %vm790_vm3, %v961_v10, 0 }
 0x237   : > { %v1815_v1 = vpop.eup %1814 }
 0x238   : > { %v954_v3 = vsel %vm751_vm1, %v1815_v1, 0.0 }
 0x239   : > { %839 = vadd.xlane.f32.xlu0 %v838_v0 }
 0x241   : > { %955 = vadd.xlane.f32.xlu0 %v954_v3  ;;  %v1759_v3 = vld [vmem:[%s2242_s8] sm:$0xff] }
 0x255   : > { %902 = vrot.lane.b32.xlu0 %v2017_v7, %s1867_s27  ;;  %s2285_s27 = sld [smem:[#allocation8_spill]] }
 0x28e   : > { %v781_v4 = vpop.xlane.xlu1 %780 }
 0x28f   : > { %1816 = vrcp.f32 %v781_v4 }
 0x295   : > { %v1817_v5 = vpop.eup %1816 }
 0x296   : > { %v783_v6 = vmul.f32 %v1817_v5, %v1809_v48 }
 0x298   : > { %v784_v8 = vpack.c.bf16 %v783_v6, %v783_v6 }
 0x29a   : > { %1675 = vmatmul.msk.bf16.vlgmr.msra.gmra.mxu2 %vm751_vm1, %v784_v8  ;;  %v1799_v8 = vld [vmem:[%s2245_s11] ss:$0 sm:$0xff] }
 0x2a4   : > { %v898_v9 = vpop.xlane.xlu0 %897 }
 0x2a6   : > { %v845_v11 = vpop.permute.xlu1 %844 }
 0x2a7   : > { %v850_v12 = vsel %vm790_vm3, %v845_v11, 0 }
 0x2a8   : > { %859 = vmatpush.bf16.msrb.mxu2 %v850_v12 }
 0x2ac   : > { %975 = vmatpush.bf16.msra.mxu2 %v966_v13  ;;  %v840_v14 = vpop.xlane.xlu0 %839 }
 0x2ad   : > { %1818 = vrcp.f32 %v840_v14 }
 0x2b3   : > { %v1819_v15 = vpop.eup %1818 }
 0x2b4   : > { %v842_v7 = vmul.f32 %v1819_v15, %v1813_v63  ;;  %v956_v16 = vpop.xlane.xlu0 %955 }
 0x2b5   : > { %1820 = vrcp.f32 %v956_v16 }
 0x2b6   : > { %v843_v17 = vpack.c.bf16 %v842_v7, %v842_v7  ;;  %1822 = vrcp.f32 %v898_v9 }
 0x2b7   : > { %1824 = vrcp.f32 %v1871_v49 }
 0x2b8   : > { %1677 = vmatmul.msk.bf16.vlgmr.msrb.gmra.mxu2 %vm751_vm1, %v843_v17 }
 0x2bb   : > { %v1821_v18 = vpop.eup %1820 }
 0x2bc   : > { %v958_v19 = vmul.f32 %v1821_v18, %v1815_v1  ;;  %v1823_v20 = vpop.eup %1822  ;;  %v1760_v1 = vld [vmem:[%s2242_s8 + $0x8] sm:$0xff] }
 0x2bd   : > { %v900_v21 = vmul.f32 %v1823_v20, %v1811_v59  ;;  %v1825_v53 = vpop.eup %1824  ;;  %v1797_v20 = vld [vmem:[%s2285_s27] ss:$0 sm:$0xff]  ;;  %s2292_s27 = smov 16  }
 0x2be   : > { %v959_v22 = vpack.c.bf16 %v958_v19, %v958_v19  ;;  %v1040_v55 = vmul.f32 32.0, %v1825_v53  ;;  %vm1044_vm6 = vweird.f32 %v1825_v53 }
 0x2bf   : > { %v901_v25 = vpack.c.bf16 %v900_v21, %v900_v21 }
 0x2c0   : > { %v1041_v56 = vsub.f32 1.0, %v1040_v55 }
 0x2c2   : > { %v1042_v57 = vmul.f32 %v1825_v53, %v1041_v56 }
 0x2c4   : > { %v1043_v58 = vadd.f32 %v1825_v53, %v1042_v57 }
 0x2c6   : > { %v2091_v59 = vsel %vm1044_vm6, %v1825_v53, %v1043_v58 }
 0x2c7   : > { %v903_v23 = vpop.permute.xlu0 %902 }
 0x2c8   : > { %1681 = vmatmul.msk.bf16.vlgmr.msra.gmra.mxu2 %vm751_vm1, %v959_v22  ;;  %v908_v24 = vsel %vm790_vm3, %v903_v23, 0  ;;  %v1798_v22 = vld [vmem:[%s2241_s7] ss:$0 sm:$0xff] }
 0x2c9   : > { %917 = vmatpush.bf16.msrb.mxu1 %v908_v24 }
 0x2cc   : > { %1679 = vmatmul.msk.bf16.vlgmr.msrb.gmra.mxu1 %vm751_vm1, %v901_v25 }
 0x2cd   : > { %1105 = vmatpush.bf16.msra.mxu1 %v1760_v1 }
 0x2d1   : > { %1106 = vmatpush.bf16.msra.mxu1 %v1759_v3 }
 0x31d   : > { %v803_v26 = vpop.f32.mrf.mxu2 }
 0x325   : > { %v805_v27 = vpop.f32.mrf.mxu2 }
 0x33b   : > { %v861_v28 = vpop.f32.mrf.mxu2 }
 0x33c   : > { %982 = vrot.lane.b32.xlu1 %v861_v28, %s2265_s25  ;;  %s2283_s25 = sld [smem:[#allocation3_spill]] }
 0x342   : > { %s694_s0 = scalar_lea.vmem %s2283_s25, %s1754_s24  ;;  %s2290_s24 = smov 80  }
 0x343   : > { %v863_v29 = vpop.f32.mrf.mxu2  ;;  %v701_v51 = vld [vmem:[%s694_s0] sm:$0xff]  ;;  %v702_v52 = vld [vmem:[%s694_s0 + $0x8] sm:$0x3] }
 0x344   : > { %v1112_v54 = vpack.c.bf16 %v702_v52, %v701_v51  ;;  %v1800_v29 = vld [vmem:[%s2243_s9] ss:$0 sm:$0xff] }
 0x349   : > { %v919_v30 = vpop.f32.mrf.mxu1 }
 0x34a   : > { %986 = vrot.lane.b32.xlu2 %v919_v30, %s2264_s26  ;;  %s2286_s26 = smov 104  }
 0x34b   : > { %v977_v31 = vpop.f32.mrf.mxu2 }
 0x34c   : > { %990 = vrot.lane.b32.xlu1 %v977_v31, %s2263_s2  ;;  %s2288_s2 = smov 72  }
 0x351   : > { %v921_v32 = vpop.f32.mrf.mxu1 }
 0x353   : > { %v979_v33 = vpop.f32.mrf.mxu2 }
 0x3a4   : > { %v987_v38 = vpop.permute.xlu2 %986 }
 0x3ae   : > { %v983_v36 = vpop.permute.xlu1 %982 }
 0x3af   : > { %v993_v37 = vsel %vm751_vm1, %v803_v26, %v983_v36 }
 0x3b0   : > { %v995_v40 = vsel %vm994_vm4, %v993_v37, %v987_v38 }
 0x3be   : > { %v991_v39 = vpop.permute.xlu1 %990 }
 0x3bf   : > { %v997_v41 = vsel %vm996_vm5, %v995_v40, %v991_v39 }
 0x3c0   : > { %v998_v42 = vpack.c.bf16 %v997_v41, %v997_v41 }
 0x3c2   : > { %1690 = vmatmul.msk.bf16.vlgmr.msra.gmra.mxu0 %vm724_vm0, %v998_v42 }
 0x43f   : > { %v1031_v44 = vpop.f32.mrf.mxu0 }
 0x440   : > { %v1032_v45 = vadd.f32 %v1796_v43, %v1031_v44 }
 0x442   : > { %v1035_v46 = vadd.f32 %v1032_v45, %v2009_v2  ;;  %v1761_v2 = vld [vmem:[%s2244_s10] sm:$0xff] }
 0x443   : > { %1143 = vmatpush.bf16.msra.mxu3 %v1761_v2 }
 0x444   : > { %v1036_v47 = vsel %vm724_vm0, %v1035_v46, 0.0 }
 0x445   : > { %1037 = vadd.xlane.f32.xlu2 %v1036_v47 }
 0x446   : > { %1708 = vmatmul.msk.bf16.vlgmr.msra.gmra.mxu3 %vm724_vm0, %v1112_v54 }
 0x447   : > { %v1033_v48 = vpop.f32.mrf.mxu0 }
 0x4b8   : > { %v1038_v60 = vpop.xlane.xlu2 %1037 }
 0x4b9   : > { %v1046_v61 = vmul.f32 %v2091_v59, %v1038_v60 }
 0x4bb   : > { %v1047_v62 = vsub.f32 %v1035_v46, %v1046_v61 }
 0x4bd   : > { %v1048_v63 = vmul.f32 %v1047_v62, %v1047_v62 }
 0x4bf   : > { %v1049_v0 = vsel %vm724_vm0, %v1048_v63, 0.0 }
 0x4c0   : > { %1050 = vadd.xlane.f32.xlu1 %v1049_v0 }
 0x4c9   : > { %v1145_v4 = vpop.f32.mrf.mxu3 }
 0x4ca   : > { %v1146_v10 = vadd.f32 %v1799_v8, %v1145_v4 }
 0x4d1   : > { %v1147_v11 = vpop.f32.mrf.mxu3 }
 0x4d2   : > { %v1148_v12 = vadd.f32 %v1799_v8, %v1147_v11 }
 0x4d4   : > { %v2105_v13 = vpack.c.bf16 %v1148_v12, %v1146_v10 }
 0x4d6   : > { %1211 = vrot.lane.b32.xlu0 %v2105_v13, %s1857_s30  ;;  %v1156_v7 = vsel %vm751_vm1, %v2105_v13, 0 }
 0x4d7   : > { %1165 = vmatpush.bf16.xpose.msrb.mxu2 %v1156_v7 }
 0x4de   : > { %1268 = vrot.lane.b32.xlu0 %v2105_v13, %s2284_s5 }
 0x533   : > { %v1051_v5 = vpop.xlane.xlu1 %1050 }
 0x534   : > { %v1052_v6 = vmul.f32 %v1051_v5, %v2091_v59 }
 0x536   : > { %v1053_v9 = vadd.f32 1e-05, %v1052_v6 }
 0x538   : > { %1826 = vrsqrt.f32 %v1053_v9  ;;  %vm1060_vm8 = vweird.f32 %v1053_v9 }
 0x53e   : > { %v1827_v14 = vpop.eup %1826 }
 0x53f   : > { %v1055_v15 = vmul.f32 %v1827_v14, %v1053_v9  ;;  %vm1061_vm7 = vweird.f32 %v1827_v14 }
 0x540   : > { %vm1062_vm9 = vmor %vm1060_vm8, %vm1061_vm7 }
 0x541   : > { %v1056_v16 = vmul.f32 %v1827_v14, %v1055_v15 }
 0x543   : > { %v1057_v17 = vmul.f32 0.5, %v1056_v16 }
 0x545   : > { %v1058_v18 = vsub.f32 1.5, %v1057_v17 }
 0x547   : > { %v1059_v19 = vmul.f32 %v1827_v14, %v1058_v18 }
 0x548   : > { %v1212_v27 = vpop.permute.xlu0 %1211 }
 0x549   : > { %v1063_v21 = vsel %vm1062_vm9, %v1827_v14, %v1059_v19  ;;  %v1217_v28 = vsel %vm751_vm1, %v1212_v27, 0 }
 0x54a   : > { %v1064_v23 = vmul.f32 %v1063_v21, %v1047_v62  ;;  %1226 = vmatpush.bf16.xpose.msrb.mxu1 %v1217_v28 }
 0x54c   : > { %v1069_v24 = vmul.f32 %v1797_v20, %v1064_v23 }
 0x54e   : > { %v2119_v25 = vadd.f32 %v1798_v22, %v1069_v24 }
 0x550   : > { %v1075_v26 = vpack.c.bf16 %v2119_v25, %v2119_v25  ;;  %v1269_v34 = vpop.permute.xlu0 %1268 }
 0x551   : > { %v1274_v35 = vsel %vm751_vm1, %v1269_v34, 0 }
 0x552   : > { %1699 = vmatmul.msk.bf16.vlgmr.msra.gmra.mxu1 %vm724_vm0, %v1075_v26  ;;  %1283 = vmatpush.bf16.xpose.msra.mxu2 %v1274_v35 }
 0x5cf   : > { %v1108_v30 = vpop.f32.mrf.mxu1 }
 0x5d0   : > { %v1109_v31 = vadd.f32 %v1800_v29, %v1108_v30 }
 0x5d2   : > { %v1150_v32 = vpack.c.bf16 %v1109_v31, %v1109_v31 }
 0x5d4   : > { %1323 = vrot.lane.b32.xlu2 %v1150_v32, %s2286_s26  ;;  %1209 = vrot.lane.b32.xlu0 %v1150_v32, %s1857_s30  ;;  %s2287_s30 = smov 96  }
 0x5d5   : > { %1709 = vmatmul.msk.bf16.vlgmr.msrb.gmra.mxu2 %vm751_vm1, %v1150_v32 }
 0x5d7   : > { %v1110_v33 = vpop.f32.mrf.mxu1 }
 0x5dc   : > { %1325 = vrot.lane.b32.xlu0 %v2105_v13, %s2286_s26 }
 0x5e4   : > { %1266 = vrot.lane.b32.xlu0 %v1150_v32, %s2284_s5  ;;  %s2289_s5 = smov 88  }
 0x62e   : > { %v1324_v39 = vpop.permute.xlu2 %1323 }
 0x646   : > { %v1210_v36 = vpop.permute.xlu0 %1209 }
 0x647   : > { %1711 = vmatmul.msk.bf16.vlgmr.msrb.gmra.mxu1 %vm751_vm1, %v1210_v36 }
 0x64e   : > { %v1326_v37 = vpop.permute.xlu0 %1325 }
 0x64f   : > { %v1331_v38 = vsel %vm751_vm1, %v1326_v37, 0 }
 0x650   : > { %1340 = vmatpush.bf16.xpose.msra.mxu1 %v1331_v38 }
 0x656   : > { %v1267_v40 = vpop.permute.xlu0 %1266 }
 0x657   : > { %1713 = vmatmul.msk.bf16.vlgmr.msra.gmra.mxu2 %vm751_vm1, %v1267_v40  ;;  %1715 = vmatmul.msk.bf16.vlgmr.msra.gmra.mxu1 %vm751_vm1, %v1324_v39 }
 0x658   : > { %v1167_v41 = vpop.f32.mrf.mxu2 }
 0x659   : > { %v1171_v42 = vmul.f32 0.35355338, %v1167_v41 }
 0x65b   : > { %v1173_v43 = vsel %vm1172_vm10, %v1171_v42, -inf }
 0x65c   : > { %1174 = vmax.xlane.f32.xlu0 %v1173_v43 }
 0x660   : > { %v1169_v44 = vpop.f32.mrf.mxu2 }
 0x670   : > { %1186 = vrot.lane.b32.xlu0 %v2105_v13, %s2287_s30 }
 0x678   : > { %1359 = vrot.lane.b32.xlu0 %v2105_v13, %s2288_s2 }
 0x6c4   : > { %v1228_v45 = vpop.f32.mrf.mxu1 }
 0x6c5   : > { %v1232_v46 = vmul.f32 0.35355338, %v1228_v45 }
 0x6c7   : > { %v1233_v47 = vsel %vm1172_vm10, %v1232_v46, -inf }
 0x6c8   : > { %1234 = vmax.xlane.f32.xlu1 %v1233_v47  ;;  %v1764_v47 = vld [vmem:[%s2246_s12 + $0x8] sm:$0xff] }
 0x6c9   : > { %1425 = vmatpush.bf16.msrb.mxu2 %v1764_v47 }
 0x6cc   : > { %v1230_v48 = vpop.f32.mrf.mxu1 }
 0x6cd   : > { %v1763_v48 = vld [vmem:[%s2246_s12] sm:$0xff] }
 0x6ce   : > { %1426 = vmatpush.bf16.msrb.mxu2 %v1763_v48 }
 0x6cf   : > { %v1175_v50 = vpop.xlane.xlu0 %1174 }
 0x6d0   : > { %v1176_v2 = vsub.f32 %v1171_v42, %v1175_v50 }
 0x6d2   : > { %v1177_v55 = vmul.f32 1.442695, %v1176_v2 }
 0x6d4   : > { %v1342_v49 = vpop.f32.mrf.mxu1  ;;  %1828 = vpow2.f32 %v1177_v55  ;;  %v1801_v55 = vld [vmem:[%s2247_s13] ss:$0 sm:$0xff] }
 0x6d5   : > { %v1346_v56 = vmul.f32 0.35355338, %v1342_v49 }
 0x6d7   : > { %v1347_v61 = vsel %vm1172_vm10, %v1346_v56, -inf }
 0x6da   : > { %v1285_v51 = vpop.f32.mrf.mxu2  ;;  %v1829_v62 = vpop.eup %1828 }
 0x6db   : > { %v1289_v52 = vmul.f32 0.35355338, %v1285_v51  ;;  %v1179_v63 = vsel %vm1172_vm10, %v1829_v62, 0.0 }
 0x6dc   : > { %v1344_v53 = vpop.f32.mrf.mxu1 }
 0x6dd   : > { %v1290_v54 = vsel %vm1172_vm10, %v1289_v52, -inf }
 0x6de   : > { %1291 = vmax.xlane.f32.xlu1 %v1290_v54 }
 0x6e2   : > { %v1187_v57 = vpop.permute.xlu0 %1186  ;;  %v1287_v58 = vpop.f32.mrf.mxu2 }
 0x6e3   : > { %v1193_v60 = vsel %vm1191_vm11, %v1187_v57, 0 }
 0x6e4   : > { %1202 = vmatpush.bf16.msrb.mxu0 %v1193_v60 }
 0x6e6   : > { %1348 = vmax.xlane.f32.xlu1 %v1347_v61 }
 0x6ea   : > { %v1360_v21 = vpop.permute.xlu0 %1359 }
 0x6eb   : > { %v1365_v24 = vsel %vm1191_vm11, %v1360_v21, 0 }
 0x6ee   : > { %1180 = vadd.xlane.f32.xlu1 %v1179_v63 }
 0x707   : > { %1245 = vrot.lane.b32.xlu1 %v2105_v13, %s2289_s5 }
 0x73b   : > { %v1235_v0 = vpop.xlane.xlu1 %1234 }
 0x73c   : > { %v1236_v1 = vsub.f32 %v1232_v46, %v1235_v0 }
 0x73e   : > { %v1237_v3 = vmul.f32 1.442695, %v1236_v1 }
 0x740   : > { %1830 = vpow2.f32 %v1237_v3 }
 0x746   : > { %v1831_v4 = vpop.eup %1830 }
 0x747   : > { %v1239_v5 = vsel %vm1172_vm10, %v1831_v4, 0.0 }
 0x748   : > { %1240 = vadd.xlane.f32.xlu2 %v1239_v5  ;;  %v1770_v5 = vld [vmem:[%s2252_s18 + $0x18] sm:$0xff] }
 0x749   : > { %1548 = vmatpush.bf16.msrb.mxu1 %v1770_v5 }
 0x751   : > { %v1292_v6 = vpop.xlane.xlu1 %1291 }
 0x752   : > { %v1293_v8 = vsub.f32 %v1289_v52, %v1292_v6 }
 0x754   : > { %v1294_v9 = vmul.f32 1.442695, %v1293_v8 }
 0x756   : > { %1832 = vpow2.f32 %v1294_v9  ;;  %v1769_v9 = vld [vmem:[%s2252_s18 + $0x10] sm:$0xff] }
 0x757   : > { %1549 = vmatpush.bf16.msrb.mxu1 %v1769_v9 }
 0x759   : > { %v1349_v10 = vpop.xlane.xlu1 %1348 }
 0x75a   : > { %v1350_v11 = vsub.f32 %v1346_v56, %v1349_v10 }
 0x75c   : > { %v1833_v12 = vpop.eup %1832  ;;  %v1351_v14 = vmul.f32 1.442695, %v1350_v11 }
 0x75d   : > { %v1296_v15 = vsel %vm1172_vm10, %v1833_v12, 0.0 }
 0x75e   : > { %1834 = vpow2.f32 %v1351_v14  ;;  %1297 = vadd.xlane.f32.xlu2 %v1296_v15 }
 0x761   : > { %v1181_v7 = vpop.xlane.xlu1 %1180 }
 0x762   : > { %1836 = vrcp.f32 %v1181_v7 }
 0x764   : > { %v1835_v16 = vpop.eup %1834 }
 0x765   : > { %v1353_v17 = vsel %vm1172_vm10, %v1835_v16, 0.0 }
 0x766   : > { %1354 = vadd.xlane.f32.xlu1 %v1353_v17  ;;  %v1802_v17 = vld [vmem:[%s2248_s14] ss:$0 sm:$0xff] }
 0x768   : > { %v1837_v18 = vpop.eup %1836 }
 0x769   : > { %v1183_v19 = vmul.f32 %v1837_v18, %v1829_v62 }
 0x76b   : > { %v1184_v20 = vpack.c.bf16 %v1183_v19, %v1183_v19  ;;  %v1803_v19 = vld [vmem:[%s2249_s15] ss:$0 sm:$0xff] }
 0x76d   : > { %1710 = vmatmul.msk.bf16.vlgmr.msrb.gmra.mxu0 %vm1172_vm10, %v1184_v20 }
 0x776   : > { %1302 = vrot.lane.b32.xlu2 %v2105_v13, %s2290_s24 }
 0x779   : > { %v1246_v22 = vpop.permute.xlu1 %1245 }
 0x77a   : > { %v1251_v23 = vsel %vm1191_vm11, %v1246_v22, 0 }
 0x77b   : > { %1260 = vmatpush.bf16.msrb.mxu3 %v1251_v23 }
 0x77f   : > { %1374 = vmatpush.bf16.msra.mxu3 %v1365_v24  ;;  %v1768_v24 = vld [vmem:[%s2252_s18 + $0x8] sm:$0xff] }
 0x780   : > { %1550 = vmatpush.bf16.msrb.mxu1 %v1768_v24 }
 0x7bb   : > { %v1241_v26 = vpop.xlane.xlu2 %1240 }
 0x7bc   : > { %1838 = vrcp.f32 %v1241_v26  ;;  %v1767_v26 = vld [vmem:[%s2252_s18] sm:$0xff] }
 0x7bd   : > { %1551 = vmatpush.bf16.msrb.mxu1 %v1767_v26 }
 0x7c2   : > { %v1839_v27 = vpop.eup %1838 }
 0x7c3   : > { %v1243_v28 = vmul.f32 %v1839_v27, %v1831_v4  ;;  %v1766_v4 = vld [vmem:[%s2250_s16 + $0x8] sm:$0xff]  ;;  %v1804_v27 = vld [vmem:[%s2251_s17] ss:$0 sm:$0xff] }
 0x7c5   : > { %v1244_v29 = vpack.c.bf16 %v1243_v28, %v1243_v28 }
 0x7c7   : > { %1712 = vmatmul.msk.bf16.vlgmr.msrb.gmra.mxu3 %vm1172_vm10, %v1244_v29 }
 0x7d1   : > { %v1298_v30 = vpop.xlane.xlu2 %1297 }
 0x7d2   : > { %1840 = vrcp.f32 %v1298_v30 }
 0x7d8   : > { %v1841_v31 = vpop.eup %1840 }
 0x7d9   : > { %v1300_v32 = vmul.f32 %v1841_v31, %v1833_v12  ;;  %v1303_v13 = vpop.permute.xlu2 %1302  ;;  %v1355_v33 = vpop.xlane.xlu1 %1354 }
 0x7da   : > { %v1308_v34 = vsel %vm1191_vm11, %v1303_v13, 0  ;;  %1842 = vrcp.f32 %v1355_v33  ;;  %v1805_v13 = vld [vmem:[%s2253_s19] ss:$0 sm:$0xff] }
 0x7db   : > { %v1301_v35 = vpack.c.bf16 %v1300_v32, %v1300_v32  ;;  %1317 = vmatpush.bf16.msra.mxu0 %v1308_v34 }
 0x7de   : > { %1714 = vmatmul.msk.bf16.vlgmr.msra.gmra.mxu0 %vm1172_vm10, %v1301_v35 }
 0x7df   : > { %1495 = vmatpush.bf16.msrb.mxu0 %v1766_v4 }
 0x7e0   : > { %v1843_v36 = vpop.eup %1842 }
 0x7e1   : > { %v1357_v37 = vmul.f32 %v1843_v36, %v1835_v16 }
 0x7e3   : > { %v1358_v38 = vpack.c.bf16 %v1357_v37, %v1357_v37 }
 0x7e5   : > { %1716 = vmatmul.msk.bf16.vlgmr.msra.gmra.mxu3 %vm1172_vm10, %v1358_v38 }
 0x7ea   : > { %v1204_v39 = vpop.f32.mrf.mxu0 }
 0x7f2   : > { %v1206_v40 = vpop.f32.mrf.mxu0 }
 0x84a   : > { %v1262_v41 = vpop.f32.mrf.mxu3 }
 0x84b   : > { %1381 = vrot.lane.b32.xlu0 %v1262_v41, %s2291_s1  ;;  %s2294_s1 = sshll.u32 %s2296_s28, 3 }
 0x84c   : > { %s698_s0 = scalar_lea.vmem %s2256_s22, %s2294_s1 }
 0x852   : > { %v1264_v42 = vpop.f32.mrf.mxu3 }
 0x85b   : > { %v1319_v43 = vpop.f32.mrf.mxu0 }
 0x85c   : > { %1385 = vrot.lane.b32.xlu0 %v1319_v43, %s2292_s27 }
 0x863   : > { %v1321_v44 = vpop.f32.mrf.mxu0 }
 0x868   : > { %v1376_v45 = vpop.f32.mrf.mxu3 }
 0x869   : > { %1389 = vrot.lane.b32.xlu0 %v1376_v45, %s2293_s29 }
 0x870   : > { %v1378_v46 = vpop.f32.mrf.mxu3 }
 0x8bd   : > { %v1382_v49 = vpop.permute.xlu0 %1381 }
 0x8be   : > { %v1392_v51 = vsel %vm751_vm1, %v1204_v39, %v1382_v49 }
 0x8ce   : > { %v1386_v50 = vpop.permute.xlu0 %1385 }
 0x8cf   : > { %v1393_v52 = vsel %vm994_vm4, %v1392_v51, %v1386_v50 }
 0x8db   : > { %v1390_v2 = vpop.permute.xlu0 %1389 }
 0x8dc   : > { %v1394_v53 = vsel %vm996_vm5, %v1393_v52, %v1390_v2  ;;  %v1806_v52 = vld [vmem:[%s2254_s20] ss:$0 sm:$0xff] }
 0x8dd   : > { %v1395_v54 = vpack.c.bf16 %v1394_v53, %v1394_v53 }
 0x8df   : > { %1725 = vmatmul.msk.bf16.vlgmr.msrb.gmra.mxu2 %vm724_vm0, %v1395_v54 }
 0x962   : > { %v1428_v56 = vpop.f32.mrf.mxu2 }
 0x963   : > { %v1429_v57 = vadd.f32 %v1801_v55, %v1428_v56 }
 0x965   : > { %v1432_v58 = vadd.f32 %v1429_v57, %v2119_v25  ;;  %v1765_v25 = vld [vmem:[%s2250_s16] sm:$0xff] }
 0x966   : > { %1496 = vmatpush.bf16.msrb.mxu0 %v1765_v25 }
 0x967   : > { %v1433_v60 = vsel %vm724_vm0, %v1432_v58, 0.0 }
 0x968   : > { %1434 = vadd.xlane.f32.xlu2 %v1433_v60 }
 0x96a   : > { %v1430_v61 = vpop.f32.mrf.mxu2 }
 0x9db   : > { %v1435_v62 = vpop.xlane.xlu2 %1434 }
 0x9dc   : > { %v1436_v63 = vmul.f32 %v1435_v62, %v2091_v59 }
 0x9de   : > { %v1437_v0 = vsub.f32 %v1432_v58, %v1436_v63 }
 0x9e0   : > { %v1438_v1 = vmul.f32 %v1437_v0, %v1437_v0 }
 0x9e2   : > { %v1439_v3 = vsel %vm724_vm0, %v1438_v1, 0.0 }
 0x9e3   : > { %1440 = vadd.xlane.f32.xlu0 %v1439_v3 }
 0xa56   : > { %v1441_v6 = vpop.xlane.xlu0 %1440 }
 0xa57   : > { %v1442_v8 = vmul.f32 %v1441_v6, %v2091_v59 }
 0xa59   : > { %v1443_v10 = vadd.f32 1e-05, %v1442_v8 }
 0xa5b   : > { %1844 = vrsqrt.f32 %v1443_v10  ;;  %vm1450_vm13 = vweird.f32 %v1443_v10 }
 0xa61   : > { %v1845_v11 = vpop.eup %1844 }
 0xa62   : > { %v1445_v12 = vmul.f32 %v1845_v11, %v1443_v10  ;;  %vm1451_vm12 = vweird.f32 %v1845_v11 }
 0xa63   : > { %vm1452_vm14 = vmor %vm1450_vm13, %vm1451_vm12 }
 0xa64   : > { %v1446_v14 = vmul.f32 %v1845_v11, %v1445_v12 }
 0xa66   : > { %v1447_v15 = vmul.f32 0.5, %v1446_v14 }
 0xa68   : > { %v1448_v7 = vsub.f32 1.5, %v1447_v15 }
 0xa6a   : > { %v1449_v16 = vmul.f32 %v1845_v11, %v1448_v7 }
 0xa6c   : > { %v1453_v18 = vsel %vm1452_vm14, %v1845_v11, %v1449_v16 }
 0xa6d   : > { %v1454_v20 = vmul.f32 %v1453_v18, %v1437_v0 }
 0xa6f   : > { %v1459_v21 = vmul.f32 %v1802_v17, %v1454_v20 }
 0xa71   : > { %v1464_v22 = vadd.f32 %v1803_v19, %v1459_v21 }
 0xa73   : > { %v1465_v23 = vpack.c.bf16 %v1464_v22, %v1464_v22 }
 0xa75   : > { %1734 = vmatmul.msk.bf16.vlgmr.msrb.gmra.mxu0 %vm724_vm0, %v1465_v23 }
 0xaf2   : > { %v1498_v28 = vpop.f32.mrf.mxu0 }
 0xaf3   : > { %v1499_v29 = vadd.f32 %v1804_v27, %v1498_v28 }
 0xaf5   : > { %v1502_v30 = vmax.f32 %v1499_v29, 0.0 }
 0xaf7   : > { %v1503_v31 = vpack.c.bf16 %v1502_v30, %v1502_v30 }
 0xaf9   : > { %1751 = vmatmul.msk.bf16.vlgmr.msrb.gmra.mxu1 %vm1540_vm15, %v1503_v31 }
 0xafa   : > { %v1500_v32 = vpop.f32.mrf.mxu0 }
 0xb76   : > { %v1553_v33 = vpop.f32.mrf.mxu1 }
 0xb77   : > { %v1554_v34 = vadd.f32 %v1805_v13, %v1553_v33 }
 0xb79   : > { %v1557_v35 = vadd.f32 %v1554_v34, %v1464_v22 }
 0xb7b   : > { %v1558_v36 = vsel %vm724_vm0, %v1557_v35, 0.0 }
 0xb7c   : > { %1559 = vadd.xlane.f32.xlu1 %v1558_v36 }
 0xb7e   : > { %v1555_v37 = vpop.f32.mrf.mxu1 }
 0xbef   : > { %v1560_v38 = vpop.xlane.xlu1 %1559 }
 0xbf0   : > { %v1561_v39 = vmul.f32 %v1560_v38, %v2091_v59 }
 0xbf2   : > { %v1562_v40 = vsub.f32 %v1557_v35, %v1561_v39 }
 0xbf4   : > { %v1563_v41 = vmul.f32 %v1562_v40, %v1562_v40 }
 0xbf6   : > { %v1564_v42 = vsel %vm724_vm0, %v1563_v41, 0.0 }
 0xbf7   : > { %1565 = vadd.xlane.f32.xlu1 %v1564_v42 }
 0xc6a   : > { %v1566_v43 = vpop.xlane.xlu1 %1565 }
 0xc6b   : > { %v1567_v44 = vmul.f32 %v1566_v43, %v2091_v59  ;;  %v1807_v59 = vld [vmem:[%s2255_s21] ss:$0 sm:$0xff] }
 0xc6d   : > { %v1568_v45 = vadd.f32 1e-05, %v1567_v44 }
 0xc6f   : > { %1846 = vrsqrt.f32 %v1568_v45  ;;  %vm1575_vm2 = vweird.f32 %v1568_v45 }
 0xc75   : > { %v1847_v46 = vpop.eup %1846 }
 0xc76   : > { %v1570_v47 = vmul.f32 %v1847_v46, %v1568_v45  ;;  %vm1576_vm1 = vweird.f32 %v1847_v46 }
 0xc77   : > { %vm1577_vm3 = vmor %vm1575_vm2, %vm1576_vm1 }
 0xc78   : > { %v1571_v48 = vmul.f32 %v1847_v46, %v1570_v47 }
 0xc7a   : > { %v1572_v49 = vmul.f32 0.5, %v1571_v48 }
 0xc7c   : > { %v1573_v50 = vsub.f32 1.5, %v1572_v49 }
 0xc7e   : > { %v1574_v51 = vmul.f32 %v1847_v46, %v1573_v50 }
 0xc80   : > { %v1578_v2 = vsel %vm1577_vm3, %v1847_v46, %v1574_v51 }
 0xc81   : > { %v1579_v53 = vmul.f32 %v1578_v2, %v1562_v40 }
 0xc83   : > { %v1584_v54 = vmul.f32 %v1806_v52, %v1579_v53 }
 0xc85   : > { %v1589_v55 = vadd.f32 %v1807_v59, %v1584_v54 }
 0xc87   : > { %1590 = vst.msk [vmem:[%s698_s0] sm:$0xff] %vm724_vm0, %v1589_v55 }
 0xc88 PF: > { %s32_s3 = sadd.s32 1, %s1854_s3  }
 0xc89   : > { %p29_p4 = scmp.ge.s32.totalorder %s32_s3, 4  }
 0xc8b   :  { %31 = sbr.rel (!%p29_p4) target bundleno = 8 (0x8), region = 141 }

// kernel: transformer_decoder_forward.4
= control target key start
LH: loop header
LB: loop body
LE: loop exit
PB: predicated region body
PF: predicated region fallthrough
CT: control target
= control target key end

     0   :  { %s2460_s0 = inlined_call_operand.vmem [shape: f32[2,8,32], index: 0, kind: input, shape index: {}]   ;;  %s2461_s1 = inlined_call_operand.vmem [shape: f32[2,10,32], index: 1, kind: input, shape index: {}]   ;;  %s2462_s2 = inlined_call_operand.vmem [shape: bf16[32,96], index: 2, kind: input, shape index: {}]   ;;  %s2463_s3 = inlined_call_operand.vmem [shape: f32[1,96], index: 3, kind: input, shape index: {}]   ;;  %s2464_s4 = inlined_call_operand.vmem [shape: bf16[32,32], index: 4, kind: input, shape index: {}]   ;;  %s2465_s5 = inlined_call_operand.vmem [shape: f32[1,32], index: 5, kind: input, shape index: {}]   ;;  %s2466_s6 = inlined_call_operand.vmem [shape: f32[1,32], index: 6, kind: input, shape index: {}]   ;;  %s2467_s7 = inlined_call_operand.vmem [shape: f32[1,32], index: 7, kind: input, shape index: {}]   ;;  %s2468_s8 = inlined_call_operand.vmem [shape: bf16[32,32], index: 8, kind: input, shape index: {}]   ;;  %s2469_s9 = inlined_call_operand.vmem [shape: f32[1,32], index: 9, kind: input, shape index: {}]   ;;  %s2470_s10 = inlined_call_operand.vmem [shape: bf16[32,64], index: 10, kind: input, shape index: {}]   ;;  %s2471_s11 = inlined_call_operand.vmem [shape: f32[1,64], index: 11, kind: input, shape index: {}]   ;;  %s2472_s12 = inlined_call_operand.vmem [shape: bf16[32,32], index: 12, kind: input, shape index: {}]   ;;  %s2473_s13 = inlined_call_operand.vmem [shape: f32[1,32], index: 13, kind: input, shape index: {}]   ;;  %s2474_s14 = inlined_call_operand.vmem [shape: f32[1,32], index: 14, kind: input, shape index: {}]   ;;  %s2475_s15 = inlined_call_operand.vmem [shape: f32[1,32], index: 15, kind: input, shape index: {}]   ;;  %s2476_s16 = inlined_call_operand.vmem [shape: bf16[32,64], index: 16, kind: input, shape index: {}]   ;;  %s2477_s17 = inlined_call_operand.vmem [shape: f32[1,64], index: 17, kind: input, shape index: {}]   ;;  %s2478_s18 = inlined_call_operand.vmem [shape: bf16[64,32], index: 18, kind: input, shape index: {}]   ;;  %s2479_s19 = inlined_call_operand.hbm [shape: f32[1,32], index: 19, kind: input, shape index: {}]   ;;  %s2480_s20 = inlined_call_operand.hbm [shape: f32[1,32], index: 20, kind: input, shape index: {}]   ;;  %s2481_s21 = inlined_call_operand.hbm [shape: f32[1,32], index: 21, kind: input, shape index: {}]   ;;  %s2482_s22 = inlined_call_operand.vmem [shape: f32[2,8,32], index: 22, kind: output, shape index: {}]  }
   0x1   :  { %2497 = sst [smem:[#allocation9_spill]] %s2460_s0 }
   0x2   :  { %2498 = sst [smem:[#allocation10_spill]] %s2461_s1 }
   0x3   :  { %2499 = sst [smem:[#allocation11_spill]] %s2462_s2 }
   0x4   :  { %2500 = sst [smem:[#allocation12_spill]] %s2463_s3 }
   0x5   :  { %2501 = sst [smem:[#allocation13_spill]] %s2464_s4 }
   0x6   :  { %2502 = sst [smem:[#allocation14_spill]] %s2465_s5 }
   0x7   :  { %2503 = sst [smem:[#allocation15_spill]] %s2466_s6 }
   0x8   :  { %27 = vsyncpa [#allocation3], 0 }
   0x9   :  { %28 = vsyncpa [#allocation5], 0  ;;  %s2200_s3 = smov 0  }
   0xa LB: > { %s612_s30 = sshll.u32 %s2480_s20, 4  ;;  %s1731_s4 = sadd.s32 4294967295, %s2064_s3   ;;  %s2064_s3 = sphi %s2200_s3, %s34_s3   ;;  %s613_s30 = int_to_ptr.hbm [resolvable:$true] %s612_s30 }
   0xb   : > { %p1733_p0 = scmp.ge.s32.totalorder %s2064_s3, 1  ;;  %p537_p1 = scmp.lt.s32.totalorder %s2064_s3, 3 }
   0xc   : > { %p1874_p2 = scmp.eq.s32.totalorder %s1731_s4, 0  ;;  %s2066_s23 = smov [#allocation4]  }
   0xd   : > { %p2211_p3 = pnand %p1733_p0, %p537_p1  ;;  %s614_s1 = sshll.u32 %s2066_s23, 4  ;;  %s615_s1 = int_to_ptr.vmem [resolvable:$true] %s614_s1 }
   0xe   : > { %s600_s6 = sshll.u32 %s2479_s19, 4  ;;  %s624_s2 = sshll.u32 %s2481_s21, 4  ;;  %s601_s6 = int_to_ptr.hbm [resolvable:$true] %s600_s6  ;;  %s625_s2 = int_to_ptr.hbm [resolvable:$true] %s624_s2 }
   0xf   : > { %p1864_p4 = pneg %p2211_p3  ;;  %s2067_s27 = smov [#allocation2]  }
  0x10   : > { %s602_s28 = sshll.u32 %s2067_s27, 4  ;;  %s2068_s29 = smov [#allocation6]   ;;  %s603_s28 = int_to_ptr.vmem [resolvable:$true] %s602_s28 }
  0x11   : > { %p1865_p5 = pnand %p1874_p2, %p1864_p4  ;;  %s626_s23 = sshll.u32 %s2068_s29, 4  ;;  %s627_s23 = int_to_ptr.vmem [resolvable:$true] %s626_s23 }
  0x12   : > { %654 = sbr.rel (%p2211_p3) target bundleno = 3223 (0xc97), region = 108 }
  0x13   : > { %1870 = dma.hbm_to_vmem [thread:$0]  (!%p1865_p5), %s613_s30, 16, %s615_s1, [#allocation5]  }
  0x14   : > { %1867 = dma.hbm_to_vmem [thread:$0]  (!%p1865_p5), %s601_s6, 16, %s603_s28, [#allocation3]  }
  0x15   : > { %1873 = dma.hbm_to_vmem [thread:$0]  (!%p1865_p5), %s625_s2, 16, %s627_s23, [#allocation5]  }
  0x17   : > { %2055 = dma.done.wait (%p1874_p2), [#allocation3], 16  }
  0x18   : > { %2057 = vsyncadd (%p1874_p2), [#allocation3], 4294967280 }
  0x19   : > { %2059 = dma.done.wait (%p1874_p2), [#allocation5], 32  }
  0x1a   : > { %2061 = vsyncadd (%p1874_p2), [#allocation5], 4294967264  ;;  %p730_p6 = scmp.lt.s32.totalorder %s1731_s4, 1  ;;  %s2505_s24 = sld [smem:[#allocation9_spill]]  ;;  %vm768_vm0 = vcmask 261120   ;;  %vm795_vm1 = vcmask 64512   ;;  %v785_v20 = vlaneseq }
  0x1b   : > { %s2506_s26 = sld [smem:[#allocation11_spill]]  ;;  %s2493_s1 = smov 104   ;;  %v2076_v24 = vmov 0.0   ;;  %vm834_vm3 = vcmask 1043456   ;;  %vm1038_vm4 = vcmask 130048   ;;  %vm1040_vm5 = vcmask 195584  }
  0x1c   : > { %s2523_s4 = smov (!%p730_p6, %s1731_s4), 1  ;;  %s2507_s23 = sld [smem:[#allocation12_spill]]  ;;  %v786_v21 = vshrl.u32 %v785_v20, 7  ;;  %v788_v22 = vand.u32 127, %v785_v20  ;;  %vm1216_vm10 = vcmask 80896   ;;  %vm1235_vm11 = vcmask 1044480  }
  0x1d   : > { %s2485_s30 = sshll.u32 %s2523_s4, 3  ;;  %s2070_s5 = smov 120   ;;  %vm1584_vm15 = vcmask 523264  }
  0x1e   : > { %s2488_s6 = smov 72   ;;  %s2487_s25 = smov 88   ;;  %vm789_vm2 = vcmp.gt.s32.totalorder %v788_v22, %v786_v21 }
  0x1f   : > { %s2495_s2 = smov 112   ;;  %v790_v25 = vsel %vm789_vm2, -1e+30, %v2076_v24  ;;  %s2077_s27 = smov 64  }
  0x20   : > { %s733_s0 = scalar_lea.vmem %s2505_s24, %s2485_s30  ;;  %s2492_s24 = smov 96  }
  0x21   : > { %v1837_v0 = vld [vmem:[%s2506_s26 + $0x8] sm:$0xff]  ;;  %v1836_v1 = vld [vmem:[%s2506_s26] sm:$0xff]  ;;  %s2078_s28 = smov 40   ;;  %s2079_s29 = smov 56  }
  0x22   : > { %778 = vmatpush.bf16.msra.mxu0 %v1837_v0  ;;  %v2244_v2 = vld [vmem:[%s733_s0] sm:$0xff]  ;;  %s2486_s0 = smov 80   ;;  %s2518_s30 = smov 8  }
  0x23   : > { %v747_v3 = vpack.c.bf16 %v2244_v2, %v2244_v2  ;;  %v1907_v4 = vld [vmem:[%s2507_s23] ss:$0 sm:$0xff]  ;;  %s2080_s23 = smov 48  }
  0x26   : > { %779 = vmatpush.bf16.msra.mxu0 %v1836_v1 }
  0x29   : > { %1754 = vmatmul.msk.bf16.vlgmr.msra.gmra.mxu0 %vm768_vm0, %v747_v3 }
  0xa6   : > { %v781_v5 = vpop.f32.mrf.mxu0 }
  0xa7   : > { %v782_v6 = vadd.f32 %v1907_v4, %v781_v5 }
  0xa9   : > { %v2252_v7 = vpack.c.bf16 %v782_v6, %v782_v6 }
  0xab   : > { %967 = vrot.lane.b32.xlu2 %v2252_v7, %s2493_s1  ;;  %851 = vrot.lane.b32.xlu1 %v2252_v7, %s2070_s5  ;;  %s2520_s1 = smov 24  }
  0xac   : > { %793 = vrot.lane.b32.xlu0 %v2252_v7, %s2492_s24 }
  0xae   : > { %v783_v8 = vpop.f32.mrf.mxu0 }
  0xb3   : > { %911 = vrot.lane.b32.xlu2 %v2252_v7, %s2486_s0  ;;  %969 = vrot.lane.b32.xlu1 %v2252_v7, %s2488_s6  ;;  %s2508_s0 = sld [smem:[#allocation13_spill]] }
  0xb4   : > { %853 = vrot.lane.b32.xlu0 %v2252_v7, %s2487_s25  ;;  %s2509_s6 = sld [smem:[#allocation14_spill]]  ;;  %s1835_s25 = sshll.u32 %s2523_s4, 4 }
  0xbc   : > { %909 = vrot.lane.b32.xlu0 %v2252_v7, %s2495_s2 }
 0x105   : > { %v968_v9 = vpop.permute.xlu2 %967 }
 0x10d   : > { %v912_v10 = vpop.permute.xlu2 %911 }
 0x10e   : > { %v917_v11 = vsel %vm795_vm1, %v912_v10, 0 }
 0x10f   : > { %926 = vmatpush.bf16.xpose.msrb.mxu0 %v917_v11 }
 0x11d   : > { %v852_v12 = vpop.permute.xlu1 %851 }
 0x11e   : > { %v794_v13 = vpop.permute.xlu0 %793 }
 0x11f   : > { %v800_v14 = vsel %vm795_vm1, %v794_v13, 0 }
 0x120   : > { %809 = vmatpush.bf16.xpose.msra.mxu1 %v800_v14 }
 0x125   : > { %v970_v15 = vpop.permute.xlu1 %969 }
 0x126   : > { %v854_v16 = vpop.permute.xlu0 %853  ;;  %v975_v17 = vsel %vm795_vm1, %v970_v15, 0 }
 0x127   : > { %1755 = vmatmul.msk.bf16.vlgmr.msra.gmra.mxu1 %vm795_vm1, %v2252_v7  ;;  %v859_v18 = vsel %vm795_vm1, %v854_v16, 0 }
 0x128   : > { %868 = vmatpush.bf16.xpose.msra.mxu3 %v859_v18 }
 0x12e   : > { %v910_v19 = vpop.permute.xlu0 %909 }
 0x12f   : > { %1757 = vmatmul.msk.bf16.vlgmr.msra.gmra.mxu3 %vm795_vm1, %v852_v12  ;;  %1759 = vmatmul.msk.bf16.vlgmr.msrb.gmra.mxu0 %vm795_vm1, %v910_v19 }
 0x130   : > { %984 = vmatpush.bf16.xpose.msrb.mxu3 %v975_v17 }
 0x13f   : > { %1761 = vmatmul.msk.bf16.vlgmr.msrb.gmra.mxu3 %vm795_vm1, %v968_v9 }
 0x1a4   : > { %v811_v23 = vpop.f32.mrf.mxu1 }
 0x1a5   : > { %v815_v26 = vmul.f32 0.35355338, %v811_v23 }
 0x1a7   : > { %v816_v27 = vadd.f32 %v815_v26, %v790_v25 }
 0x1a9   : > { %v817_v28 = vsel %vm795_vm1, %v816_v27, -inf }
 0x1aa   : > { %818 = vmax.xlane.f32.xlu1 %v817_v28 }
 0x1ac   : > { %v813_v29 = vpop.f32.mrf.mxu1  ;;  %v928_v30 = vpop.f32.mrf.mxu0 }
 0x1ad   : > { %v932_v35 = vmul.f32 0.35355338, %v928_v30 }
 0x1af   : > { %v933_v38 = vadd.f32 %v932_v35, %v790_v25  ;;  %v1838_v35 = vld [vmem:[%s2508_s0] sm:$0xff] }
 0x1b1   : > { %v934_v39 = vsel %vm795_vm1, %v933_v38, -inf }
 0x1b2   : > { %v870_v31 = vpop.f32.mrf.mxu3 }
 0x1b3   : > { %v874_v32 = vmul.f32 0.35355338, %v870_v31 }
 0x1b4   : > { %v930_v33 = vpop.f32.mrf.mxu0 }
 0x1b5   : > { %v875_v34 = vadd.f32 %v874_v32, %v790_v25 }
 0x1b7   : > { %v876_v36 = vsel %vm795_vm1, %v875_v34, -inf }
 0x1b8   : > { %877 = vmax.xlane.f32.xlu2 %v876_v36 }
 0x1ba   : > { %v872_v37 = vpop.f32.mrf.mxu3 }
 0x1c0   : > { %935 = vmax.xlane.f32.xlu2 %v934_v39 }
 0x1c2   : > { %v986_v40 = vpop.f32.mrf.mxu3 }
 0x1c3   : > { %v990_v41 = vmul.f32 0.35355338, %v986_v40 }
 0x1c5   : > { %v991_v42 = vadd.f32 %v990_v41, %v790_v25 }
 0x1c7   : > { %v992_v43 = vsel %vm795_vm1, %v991_v42, -inf }
 0x1c8   : > { %993 = vmax.xlane.f32.xlu0 %v992_v43  ;;  %v1908_v43 = vld [vmem:[%s2509_s6] ss:$0 sm:$0xff]  ;;  %s2511_s6 = smov 112  }
 0x1ca   : > { %v988_v44 = vpop.f32.mrf.mxu3 }
 0x1d8   : > { %829 = vrot.lane.b32.xlu2 %v2252_v7, %s2077_s27  ;;  %s2491_s27 = smov 8  }
 0x1e0   : > { %1004 = vrot.lane.b32.xlu2 %v2252_v7, %s2078_s28  ;;  %s2490_s28 = smov 16  }
 0x21d   : > { %v819_v45 = vpop.xlane.xlu1 %818 }
 0x21e   : > { %v820_v46 = vsub.f32 %v816_v27, %v819_v45 }
 0x220   : > { %v821_v47 = vmul.f32 1.442695, %v820_v46 }
 0x222   : > { %1920 = vpow2.f32 %v821_v47 }
 0x228   : > { %v1921_v48 = vpop.eup %1920 }
 0x229   : > { %v823_v49 = vsel %vm795_vm1, %v1921_v48, 0.0 }
 0x22a   : > { %824 = vadd.xlane.f32.xlu1 %v823_v49  ;;  %v2084_v49 = vmov 32.0  }
 0x22b   : > { %v878_v50 = vpop.xlane.xlu2 %877 }
 0x22c   : > { %v879_v53 = vsub.f32 %v875_v34, %v878_v50  ;;  %v1839_v34 = vld [vmem:[%s2508_s0 + $0x8] sm:$0xff] }
 0x22d   : > { %1072 = vmatpush.bf16.msra.mxu0 %v1839_v34  ;;  %v1843_v50 = vld [vmem:[%s2470_s10 + $0x8] sm:$0xff] }
 0x22e   : > { %v880_v55 = vmul.f32 1.442695, %v879_v53  ;;  %1186 = vmatpush.bf16.msra.mxu3 %v1843_v50 }
 0x231   : > { %1073 = vmatpush.bf16.msra.mxu0 %v1838_v35 }
 0x233   : > { %v936_v51 = vpop.xlane.xlu2 %935 }
 0x234   : > { %v937_v52 = vsub.f32 %v933_v38, %v936_v51 }
 0x236   : > { %v938_v54 = vmul.f32 1.442695, %v937_v52 }
 0x238   : > { %1922 = vpow2.f32 %v938_v54 }
 0x239   : > { %1924 = vpow2.f32 %v880_v55 }
 0x23b   : > { %v830_v56 = vpop.permute.xlu2 %829  ;;  %v994_v57 = vpop.xlane.xlu0 %993 }
 0x23c   : > { %v836_v58 = vsel %vm834_vm3, %v830_v56, 0  ;;  %v995_v60 = vsub.f32 %v991_v42, %v994_v57 }
 0x23d   : > { %845 = vmatpush.bf16.msra.mxu2 %v836_v58 }
 0x23e   : > { %v1923_v59 = vpop.eup %1922  ;;  %v996_v62 = vmul.f32 1.442695, %v995_v60 }
 0x23f   : > { %v940_v61 = vsel %vm795_vm1, %v1923_v59, 0.0  ;;  %v1925_v63 = vpop.eup %1924 }
 0x240   : > { %941 = vadd.xlane.f32.xlu0 %v940_v61  ;;  %1926 = vpow2.f32 %v996_v62  ;;  %v882_v0 = vsel %vm795_vm1, %v1925_v63, 0.0 }
 0x243   : > { %888 = vrot.lane.b32.xlu1 %v2252_v7, %s2079_s29  ;;  %v1005_v10 = vpop.permute.xlu2 %1004  ;;  %s2489_s29 = smov 24  }
 0x244   : > { %v1010_v13 = vsel %vm834_vm3, %v1005_v10, 0 }
 0x246   : > { %v1927_v1 = vpop.eup %1926 }
 0x247   : > { %v998_v3 = vsel %vm795_vm1, %v1927_v1, 0.0 }
 0x248   : > { %883 = vadd.xlane.f32.xlu0 %v882_v0 }
 0x250   : > { %999 = vadd.xlane.f32.xlu0 %v998_v3  ;;  %v1840_v3 = vld [vmem:[%s2468_s8] sm:$0xff] }
 0x264   : > { %946 = vrot.lane.b32.xlu0 %v2252_v7, %s2080_s23  ;;  %s2512_s23 = sld [smem:[#allocation15_spill]] }
 0x29d   : > { %v825_v4 = vpop.xlane.xlu1 %824 }
 0x29e   : > { %1928 = vrcp.f32 %v825_v4 }
 0x2a4   : > { %v1929_v5 = vpop.eup %1928 }
 0x2a5   : > { %v827_v6 = vmul.f32 %v1929_v5, %v1921_v48 }
 0x2a7   : > { %v828_v8 = vpack.c.bf16 %v827_v6, %v827_v6 }
 0x2a9   : > { %1756 = vmatmul.msk.bf16.vlgmr.msra.gmra.mxu2 %vm795_vm1, %v828_v8  ;;  %v1911_v8 = vld [vmem:[%s2471_s11] ss:$0 sm:$0xff] }
 0x2b3   : > { %v942_v9 = vpop.xlane.xlu0 %941 }
 0x2b5   : > { %v889_v11 = vpop.permute.xlu1 %888 }
 0x2b6   : > { %v894_v12 = vsel %vm834_vm3, %v889_v11, 0 }
 0x2b7   : > { %903 = vmatpush.bf16.msrb.mxu2 %v894_v12 }
 0x2bb   : > { %1019 = vmatpush.bf16.msra.mxu2 %v1010_v13  ;;  %v884_v14 = vpop.xlane.xlu0 %883 }
 0x2bc   : > { %1930 = vrcp.f32 %v884_v14 }
 0x2c2   : > { %v1931_v15 = vpop.eup %1930 }
 0x2c3   : > { %v886_v7 = vmul.f32 %v1931_v15, %v1925_v63  ;;  %v1000_v16 = vpop.xlane.xlu0 %999 }
 0x2c4   : > { %1932 = vrcp.f32 %v1000_v16 }
 0x2c5   : > { %v887_v17 = vpack.c.bf16 %v886_v7, %v886_v7  ;;  %1934 = vrcp.f32 %v942_v9 }
 0x2c6   : > { %1936 = vrcp.f32 %v2084_v49 }
 0x2c7   : > { %1758 = vmatmul.msk.bf16.vlgmr.msrb.gmra.mxu2 %vm795_vm1, %v887_v17 }
 0x2ca   : > { %v1933_v18 = vpop.eup %1932 }
 0x2cb   : > { %v1002_v19 = vmul.f32 %v1933_v18, %v1927_v1  ;;  %v1935_v20 = vpop.eup %1934  ;;  %v1841_v1 = vld [vmem:[%s2468_s8 + $0x8] sm:$0xff] }
 0x2cc   : > { %v944_v21 = vmul.f32 %v1935_v20, %v1923_v59  ;;  %v1937_v53 = vpop.eup %1936  ;;  %v1909_v20 = vld [vmem:[%s2512_s23] ss:$0 sm:$0xff]  ;;  %s2519_s23 = smov 16  }
 0x2cd   : > { %v1003_v22 = vpack.c.bf16 %v1002_v19, %v1002_v19  ;;  %v1084_v55 = vmul.f32 32.0, %v1937_v53  ;;  %vm1088_vm6 = vweird.f32 %v1937_v53 }
 0x2ce   : > { %v945_v25 = vpack.c.bf16 %v944_v21, %v944_v21 }
 0x2cf   : > { %v1085_v56 = vsub.f32 1.0, %v1084_v55 }
 0x2d1   : > { %v1086_v57 = vmul.f32 %v1937_v53, %v1085_v56 }
 0x2d3   : > { %v1087_v58 = vadd.f32 %v1937_v53, %v1086_v57 }
 0x2d5   : > { %v2326_v59 = vsel %vm1088_vm6, %v1937_v53, %v1087_v58 }
 0x2d6   : > { %v947_v23 = vpop.permute.xlu0 %946 }
 0x2d7   : > { %1762 = vmatmul.msk.bf16.vlgmr.msra.gmra.mxu2 %vm795_vm1, %v1003_v22  ;;  %v952_v24 = vsel %vm834_vm3, %v947_v23, 0  ;;  %v1910_v22 = vld [vmem:[%s2467_s7] ss:$0 sm:$0xff] }
 0x2d8   : > { %961 = vmatpush.bf16.msrb.mxu1 %v952_v24 }
 0x2db   : > { %1760 = vmatmul.msk.bf16.vlgmr.msrb.gmra.mxu1 %vm795_vm1, %v945_v25 }
 0x2dc   : > { %1149 = vmatpush.bf16.msra.mxu1 %v1841_v1 }
 0x2e0   : > { %1150 = vmatpush.bf16.msra.mxu1 %v1840_v3 }
 0x32c   : > { %v847_v26 = vpop.f32.mrf.mxu2 }
 0x334   : > { %v849_v27 = vpop.f32.mrf.mxu2 }
 0x34a   : > { %v905_v28 = vpop.f32.mrf.mxu2 }
 0x34b   : > { %1026 = vrot.lane.b32.xlu1 %v905_v28, %s2491_s27  ;;  %s2510_s27 = sld [smem:[#allocation10_spill]] }
 0x351   : > { %s738_s24 = scalar_lea.vmem %s2510_s27, %s1835_s25  ;;  %s2517_s25 = smov 80  }
 0x352   : > { %v907_v29 = vpop.f32.mrf.mxu2  ;;  %v745_v51 = vld [vmem:[%s738_s24] sm:$0xff]  ;;  %v746_v52 = vld [vmem:[%s738_s24 + $0x8] sm:$0x3]  ;;  %s2521_s27 = sshll.u32 %s2523_s4, 3 }
 0x353   : > { %v1156_v54 = vpack.c.bf16 %v746_v52, %v745_v51  ;;  %v1912_v29 = vld [vmem:[%s2469_s9] ss:$0 sm:$0xff] }
 0x358   : > { %v963_v30 = vpop.f32.mrf.mxu1 }
 0x359   : > { %1030 = vrot.lane.b32.xlu2 %v963_v30, %s2490_s28  ;;  %s2513_s28 = smov 104  }
 0x35a   : > { %v1021_v31 = vpop.f32.mrf.mxu2 }
 0x35b   : > { %1034 = vrot.lane.b32.xlu1 %v1021_v31, %s2489_s29  ;;  %s2515_s29 = smov 72  }
 0x360   : > { %v965_v32 = vpop.f32.mrf.mxu1 }
 0x362   : > { %v1023_v33 = vpop.f32.mrf.mxu2 }
 0x3b3   : > { %v1031_v38 = vpop.permute.xlu2 %1030 }
 0x3bd   : > { %v1027_v36 = vpop.permute.xlu1 %1026 }
 0x3be   : > { %v1037_v37 = vsel %vm795_vm1, %v847_v26, %v1027_v36 }
 0x3bf   : > { %v1039_v40 = vsel %vm1038_vm4, %v1037_v37, %v1031_v38 }
 0x3cd   : > { %v1035_v39 = vpop.permute.xlu1 %1034 }
 0x3ce   : > { %v1041_v41 = vsel %vm1040_vm5, %v1039_v40, %v1035_v39 }
 0x3cf   : > { %v1042_v42 = vpack.c.bf16 %v1041_v41, %v1041_v41 }
 0x3d1   : > { %1771 = vmatmul.msk.bf16.vlgmr.msra.gmra.mxu0 %vm768_vm0, %v1042_v42 }
 0x44e   : > { %v1075_v44 = vpop.f32.mrf.mxu0 }
 0x44f   : > { %v1076_v45 = vadd.f32 %v1908_v43, %v1075_v44 }
 0x451   : > { %v1079_v46 = vadd.f32 %v1076_v45, %v2244_v2  ;;  %v1842_v2 = vld [vmem:[%s2470_s10] sm:$0xff] }
 0x452   : > { %1187 = vmatpush.bf16.msra.mxu3 %v1842_v2 }
 0x453   : > { %v1080_v47 = vsel %vm768_vm0, %v1079_v46, 0.0 }
 0x454   : > { %1081 = vadd.xlane.f32.xlu2 %v1080_v47 }
 0x455   : > { %1789 = vmatmul.msk.bf16.vlgmr.msra.gmra.mxu3 %vm768_vm0, %v1156_v54 }
 0x456   : > { %v1077_v48 = vpop.f32.mrf.mxu0 }
 0x4c7   : > { %v1082_v60 = vpop.xlane.xlu2 %1081 }
 0x4c8   : > { %v1090_v61 = vmul.f32 %v2326_v59, %v1082_v60 }
 0x4ca   : > { %v1091_v62 = vsub.f32 %v1079_v46, %v1090_v61 }
 0x4cc   : > { %v1092_v63 = vmul.f32 %v1091_v62, %v1091_v62 }
 0x4ce   : > { %v1093_v0 = vsel %vm768_vm0, %v1092_v63, 0.0 }
 0x4cf   : > { %1094 = vadd.xlane.f32.xlu1 %v1093_v0 }
 0x4d8   : > { %v1189_v4 = vpop.f32.mrf.mxu3 }
 0x4d9   : > { %v1190_v10 = vadd.f32 %v1911_v8, %v1189_v4 }
 0x4e0   : > { %v1191_v11 = vpop.f32.mrf.mxu3 }
 0x4e1   : > { %v1192_v12 = vadd.f32 %v1911_v8, %v1191_v11 }
 0x4e3   : > { %v2340_v13 = vpack.c.bf16 %v1192_v12, %v1190_v10 }
 0x4e5   : > { %1255 = vrot.lane.b32.xlu0 %v2340_v13, %s2070_s5  ;;  %v1200_v7 = vsel %vm795_vm1, %v2340_v13, 0 }
 0x4e6   : > { %1209 = vmatpush.bf16.xpose.msrb.mxu2 %v1200_v7 }
 0x4ed   : > { %1312 = vrot.lane.b32.xlu0 %v2340_v13, %s2511_s6 }
 0x542   : > { %v1095_v5 = vpop.xlane.xlu1 %1094 }
 0x543   : > { %v1096_v6 = vmul.f32 %v1095_v5, %v2326_v59 }
 0x545   : > { %v1097_v9 = vadd.f32 1e-05, %v1096_v6 }
 0x547   : > { %1938 = vrsqrt.f32 %v1097_v9  ;;  %vm1104_vm8 = vweird.f32 %v1097_v9 }
 0x54d   : > { %v1939_v14 = vpop.eup %1938 }
 0x54e   : > { %v1099_v15 = vmul.f32 %v1939_v14, %v1097_v9  ;;  %vm1105_vm7 = vweird.f32 %v1939_v14 }
 0x54f   : > { %vm1106_vm9 = vmor %vm1104_vm8, %vm1105_vm7 }
 0x550   : > { %v1100_v16 = vmul.f32 %v1939_v14, %v1099_v15 }
 0x552   : > { %v1101_v17 = vmul.f32 0.5, %v1100_v16 }
 0x554   : > { %v1102_v18 = vsub.f32 1.5, %v1101_v17 }
 0x556   : > { %v1103_v19 = vmul.f32 %v1939_v14, %v1102_v18 }
 0x557   : > { %v1256_v27 = vpop.permute.xlu0 %1255 }
 0x558   : > { %v1107_v21 = vsel %vm1106_vm9, %v1939_v14, %v1103_v19  ;;  %v1261_v28 = vsel %vm795_vm1, %v1256_v27, 0 }
 0x559   : > { %v1108_v23 = vmul.f32 %v1107_v21, %v1091_v62  ;;  %1270 = vmatpush.bf16.xpose.msrb.mxu1 %v1261_v28 }
 0x55b   : > { %v1113_v24 = vmul.f32 %v1909_v20, %v1108_v23 }
 0x55d   : > { %v2354_v25 = vadd.f32 %v1910_v22, %v1113_v24 }
 0x55f   : > { %v1119_v26 = vpack.c.bf16 %v2354_v25, %v2354_v25  ;;  %v1313_v34 = vpop.permute.xlu0 %1312 }
 0x560   : > { %v1318_v35 = vsel %vm795_vm1, %v1313_v34, 0 }
 0x561   : > { %1780 = vmatmul.msk.bf16.vlgmr.msra.gmra.mxu1 %vm768_vm0, %v1119_v26  ;;  %1327 = vmatpush.bf16.xpose.msra.mxu2 %v1318_v35 }
 0x5de   : > { %v1152_v30 = vpop.f32.mrf.mxu1 }
 0x5df   : > { %v1153_v31 = vadd.f32 %v1912_v29, %v1152_v30 }
 0x5e1   : > { %v1194_v32 = vpack.c.bf16 %v1153_v31, %v1153_v31 }
 0x5e3   : > { %1367 = vrot.lane.b32.xlu2 %v1194_v32, %s2513_s28  ;;  %1253 = vrot.lane.b32.xlu0 %v1194_v32, %s2070_s5  ;;  %s2514_s5 = smov 96  }
 0x5e4   : > { %1790 = vmatmul.msk.bf16.vlgmr.msrb.gmra.mxu2 %vm795_vm1, %v1194_v32 }
 0x5e6   : > { %v1154_v33 = vpop.f32.mrf.mxu1 }
 0x5eb   : > { %1369 = vrot.lane.b32.xlu0 %v2340_v13, %s2513_s28 }
 0x5f3   : > { %1310 = vrot.lane.b32.xlu0 %v1194_v32, %s2511_s6  ;;  %s2516_s6 = smov 88  }
 0x63d   : > { %v1368_v39 = vpop.permute.xlu2 %1367 }
 0x655   : > { %v1254_v36 = vpop.permute.xlu0 %1253 }
 0x656   : > { %1792 = vmatmul.msk.bf16.vlgmr.msrb.gmra.mxu1 %vm795_vm1, %v1254_v36 }
 0x65d   : > { %v1370_v37 = vpop.permute.xlu0 %1369 }
 0x65e   : > { %v1375_v38 = vsel %vm795_vm1, %v1370_v37, 0 }
 0x65f   : > { %1384 = vmatpush.bf16.xpose.msra.mxu1 %v1375_v38 }
 0x665   : > { %v1311_v40 = vpop.permute.xlu0 %1310 }
 0x666   : > { %1794 = vmatmul.msk.bf16.vlgmr.msra.gmra.mxu2 %vm795_vm1, %v1311_v40  ;;  %1796 = vmatmul.msk.bf16.vlgmr.msra.gmra.mxu1 %vm795_vm1, %v1368_v39 }
 0x667   : > { %v1211_v41 = vpop.f32.mrf.mxu2 }
 0x668   : > { %v1215_v42 = vmul.f32 0.35355338, %v1211_v41 }
 0x66a   : > { %v1217_v43 = vsel %vm1216_vm10, %v1215_v42, -inf }
 0x66b   : > { %1218 = vmax.xlane.f32.xlu0 %v1217_v43 }
 0x66f   : > { %v1213_v44 = vpop.f32.mrf.mxu2 }
 0x67f   : > { %1230 = vrot.lane.b32.xlu0 %v2340_v13, %s2514_s5 }
 0x687   : > { %1403 = vrot.lane.b32.xlu0 %v2340_v13, %s2515_s29  ;;  %s742_s29 = scalar_lea.vmem %s2482_s22, %s2521_s27 }
 0x6d3   : > { %v1272_v45 = vpop.f32.mrf.mxu1 }
 0x6d4   : > { %v1276_v46 = vmul.f32 0.35355338, %v1272_v45 }
 0x6d6   : > { %v1277_v47 = vsel %vm1216_vm10, %v1276_v46, -inf }
 0x6d7   : > { %1278 = vmax.xlane.f32.xlu1 %v1277_v47  ;;  %v1845_v47 = vld [vmem:[%s2472_s12 + $0x8] sm:$0xff] }
 0x6d8   : > { %1469 = vmatpush.bf16.msrb.mxu2 %v1845_v47 }
 0x6db   : > { %v1274_v48 = vpop.f32.mrf.mxu1 }
 0x6dc   : > { %v1844_v48 = vld [vmem:[%s2472_s12] sm:$0xff] }
 0x6dd   : > { %1470 = vmatpush.bf16.msrb.mxu2 %v1844_v48 }
 0x6de   : > { %v1219_v50 = vpop.xlane.xlu0 %1218 }
 0x6df   : > { %v1220_v2 = vsub.f32 %v1215_v42, %v1219_v50 }
 0x6e1   : > { %v1221_v55 = vmul.f32 1.442695, %v1220_v2 }
 0x6e3   : > { %v1386_v49 = vpop.f32.mrf.mxu1  ;;  %1940 = vpow2.f32 %v1221_v55  ;;  %v1913_v55 = vld [vmem:[%s2473_s13] ss:$0 sm:$0xff] }
 0x6e4   : > { %v1390_v56 = vmul.f32 0.35355338, %v1386_v49 }
 0x6e6   : > { %v1391_v61 = vsel %vm1216_vm10, %v1390_v56, -inf }
 0x6e9   : > { %v1329_v51 = vpop.f32.mrf.mxu2  ;;  %v1941_v62 = vpop.eup %1940 }
 0x6ea   : > { %v1333_v52 = vmul.f32 0.35355338, %v1329_v51  ;;  %v1223_v63 = vsel %vm1216_vm10, %v1941_v62, 0.0 }
 0x6eb   : > { %v1388_v53 = vpop.f32.mrf.mxu1 }
 0x6ec   : > { %v1334_v54 = vsel %vm1216_vm10, %v1333_v52, -inf }
 0x6ed   : > { %1335 = vmax.xlane.f32.xlu1 %v1334_v54 }
 0x6f1   : > { %v1231_v57 = vpop.permute.xlu0 %1230  ;;  %v1331_v58 = vpop.f32.mrf.mxu2 }
 0x6f2   : > { %v1237_v60 = vsel %vm1235_vm11, %v1231_v57, 0 }
 0x6f3   : > { %1246 = vmatpush.bf16.msrb.mxu0 %v1237_v60 }
 0x6f5   : > { %1392 = vmax.xlane.f32.xlu1 %v1391_v61 }
 0x6f9   : > { %v1404_v21 = vpop.permute.xlu0 %1403 }
 0x6fa   : > { %v1409_v24 = vsel %vm1235_vm11, %v1404_v21, 0 }
 0x6fd   : > { %1224 = vadd.xlane.f32.xlu1 %v1223_v63 }
 0x716   : > { %1289 = vrot.lane.b32.xlu1 %v2340_v13, %s2516_s6 }
 0x74a   : > { %v1279_v0 = vpop.xlane.xlu1 %1278 }
 0x74b   : > { %v1280_v1 = vsub.f32 %v1276_v46, %v1279_v0 }
 0x74d   : > { %v1281_v3 = vmul.f32 1.442695, %v1280_v1 }
 0x74f   : > { %1942 = vpow2.f32 %v1281_v3 }
 0x755   : > { %v1943_v4 = vpop.eup %1942 }
 0x756   : > { %v1283_v5 = vsel %vm1216_vm10, %v1943_v4, 0.0 }
 0x757   : > { %1284 = vadd.xlane.f32.xlu2 %v1283_v5  ;;  %v1851_v5 = vld [vmem:[%s2478_s18 + $0x18] sm:$0xff] }
 0x758   : > { %1592 = vmatpush.bf16.msrb.mxu1 %v1851_v5 }
 0x760   : > { %v1336_v6 = vpop.xlane.xlu1 %1335 }
 0x761   : > { %v1337_v8 = vsub.f32 %v1333_v52, %v1336_v6 }
 0x763   : > { %v1338_v9 = vmul.f32 1.442695, %v1337_v8 }
 0x765   : > { %1944 = vpow2.f32 %v1338_v9  ;;  %v1850_v9 = vld [vmem:[%s2478_s18 + $0x10] sm:$0xff] }
 0x766   : > { %1593 = vmatpush.bf16.msrb.mxu1 %v1850_v9 }
 0x768   : > { %v1393_v10 = vpop.xlane.xlu1 %1392 }
 0x769   : > { %v1394_v11 = vsub.f32 %v1390_v56, %v1393_v10 }
 0x76b   : > { %v1945_v12 = vpop.eup %1944  ;;  %v1395_v14 = vmul.f32 1.442695, %v1394_v11 }
 0x76c   : > { %v1340_v15 = vsel %vm1216_vm10, %v1945_v12, 0.0 }
 0x76d   : > { %1946 = vpow2.f32 %v1395_v14  ;;  %1341 = vadd.xlane.f32.xlu2 %v1340_v15 }
 0x770   : > { %v1225_v7 = vpop.xlane.xlu1 %1224 }
 0x771   : > { %1948 = vrcp.f32 %v1225_v7 }
 0x773   : > { %v1947_v16 = vpop.eup %1946 }
 0x774   : > { %v1397_v17 = vsel %vm1216_vm10, %v1947_v16, 0.0 }
 0x775   : > { %1398 = vadd.xlane.f32.xlu1 %v1397_v17  ;;  %v1914_v17 = vld [vmem:[%s2474_s14] ss:$0 sm:$0xff] }
 0x777   : > { %v1949_v18 = vpop.eup %1948 }
 0x778   : > { %v1227_v19 = vmul.f32 %v1949_v18, %v1941_v62 }
 0x77a   : > { %v1228_v20 = vpack.c.bf16 %v1227_v19, %v1227_v19  ;;  %v1915_v19 = vld [vmem:[%s2475_s15] ss:$0 sm:$0xff] }
 0x77c   : > { %1791 = vmatmul.msk.bf16.vlgmr.msrb.gmra.mxu0 %vm1216_vm10, %v1228_v20 }
 0x785   : > { %1346 = vrot.lane.b32.xlu2 %v2340_v13, %s2517_s25 }
 0x788   : > { %v1290_v22 = vpop.permute.xlu1 %1289 }
 0x789   : > { %v1295_v23 = vsel %vm1235_vm11, %v1290_v22, 0 }
 0x78a   : > { %1304 = vmatpush.bf16.msrb.mxu3 %v1295_v23 }
 0x78e   : > { %1418 = vmatpush.bf16.msra.mxu3 %v1409_v24  ;;  %v1849_v24 = vld [vmem:[%s2478_s18 + $0x8] sm:$0xff] }
 0x78f   : > { %1594 = vmatpush.bf16.msrb.mxu1 %v1849_v24 }
 0x7ca   : > { %v1285_v26 = vpop.xlane.xlu2 %1284 }
 0x7cb   : > { %1950 = vrcp.f32 %v1285_v26  ;;  %v1848_v26 = vld [vmem:[%s2478_s18] sm:$0xff] }
 0x7cc   : > { %1595 = vmatpush.bf16.msrb.mxu1 %v1848_v26 }
 0x7d1   : > { %v1951_v27 = vpop.eup %1950 }
 0x7d2   : > { %v1287_v28 = vmul.f32 %v1951_v27, %v1943_v4  ;;  %v1847_v4 = vld [vmem:[%s2476_s16 + $0x8] sm:$0xff]  ;;  %v1916_v27 = vld [vmem:[%s2477_s17] ss:$0 sm:$0xff] }
 0x7d4   : > { %v1288_v29 = vpack.c.bf16 %v1287_v28, %v1287_v28 }
 0x7d6   : > { %1793 = vmatmul.msk.bf16.vlgmr.msrb.gmra.mxu3 %vm1216_vm10, %v1288_v29 }
 0x7e0   : > { %v1342_v30 = vpop.xlane.xlu2 %1341 }
 0x7e1   : > { %1952 = vrcp.f32 %v1342_v30 }
 0x7e7   : > { %v1953_v31 = vpop.eup %1952 }
 0x7e8   : > { %v1344_v32 = vmul.f32 %v1953_v31, %v1945_v12  ;;  %v1347_v13 = vpop.permute.xlu2 %1346  ;;  %v1399_v33 = vpop.xlane.xlu1 %1398 }
 0x7e9   : > { %v1352_v34 = vsel %vm1235_vm11, %v1347_v13, 0  ;;  %1954 = vrcp.f32 %v1399_v33  ;;  %v1917_v13 = vld [vmem:[#allocation2] ss:$0 sm:$0xff] }
 0x7ea   : > { %v1345_v35 = vpack.c.bf16 %v1344_v32, %v1344_v32  ;;  %1361 = vmatpush.bf16.msra.mxu0 %v1352_v34 }
 0x7ed   : > { %1795 = vmatmul.msk.bf16.vlgmr.msra.gmra.mxu0 %vm1216_vm10, %v1345_v35 }
 0x7ee   : > { %1539 = vmatpush.bf16.msrb.mxu0 %v1847_v4 }
 0x7ef   : > { %v1955_v36 = vpop.eup %1954 }
 0x7f0   : > { %v1401_v37 = vmul.f32 %v1955_v36, %v1947_v16 }
 0x7f2   : > { %v1402_v38 = vpack.c.bf16 %v1401_v37, %v1401_v37 }
 0x7f4   : > { %1797 = vmatmul.msk.bf16.vlgmr.msra.gmra.mxu3 %vm1216_vm10, %v1402_v38 }
 0x7f9   : > { %v1248_v39 = vpop.f32.mrf.mxu0 }
 0x801   : > { %v1250_v40 = vpop.f32.mrf.mxu0 }
 0x859   : > { %v1306_v41 = vpop.f32.mrf.mxu3 }
 0x85a   : > { %1425 = vrot.lane.b32.xlu0 %v1306_v41, %s2518_s30 }
 0x861   : > { %v1308_v42 = vpop.f32.mrf.mxu3 }
 0x86a   : > { %v1363_v43 = vpop.f32.mrf.mxu0 }
 0x86b   : > { %1429 = vrot.lane.b32.xlu0 %v1363_v43, %s2519_s23 }
 0x872   : > { %v1365_v44 = vpop.f32.mrf.mxu0 }
 0x877   : > { %v1420_v45 = vpop.f32.mrf.mxu3 }
 0x878   : > { %1433 = vrot.lane.b32.xlu0 %v1420_v45, %s2520_s1 }
 0x87f   : > { %v1422_v46 = vpop.f32.mrf.mxu3 }
 0x8cc   : > { %v1426_v49 = vpop.permute.xlu0 %1425 }
 0x8cd   : > { %v1436_v51 = vsel %vm795_vm1, %v1248_v39, %v1426_v49 }
 0x8dd   : > { %v1430_v50 = vpop.permute.xlu0 %1429 }
 0x8de   : > { %v1437_v52 = vsel %vm1038_vm4, %v1436_v51, %v1430_v50 }
 0x8ea   : > { %v1434_v2 = vpop.permute.xlu0 %1433 }
 0x8eb   : > { %v1438_v53 = vsel %vm1040_vm5, %v1437_v52, %v1434_v2  ;;  %v1918_v52 = vld [vmem:[#allocation4] ss:$0 sm:$0xff] }
 0x8ec   : > { %v1439_v54 = vpack.c.bf16 %v1438_v53, %v1438_v53  ;;  %v1919_v53 = vld [vmem:[#allocation6] ss:$0 sm:$0xff] }
 0x8ee   : > { %1806 = vmatmul.msk.bf16.vlgmr.msrb.gmra.mxu2 %vm768_vm0, %v1439_v54 }
 0x971   : > { %v1472_v56 = vpop.f32.mrf.mxu2 }
 0x972   : > { %v1473_v57 = vadd.f32 %v1913_v55, %v1472_v56 }
 0x974   : > { %v1476_v58 = vadd.f32 %v1473_v57, %v2354_v25  ;;  %v1846_v25 = vld [vmem:[%s2476_s16] sm:$0xff] }
 0x975   : > { %1540 = vmatpush.bf16.msrb.mxu0 %v1846_v25 }
 0x976   : > { %v1477_v60 = vsel %vm768_vm0, %v1476_v58, 0.0 }
 0x977   : > { %1478 = vadd.xlane.f32.xlu2 %v1477_v60 }
 0x979   : > { %v1474_v61 = vpop.f32.mrf.mxu2 }
 0x9ea   : > { %v1479_v62 = vpop.xlane.xlu2 %1478 }
 0x9eb   : > { %v1480_v63 = vmul.f32 %v1479_v62, %v2326_v59 }
 0x9ed   : > { %v1481_v0 = vsub.f32 %v1476_v58, %v1480_v63 }
 0x9ef   : > { %v1482_v1 = vmul.f32 %v1481_v0, %v1481_v0 }
 0x9f1   : > { %v1483_v3 = vsel %vm768_vm0, %v1482_v1, 0.0 }
 0x9f2   : > { %1484 = vadd.xlane.f32.xlu0 %v1483_v3 }
 0xa65   : > { %v1485_v6 = vpop.xlane.xlu0 %1484 }
 0xa66   : > { %v1486_v8 = vmul.f32 %v1485_v6, %v2326_v59 }
 0xa68   : > { %v1487_v10 = vadd.f32 1e-05, %v1486_v8 }
 0xa6a   : > { %1956 = vrsqrt.f32 %v1487_v10  ;;  %vm1494_vm13 = vweird.f32 %v1487_v10 }
 0xa70   : > { %v1957_v11 = vpop.eup %1956 }
 0xa71   : > { %v1489_v12 = vmul.f32 %v1957_v11, %v1487_v10  ;;  %vm1495_vm12 = vweird.f32 %v1957_v11 }
 0xa72   : > { %vm1496_vm14 = vmor %vm1494_vm13, %vm1495_vm12 }
 0xa73   : > { %v1490_v14 = vmul.f32 %v1957_v11, %v1489_v12 }
 0xa75   : > { %v1491_v15 = vmul.f32 0.5, %v1490_v14 }
 0xa77   : > { %v1492_v7 = vsub.f32 1.5, %v1491_v15 }
 0xa79   : > { %v1493_v16 = vmul.f32 %v1957_v11, %v1492_v7 }
 0xa7b   : > { %v1497_v18 = vsel %vm1496_vm14, %v1957_v11, %v1493_v16 }
 0xa7c   : > { %v1498_v20 = vmul.f32 %v1497_v18, %v1481_v0 }
 0xa7e   : > { %v1503_v21 = vmul.f32 %v1914_v17, %v1498_v20 }
 0xa80   : > { %v1508_v22 = vadd.f32 %v1915_v19, %v1503_v21 }
 0xa82   : > { %v1509_v23 = vpack.c.bf16 %v1508_v22, %v1508_v22 }
 0xa84   : > { %1815 = vmatmul.msk.bf16.vlgmr.msrb.gmra.mxu0 %vm768_vm0, %v1509_v23 }
 0xb01   : > { %v1542_v28 = vpop.f32.mrf.mxu0 }
 0xb02   : > { %v1543_v29 = vadd.f32 %v1916_v27, %v1542_v28 }
 0xb04   : > { %v1546_v30 = vmax.f32 %v1543_v29, 0.0 }
 0xb06   : > { %v1547_v31 = vpack.c.bf16 %v1546_v30, %v1546_v30 }
 0xb08   : > { %1832 = vmatmul.msk.bf16.vlgmr.msrb.gmra.mxu1 %vm1584_vm15, %v1547_v31 }
 0xb09   : > { %v1544_v32 = vpop.f32.mrf.mxu0 }
 0xb85   : > { %v1597_v33 = vpop.f32.mrf.mxu1 }
 0xb86   : > { %v1598_v34 = vadd.f32 %v1917_v13, %v1597_v33 }
 0xb88   : > { %v1601_v35 = vadd.f32 %v1598_v34, %v1508_v22 }
 0xb8a   : > { %v1602_v36 = vsel %vm768_vm0, %v1601_v35, 0.0 }
 0xb8b   : > { %1603 = vadd.xlane.f32.xlu1 %v1602_v36 }
 0xb8d   : > { %v1599_v37 = vpop.f32.mrf.mxu1 }
 0xbfe   : > { %v1604_v38 = vpop.xlane.xlu1 %1603 }
 0xbff   : > { %v1605_v39 = vmul.f32 %v1604_v38, %v2326_v59 }
 0xc01   : > { %v1606_v40 = vsub.f32 %v1601_v35, %v1605_v39 }
 0xc03   : > { %v1607_v41 = vmul.f32 %v1606_v40, %v1606_v40 }
 0xc05   : > { %v1608_v42 = vsel %vm768_vm0, %v1607_v41, 0.0 }
 0xc06   : > { %1609 = vadd.xlane.f32.xlu1 %v1608_v42 }
 0xc79   : > { %v1610_v43 = vpop.xlane.xlu1 %1609 }
 0xc7a   : > { %v1611_v44 = vmul.f32 %v1610_v43, %v2326_v59 }
 0xc7c   : > { %v1612_v45 = vadd.f32 1e-05, %v1611_v44 }
 0xc7e   : > { %1958 = vrsqrt.f32 %v1612_v45  ;;  %vm1619_vm2 = vweird.f32 %v1612_v45 }
 0xc84   : > { %v1959_v46 = vpop.eup %1958 }
 0xc85   : > { %v1614_v47 = vmul.f32 %v1959_v46, %v1612_v45  ;;  %vm1620_vm1 = vweird.f32 %v1959_v46 }
 0xc86   : > { %vm1621_vm3 = vmor %vm1619_vm2, %vm1620_vm1 }
 0xc87   : > { %v1615_v48 = vmul.f32 %v1959_v46, %v1614_v47 }
 0xc89   : > { %v1616_v49 = vmul.f32 0.5, %v1615_v48 }
 0xc8b   : > { %v1617_v50 = vsub.f32 1.5, %v1616_v49 }
 0xc8d   : > { %v1618_v51 = vmul.f32 %v1959_v46, %v1617_v50 }
 0xc8f   : > { %v1622_v2 = vsel %vm1621_vm3, %v1959_v46, %v1618_v51 }
 0xc90   : > { %v1623_v54 = vmul.f32 %v1622_v2, %v1606_v40 }
 0xc92   : > { %v1628_v55 = vmul.f32 %v1918_v52, %v1623_v54 }
 0xc94   : > { %v1633_v59 = vadd.f32 %v1919_v53, %v1628_v55 }
 0xc96   : > { %1634 = vst.msk [vmem:[%s742_s29] sm:$0xff] %vm768_vm0, %v1633_v59 }
 0xc97 PF: > { %s34_s3 = sadd.s32 1, %s2064_s3  }
 0xc98   : > { %p31_p7 = scmp.ge.s32.totalorder %s34_s3, 4  }
 0xc9a   :  { %33 = sbr.rel (!%p31_p7) target bundleno = 10 (0xa), region = 154 }
 0xc9f   :  { %1654 = vsyncpa [#allocation3], 1 }
 0xca0   :  { %1656 = vsyncpa [#allocation3 + $0x1], 1 }
 0xca1   :  { %1657 = vsyncpa [#allocation5], 1 }

</bundles_post_ra>
